<compile_context>
chip_gen: v7x
topology: tpu7x:2x2x1
jax: 0.10.0
libtpu: 0.0.40
codegen_flags: <defaults>
</compile_context>

<pallas_src>
import functools

import jax
import jax.numpy as jnp
from jax.experimental import pallas as pl
from jax.experimental.pallas import tpu as pltpu


# ---------------------------------------------------------------- config ----
class Config:
    in_channels = 3
    out_channels = 3
    encoder_channels = (8, 16, 32)
    decoder_channels = (32, 16, 8)
    kernel_size = 4          # ks=4, stride=2, pad=1 halves / doubles spatial dims
    latent_dim = 16
    image_size = 32          # 32 -> 16 -> 8 -> 4 (flatten expects C*4*4)


BN_EPS = 1e-5


# --------------------------------------------------------------- kernels ----
def _fold_phases(v, phases, c):
    """(1, phases*c) -> (1, c): sum per-phase column groups (static lane slices)."""
    if phases == 1:
        return v
    out = v[:, :c]
    for p in range(1, phases):
        out = out + v[:, p * c:(p + 1) * c]
    return out


def _tile_phases(v, phases):
    """(1, c) -> (1, phases*c): repeat the per-channel vector for every phase."""
    if phases == 1:
        return v
    return jnp.concatenate([v] * phases, axis=1)


def _conv_bn_relu_kernel(a_ref, w_ref, bias_ref, g_ref, b_ref, o_ref, *, phases):
    """Fused layer: (M,K)@(K,N) + bias -> BatchNorm(batch stats) -> ReLU.

    For ConvTranspose layers N = phases*C: the output columns are the subpixel
    phases of C channels and the BN statistics are folded across phases here.
    Matmul result, stats and the normalized activation all stay in VMEM; the
    activation is written to HBM exactly once (bf16)."""
    y = jnp.dot(a_ref[...], w_ref[...], preferred_element_type=jnp.float32)
    y = y + bias_ref[...]
    m = y.shape[0]
    c = y.shape[1] // phases
    inv_count = 1.0 / float(m * phases)

    col_sum = jnp.sum(y, axis=0, keepdims=True)                 # (1, phases*c)
    mean = _fold_phases(col_sum, phases, c) * inv_count         # (1, c)
    yc = y - _tile_phases(mean, phases)                         # centered, f32
    col_sq = jnp.sum(yc * yc, axis=0, keepdims=True)
    var = _fold_phases(col_sq, phases, c) * inv_count           # biased variance
    scale = g_ref[...] * jax.lax.rsqrt(var + BN_EPS)            # (1, c)
    out = yc * _tile_phases(scale, phases) + _tile_phases(b_ref[...], phases)
    o_ref[...] = jnp.maximum(out, 0.0).astype(o_ref.dtype)


def _mm_bias_tanh_kernel(a_ref, w_ref, bias_ref, o_ref):
    y = jnp.dot(a_ref[...], w_ref[...], preferred_element_type=jnp.float32)
    o_ref[...] = jnp.tanh(y + bias_ref[...]).astype(o_ref.dtype)


def _head_reparam_fc_kernel(h_ref, wh_ref, bh_ref, eps_ref, wf_ref, bf_ref,
                            mu_ref, lv_ref, d_ref, *, latent):
    """mu/logvar heads + reparameterize + decoder fc fused into one kernel."""
    head = jnp.dot(h_ref[...], wh_ref[...],
                   preferred_element_type=jnp.float32) + bh_ref[...]
    mu = head[:, :latent]
    lv = head[:, latent:]
    z = mu + jnp.exp(0.5 * lv) * eps_ref[...]
    d = jnp.dot(z.astype(wf_ref.dtype), wf_ref[...],
                preferred_element_type=jnp.float32) + bf_ref[...]
    mu_ref[...] = mu
    lv_ref[...] = lv
    d_ref[...] = d.astype(d_ref.dtype)


# ------------------------------------------------------------- wrappers ----
_SINGLE_STEP = pltpu.CompilerParams(dimension_semantics=("arbitrary",))


def _full_spec(shape):
    nd = len(shape)
    return pl.BlockSpec(shape, lambda i: (0,) * nd)


def fused_conv_bn_relu_mm(a, w, bias, gamma, beta, phases):
    """Whole conv/deconv layer in one single-grid-step pallas_call (M <= 512)."""
    M, K = a.shape
    N = w.shape[1]
    C = N // phases
    bias_v = jnp.zeros((N,), jnp.float32) if bias is None else bias
    # TODO(synk): sub-128-lane outputs (N = 8..64) lower to masked stores; a
    # lane-dense (M*N/128, 128) relayout was considered but the in-kernel
    # cross-lane reshape costs more XLU work than the masked vst saves here.
    return pl.pallas_call(
        functools.partial(_conv_bn_relu_kernel, phases=phases),
        out_shape=jax.ShapeDtypeStruct((M, N), jnp.bfloat16),
        grid=(1,),
        in_specs=[_full_spec((M, K)), _full_spec((K, N)), _full_spec((1, N)),
                  _full_spec((1, C)), _full_spec((1, C))],
        out_specs=_full_spec((M, N)),
        compiler_params=_SINGLE_STEP,
    )(a.astype(jnp.bfloat16), w.astype(jnp.bfloat16),
      bias_v.reshape(1, N).astype(jnp.float32),
      gamma.reshape(1, C).astype(jnp.float32),
      beta.reshape(1, C).astype(jnp.float32))


def fused_mm_bias_tanh(a, w, bias):
    M, K = a.shape
    N = w.shape[1]
    return pl.pallas_call(
        _mm_bias_tanh_kernel,
        out_shape=jax.ShapeDtypeStruct((M, N), jnp.float32),
        grid=(1,),
        in_specs=[_full_spec((M, K)), _full_spec((K, N)), _full_spec((1, N))],
        out_specs=_full_spec((M, N)),
        compiler_params=_SINGLE_STEP,
    )(a.astype(jnp.bfloat16), w.astype(jnp.bfloat16),
      bias.reshape(1, N).astype(jnp.float32))


def head_reparam_fc(hflat, w_head, b_head, eps, w_fc, b_fc):
    """(mu|logvar) head matmul + reparameterize + decoder fc in one kernel."""
    B, F = hflat.shape
    H2 = w_head.shape[1]
    ld = H2 // 2
    D = w_fc.shape[1]
    return pl.pallas_call(
        functools.partial(_head_reparam_fc_kernel, latent=ld),
        out_shape=(jax.ShapeDtypeStruct((B, ld), jnp.float32),
                   jax.ShapeDtypeStruct((B, ld), jnp.float32),
                   jax.ShapeDtypeStruct((B, D), jnp.bfloat16)),
        grid=(1,),
        in_specs=[_full_spec((B, F)), _full_spec((F, H2)), _full_spec((1, H2)),
                  _full_spec((B, ld)), _full_spec((ld, D)), _full_spec((1, D))],
        out_specs=(_full_spec((B, ld)), _full_spec((B, ld)), _full_spec((B, D))),
        compiler_params=_SINGLE_STEP,
    )(hflat.astype(jnp.bfloat16), w_head.astype(jnp.bfloat16),
      b_head.reshape(1, H2).astype(jnp.float32), eps.astype(jnp.float32),
      w_fc.astype(jnp.bfloat16), b_fc.reshape(1, D).astype(jnp.float32))


# -------------------------------------------------- conv glue (plain JAX) ----
def _im2col_nhwc(x, ks, stride, pad):
    # TODO(synk): window extraction stays in plain JAX (pad + slice + concat);
    # every patch tensor here is < 300 KB in bf16, so it is left to XLA rather
    # than streaming strided windows with in-kernel DMA.
    N, H, W, C = x.shape
    xp = jnp.pad(x, ((0, 0), (pad, pad), (pad, pad), (0, 0)))
    OH = (H + 2 * pad - ks) // stride + 1
    OW = (W + 2 * pad - ks) // stride + 1
    cols = []
    for ky in range(ks):
        for kx in range(ks):
            cols.append(xp[:, ky:ky + stride * OH:stride,
                           kx:kx + stride * OW:stride, :])
    patches = jnp.concatenate(cols, axis=-1)  # (N, OH, OW, ks*ks*C), (ky,kx,c)
    return patches, OH, OW


def conv_bn_relu(x_nhwc, wmat, bias, gamma, beta):
    """Conv2d(ks=4, s=2, p=1) -> BatchNorm2d(train stats) -> ReLU, one kernel."""
    N, _, _, Cin = x_nhwc.shape
    ks = Config.kernel_size
    patches, OH, OW = _im2col_nhwc(x_nhwc, ks, 2, 1)
    A = patches.reshape(N * OH * OW, ks * ks * Cin)
    y = fused_conv_bn_relu_mm(A, wmat, bias, gamma, beta, phases=1)
    return y.reshape(N, OH, OW, -1)


def _interleave_phases(y, N, H, W, Cout):
    # y: (N*H*W, 4*Cout), columns ordered [py=0,px=0 | py=0,px=1 | py=1,px=0 | py=1,px=1]
    y = y.reshape(N, H, W, 2, 2, Cout)
    return y.transpose(0, 1, 3, 2, 4, 5).reshape(N, 2 * H, 2 * W, Cout)


def deconv_bn_relu(x_nhwc, bmat, gamma, beta):
    """ConvTranspose2d(ks=4, s=2, p=1, bias=False) -> BatchNorm2d -> ReLU."""
    N, H, W, Cin = x_nhwc.shape
    Cout = bmat.shape[1] // 4
    patches, _, _ = _im2col_nhwc(x_nhwc, 3, 1, 1)
    A = patches.reshape(N * H * W, 9 * Cin)
    y = fused_conv_bn_relu_mm(A, bmat, None, gamma, beta, phases=4)
    return _interleave_phases(y, N, H, W, Cout)


def deconv_tanh(x_nhwc, bmat, bias_cat):
    """Final ConvTranspose2d(ks=4, s=2, p=1, bias=True) -> Tanh (f32 output)."""
    N, H, W, Cin = x_nhwc.shape
    Cout = bmat.shape[1] // 4
    patches, _, _ = _im2col_nhwc(x_nhwc, 3, 1, 1)
    A = patches.reshape(N * H * W, 9 * Cin)
    y = fused_mm_bias_tanh(A, bmat, bias_cat)
    return _interleave_phases(y, N, H, W, Cout)


# ------------------------------------------------------------ parameters ----
def init_params(key):
    ks = Config.kernel_size
    ec, dc, ld = Config.encoder_channels, Config.decoder_channels, Config.latent_dim
    feat = ec[2] * 4 * 4
    keys = jax.random.split(key, 9)

    def w(k, shape):
        return jax.random.normal(k, shape, jnp.float32) * 0.05

    return {
        # encoder Conv2d weights (PyTorch layout (Cout, Cin, KH, KW))
        "ew1": w(keys[0], (ec[0], Config.in_channels, ks, ks)),
        "ew2": w(keys[1], (ec[1], ec[0], ks, ks)),
        "ew3": w(keys[2], (ec[2], ec[1], ks, ks)),
        "ebias3": jnp.zeros((ec[2],), jnp.float32),       # conv3 has bias=True
        "eg1": jnp.ones((ec[0],), jnp.float32), "eb1": jnp.zeros((ec[0],), jnp.float32),
        "eg2": jnp.ones((ec[1],), jnp.float32), "eb2": jnp.zeros((ec[1],), jnp.float32),
        "eg3": jnp.ones((ec[2],), jnp.float32), "eb3": jnp.zeros((ec[2],), jnp.float32),
        # latent heads (PyTorch Linear layout (out, in))
        "w_mu": w(keys[3], (ld, feat)), "b_mu": jnp.zeros((ld,), jnp.float32),
        "w_lv": w(keys[4], (ld, feat)), "b_lv": jnp.zeros((ld,), jnp.float32),
        # decoder fc
        "w_fc": w(keys[5], (dc[0] * 4 * 4, ld)),
        "b_fc": jnp.zeros((dc[0] * 4 * 4,), jnp.float32),
        # decoder ConvTranspose2d weights (PyTorch layout (Cin, Cout, KH, KW))
        "dw1": w(keys[6], (dc[0], dc[1], ks, ks)),
        "dw2": w(keys[7], (dc[1], dc[2], ks, ks)),
        "dw3": w(keys[8], (dc[2], Config.out_channels, ks, ks)),
        "dbias3": jnp.zeros((Config.out_channels,), jnp.float32),
        "dg1": jnp.ones((dc[1],), jnp.float32), "db1": jnp.zeros((dc[1],), jnp.float32),
        "dg2": jnp.ones((dc[2],), jnp.float32), "db2": jnp.zeros((dc[2],), jnp.float32),
    }


def _make_deconv_matrix(w_iohw, bias):
    """ConvTranspose2d(ks=4, stride=2, pad=1) -> (9*Cin, 4*Cout) matrix for a
    3x3 stride-1 conv over the *undilated* input.  Per spatial dim and output
    phase p:  out[2i] = x[i]*w[1] + x[i-1]*w[3],  out[2i+1] = x[i]*w[2] + x[i+1]*w[0],
    so each phase uses only 2 of the 3 neighborhood offsets (no zero-dilated taps)."""
    Cin, Cout = w_iohw.shape[0], w_iohw.shape[1]
    tap = ({-1: 3, 0: 1, 1: None},    # phase 0
           {-1: None, 0: 2, 1: 0})    # phase 1
    cols = []
    for py in (0, 1):
        for px in (0, 1):
            wp = jnp.zeros((3, 3, Cin, Cout), jnp.float32)
            for dy in (-1, 0, 1):
                ky = tap[py][dy]
                if ky is None:
                    continue
                for dx in (-1, 0, 1):
                    kx = tap[px][dx]
                    if kx is None:
                        continue
                    wp = wp.at[dy + 1, dx + 1].set(w_iohw[:, :, ky, kx])
            cols.append(wp.reshape(9 * Cin, Cout))
    bmat = jnp.concatenate(cols, axis=1)
    bias_cat = None if bias is None else jnp.tile(bias, 4)
    return bmat, bias_cat


def prepare_params(p):
    """One-time conversion of PyTorch-layout weights into matmul-ready (bf16) matrices."""
    ks = Config.kernel_size
    q = {}
    for name in ("ew1", "ew2", "ew3"):
        w = p[name]                                    # (Cout, Cin, KH, KW)
        q[name] = jnp.transpose(w, (2, 3, 1, 0)).reshape(
            ks * ks * w.shape[1], w.shape[0]).astype(jnp.bfloat16)
    q["ebias3"] = p["ebias3"]
    for name in ("eg1", "eb1", "eg2", "eb2", "eg3", "eb3",
                 "dg1", "db1", "dg2", "db2"):
        q[name] = p[name]
    # fused mu/logvar head: (feat, 2*latent), columns = [mu | logvar]
    q["w_head"] = jnp.concatenate([p["w_mu"].T, p["w_lv"].T], axis=1).astype(jnp.bfloat16)
    q["b_head"] = jnp.concatenate([p["b_mu"], p["b_lv"]])
    q["w_fc"] = p["w_fc"].T.astype(jnp.bfloat16)       # (latent, dc0*4*4)
    q["b_fc"] = p["b_fc"]
    dw1, _ = _make_deconv_matrix(p["dw1"], None)
    dw2, _ = _make_deconv_matrix(p["dw2"], None)
    dw3, dbias3 = _make_deconv_matrix(p["dw3"], p["dbias3"])
    q["dw1"] = dw1.astype(jnp.bfloat16)
    q["dw2"] = dw2.astype(jnp.bfloat16)
    q["dw3"] = dw3.astype(jnp.bfloat16)
    q["dbias3"] = dbias3
    return q


# ---------------------------------------------------------------- forward ----
def vae_forward(x_nchw, q, eps):
    x = jnp.transpose(x_nchw, (0, 2, 3, 1)).astype(jnp.bfloat16)   # NCHW -> NHWC
    N = x.shape[0]

    # ----- Encoder (3 fused conv+BN+ReLU kernels) -----
    h = conv_bn_relu(x, q["ew1"], None, q["eg1"], q["eb1"])
    h = conv_bn_relu(h, q["ew2"], None, q["eg2"], q["eb2"])
    h = conv_bn_relu(h, q["ew3"], q["ebias3"], q["eg3"], q["eb3"])
    # channel-major (NCHW) flatten to match PyTorch nn.Flatten semantics
    # (the reference stores the Flatten in a tuple; we implement the intent).
    hflat = jnp.transpose(h, (0, 3, 1, 2)).reshape(N, -1)

    # ----- latent heads + reparameterize + decoder fc (one kernel) -----
    mu, logvar, d = head_reparam_fc(hflat, q["w_head"], q["b_head"], eps,
                                    q["w_fc"], q["b_fc"])

    # ----- Decoder (2 fused deconv+BN+ReLU kernels + 1 deconv+tanh kernel) -----
    d = d.reshape(N, Config.decoder_channels[0], 4, 4).transpose(0, 2, 3, 1)   # NHWC
    d = deconv_bn_relu(d, q["dw1"], q["dg1"], q["db1"])
    d = deconv_bn_relu(d, q["dw2"], q["dg2"], q["db2"])
    d = deconv_tanh(d, q["dw3"], q["dbias3"])
    recon = jnp.transpose(d, (0, 3, 1, 2))                   # NHWC -> NCHW
    return recon, mu, logvar


# ------------------------------------------------------------------- main ----
if __name__ == "__main__":
    key = jax.random.PRNGKey(0)
    k_x, k_p, k_eps = jax.random.split(key, 3)

    batch = 2
    x = jax.random.normal(
        k_x, (batch, Config.in_channels, Config.image_size, Config.image_size),
        jnp.float32)
    params = init_params(k_p)
    prepped = prepare_params(params)       # one-time weight re-layout (outside jit)
    eps = jax.random.normal(k_eps, (batch, Config.latent_dim), jnp.float32)

    recon, mu, logvar = jax.jit(vae_forward)(x, prepped, eps)
    jax.block_until_ready((recon, mu, logvar))

    assert recon.shape == (batch, Config.out_channels,
                           Config.image_size, Config.image_size)
    assert mu.shape == (batch, Config.latent_dim)
    assert logvar.shape == (batch, Config.latent_dim)
    print("KERNEL_OK")
</pallas_src>

<mosaic_0001>
module attributes {stable_mosaic.version = 11 : i64} {
  func.func @_conv_bn_relu_kernel(%arg0: i32, %arg1: memref<512x48xbf16, #tpu.memory_space<vmem>>, %arg2: memref<48x8xbf16, #tpu.memory_space<vmem>>, %arg3: memref<1x8xf32, #tpu.memory_space<vmem>>, %arg4: memref<1x8xf32, #tpu.memory_space<vmem>>, %arg5: memref<1x8xf32, #tpu.memory_space<vmem>>, %arg6: memref<512x8xbf16, #tpu.memory_space<vmem>>) attributes {dimension_semantics = [#tpu.dimension_semantics<arbitrary>], iteration_bounds = array<i64: 1>, scalar_prefetch = 0 : i64, scratch_operands = 0 : i64, tpu.core_type = #tpu.core_type<tc>, window_params = [{pipeline_mode = #tpu.pipeline_mode<synchronous>, transform_indices = @transform_0, window_bounds = array<i64: 512, 48>}, {pipeline_mode = #tpu.pipeline_mode<synchronous>, transform_indices = @transform_1, window_bounds = array<i64: 48, 8>}, {pipeline_mode = #tpu.pipeline_mode<synchronous>, transform_indices = @transform_2, window_bounds = array<i64: 1, 8>}, {pipeline_mode = #tpu.pipeline_mode<synchronous>, transform_indices = @transform_3, window_bounds = array<i64: 1, 8>}, {pipeline_mode = #tpu.pipeline_mode<synchronous>, transform_indices = @transform_4, window_bounds = array<i64: 1, 8>}, {pipeline_mode = #tpu.pipeline_mode<synchronous>, transform_indices = @transform_5, window_bounds = array<i64: 512, 8>}]} {
    %c0 = arith.constant 0 : index
    %c0_0 = arith.constant 0 : index
    %0 = vector.load %arg1[%c0, %c0_0] : memref<512x48xbf16, #tpu.memory_space<vmem>>, vector<512x48xbf16>
    %c0_1 = arith.constant 0 : index
    %c0_2 = arith.constant 0 : index
    %1 = vector.load %arg2[%c0_1, %c0_2] : memref<48x8xbf16, #tpu.memory_space<vmem>>, vector<48x8xbf16>
    %cst = arith.constant dense<0.000000e+00> : vector<512x8xf32>
    %2 = tpu.matmul %0, %1, %cst {dimension_numbers = #tpu.dot_dimension_numbers<[1], [0], [0], [1], [0, 0, 1, 1], [], []>} : vector<512x48xbf16>, vector<48x8xbf16>, vector<512x8xf32> -> vector<512x8xf32>
    %c0_3 = arith.constant 0 : index
    %c0_4 = arith.constant 0 : index
    %3 = vector.load %arg3[%c0_3, %c0_4] : memref<1x8xf32, #tpu.memory_space<vmem>>, vector<1x8xf32>
    %4 = vector.broadcast %3 : vector<1x8xf32> to vector<512x8xf32>
    %5 = arith.addf %2, %4 : vector<512x8xf32>
    %cst_5 = arith.constant dense<0.000000e+00> : vector<8xf32>
    %6 = vector.multi_reduction <add>, %5, %cst_5 [0] : vector<512x8xf32> to vector<8xf32>
    %7 = vector.shape_cast %6 : vector<8xf32> to vector<1x8xf32>
    %cst_6 = arith.constant 0.001953125 : f32
    %8 = vector.broadcast %cst_6 : f32 to vector<1x8xf32>
    %9 = arith.mulf %7, %8 : vector<1x8xf32>
    %10 = vector.broadcast %9 : vector<1x8xf32> to vector<512x8xf32>
    %11 = arith.subf %5, %10 : vector<512x8xf32>
    %12 = arith.mulf %11, %11 : vector<512x8xf32>
    %cst_7 = arith.constant dense<0.000000e+00> : vector<8xf32>
    %13 = vector.multi_reduction <add>, %12, %cst_7 [0] : vector<512x8xf32> to vector<8xf32>
    %14 = vector.shape_cast %13 : vector<8xf32> to vector<1x8xf32>
    %cst_8 = arith.constant 0.001953125 : f32
    %15 = vector.broadcast %cst_8 : f32 to vector<1x8xf32>
    %16 = arith.mulf %14, %15 : vector<1x8xf32>
    %c0_9 = arith.constant 0 : index
    %c0_10 = arith.constant 0 : index
    %17 = vector.load %arg4[%c0_9, %c0_10] : memref<1x8xf32, #tpu.memory_space<vmem>>, vector<1x8xf32>
    %cst_11 = arith.constant 9.99999974E-6 : f32
    %18 = vector.broadcast %cst_11 : f32 to vector<1x8xf32>
    %19 = arith.addf %16, %18 : vector<1x8xf32>
    %20 = math.rsqrt %19 : vector<1x8xf32>
    %21 = arith.mulf %17, %20 : vector<1x8xf32>
    %22 = vector.broadcast %21 : vector<1x8xf32> to vector<512x8xf32>
    %23 = arith.mulf %11, %22 : vector<512x8xf32>
    %c0_12 = arith.constant 0 : index
    %c0_13 = arith.constant 0 : index
    %24 = vector.load %arg5[%c0_12, %c0_13] : memref<1x8xf32, #tpu.memory_space<vmem>>, vector<1x8xf32>
    %25 = vector.broadcast %24 : vector<1x8xf32> to vector<512x8xf32>
    %26 = arith.addf %23, %25 : vector<512x8xf32>
    %cst_14 = arith.constant 0.000000e+00 : f32
    %27 = vector.broadcast %cst_14 : f32 to vector<512x8xf32>
    %28 = arith.maximumf %26, %27 : vector<512x8xf32>
    %29 = arith.truncf %28 : vector<512x8xf32> to vector<512x8xbf16>
    %c0_15 = arith.constant 0 : index
    %c0_16 = arith.constant 0 : index
    %30 = vector.load %arg6[%c0_15, %c0_16] : memref<512x8xbf16, #tpu.memory_space<vmem>>, vector<512x8xbf16>
    tpu.vector_store %arg6[%c0_15, %c0_16], %29 {strides = array<i32>} : memref<512x8xbf16, #tpu.memory_space<vmem>>, vector<512x8xbf16>,
    return
  }
  func.func @transform_0(%arg0: i32) -> (i32, i32) {
    %c0_i32 = arith.constant 0 : i32
    %c0_i32_0 = arith.constant 0 : i32
    %c0_i32_1 = arith.constant 0 : i32
    return %c0_i32, %c0_i32_0 : i32, i32
  }
  func.func @transform_1(%arg0: i32) -> (i32, i32) {
    %c0_i32 = arith.constant 0 : i32
    %c0_i32_0 = arith.constant 0 : i32
    %c0_i32_1 = arith.constant 0 : i32
    return %c0_i32, %c0_i32_0 : i32, i32
  }
  func.func @transform_2(%arg0: i32) -> (i32, i32) {
    %c0_i32 = arith.constant 0 : i32
    %c0_i32_0 = arith.constant 0 : i32
    %c0_i32_1 = arith.constant 0 : i32
    return %c0_i32, %c0_i32_0 : i32, i32
  }
  func.func @transform_3(%arg0: i32) -> (i32, i32) {
    %c0_i32 = arith.constant 0 : i32
    %c0_i32_0 = arith.constant 0 : i32
    %c0_i32_1 = arith.constant 0 : i32
    return %c0_i32, %c0_i32_0 : i32, i32
  }
  func.func @transform_4(%arg0: i32) -> (i32, i32) {
    %c0_i32 = arith.constant 0 : i32
    %c0_i32_0 = arith.constant 0 : i32
    %c0_i32_1 = arith.constant 0 : i32
    return %c0_i32, %c0_i32_0 : i32, i32
  }
  func.func @transform_5(%arg0: i32) -> (i32, i32) {
    %c0_i32 = arith.constant 0 : i32
    %c0_i32_0 = arith.constant 0 : i32
    %c0_i32_1 = arith.constant 0 : i32
    return %c0_i32, %c0_i32_0 : i32, i32
  }
}

module attributes {stable_mosaic.version = 11 : i64} {
  func.func @_conv_bn_relu_kernel(%arg0: i32, %arg1: memref<128x128xbf16, #tpu.memory_space<vmem>>, %arg2: memref<128x16xbf16, #tpu.memory_space<vmem>>, %arg3: memref<1x16xf32, #tpu.memory_space<vmem>>, %arg4: memref<1x16xf32, #tpu.memory_space<vmem>>, %arg5: memref<1x16xf32, #tpu.memory_space<vmem>>, %arg6: memref<128x16xbf16, #tpu.memory_space<vmem>>) attributes {dimension_semantics = [#tpu.dimension_semantics<arbitrary>], iteration_bounds = array<i64: 1>, scalar_prefetch = 0 : i64, scratch_operands = 0 : i64, tpu.core_type = #tpu.core_type<tc>, window_params = [{pipeline_mode = #tpu.pipeline_mode<synchronous>, transform_indices = @transform_0, window_bounds = array<i64: 128, 128>}, {pipeline_mode = #tpu.pipeline_mode<synchronous>, transform_indices = @transform_1, window_bounds = array<i64: 128, 16>}, {pipeline_mode = #tpu.pipeline_mode<synchronous>, transform_indices = @transform_2, window_bounds = array<i64: 1, 16>}, {pipeline_mode = #tpu.pipeline_mode<synchronous>, transform_indices = @transform_3, window_bounds = array<i64: 1, 16>}, {pipeline_mode = #tpu.pipeline_mode<synchronous>, transform_indices = @transform_4, window_bounds = array<i64: 1, 16>}, {pipeline_mode = #tpu.pipeline_mode<synchronous>, transform_indices = @transform_5, window_bounds = array<i64: 128, 16>}]} {
    %c0 = arith.constant 0 : index
    %c0_0 = arith.constant 0 : index
    %0 = vector.load %arg1[%c0, %c0_0] : memref<128x128xbf16, #tpu.memory_space<vmem>>, vector<128x128xbf16>
    %c0_1 = arith.constant 0 : index
    %c0_2 = arith.constant 0 : index
    %1 = vector.load %arg2[%c0_1, %c0_2] : memref<128x16xbf16, #tpu.memory_space<vmem>>, vector<128x16xbf16>
    %cst = arith.constant dense<0.000000e+00> : vector<128x16xf32>
    %2 = tpu.matmul %0, %1, %cst {dimension_numbers = #tpu.dot_dimension_numbers<[1], [0], [0], [1], [0, 0, 1, 1], [], []>} : vector<128x128xbf16>, vector<128x16xbf16>, vector<128x16xf32> -> vector<128x16xf32>
    %c0_3 = arith.constant 0 : index
    %c0_4 = arith.constant 0 : index
    %3 = vector.load %arg3[%c0_3, %c0_4] : memref<1x16xf32, #tpu.memory_space<vmem>>, vector<1x16xf32>
    %4 = vector.broadcast %3 : vector<1x16xf32> to vector<128x16xf32>
    %5 = arith.addf %2, %4 : vector<128x16xf32>
    %cst_5 = arith.constant dense<0.000000e+00> : vector<16xf32>
    %6 = vector.multi_reduction <add>, %5, %cst_5 [0] : vector<128x16xf32> to vector<16xf32>
    %7 = vector.shape_cast %6 : vector<16xf32> to vector<1x16xf32>
    %cst_6 = arith.constant 7.812500e-03 : f32
    %8 = vector.broadcast %cst_6 : f32 to vector<1x16xf32>
    %9 = arith.mulf %7, %8 : vector<1x16xf32>
    %10 = vector.broadcast %9 : vector<1x16xf32> to vector<128x16xf32>
    %11 = arith.subf %5, %10 : vector<128x16xf32>
    %12 = arith.mulf %11, %11 : vector<128x16xf32>
    %cst_7 = arith.constant dense<0.000000e+00> : vector<16xf32>
    %13 = vector.multi_reduction <add>, %12, %cst_7 [0] : vector<128x16xf32> to vector<16xf32>
    %14 = vector.shape_cast %13 : vector<16xf32> to vector<1x16xf32>
    %cst_8 = arith.constant 7.812500e-03 : f32
    %15 = vector.broadcast %cst_8 : f32 to vector<1x16xf32>
    %16 = arith.mulf %14, %15 : vector<1x16xf32>
    %c0_9 = arith.constant 0 : index
    %c0_10 = arith.constant 0 : index
    %17 = vector.load %arg4[%c0_9, %c0_10] : memref<1x16xf32, #tpu.memory_space<vmem>>, vector<1x16xf32>
    %cst_11 = arith.constant 9.99999974E-6 : f32
    %18 = vector.broadcast %cst_11 : f32 to vector<1x16xf32>
    %19 = arith.addf %16, %18 : vector<1x16xf32>
    %20 = math.rsqrt %19 : vector<1x16xf32>
    %21 = arith.mulf %17, %20 : vector<1x16xf32>
    %22 = vector.broadcast %21 : vector<1x16xf32> to vector<128x16xf32>
    %23 = arith.mulf %11, %22 : vector<128x16xf32>
    %c0_12 = arith.constant 0 : index
    %c0_13 = arith.constant 0 : index
    %24 = vector.load %arg5[%c0_12, %c0_13] : memref<1x16xf32, #tpu.memory_space<vmem>>, vector<1x16xf32>
    %25 = vector.broadcast %24 : vector<1x16xf32> to vector<128x16xf32>
    %26 = arith.addf %23, %25 : vector<128x16xf32>
    %cst_14 = arith.constant 0.000000e+00 : f32
    %27 = vector.broadcast %cst_14 : f32 to vector<128x16xf32>
    %28 = arith.maximumf %26, %27 : vector<128x16xf32>
    %29 = arith.truncf %28 : vector<128x16xf32> to vector<128x16xbf16>
    %c0_15 = arith.constant 0 : index
    %c0_16 = arith.constant 0 : index
    %30 = vector.load %arg6[%c0_15, %c0_16] : memref<128x16xbf16, #tpu.memory_space<vmem>>, vector<128x16xbf16>
    tpu.vector_store %arg6[%c0_15, %c0_16], %29 {strides = array<i32>} : memref<128x16xbf16, #tpu.memory_space<vmem>>, vector<128x16xbf16>,
    return
  }
  func.func @transform_0(%arg0: i32) -> (i32, i32) {
    %c0_i32 = arith.constant 0 : i32
    %c0_i32_0 = arith.constant 0 : i32
    %c0_i32_1 = arith.constant 0 : i32
    return %c0_i32, %c0_i32_0 : i32, i32
  }
  func.func @transform_1(%arg0: i32) -> (i32, i32) {
    %c0_i32 = arith.constant 0 : i32
    %c0_i32_0 = arith.constant 0 : i32
    %c0_i32_1 = arith.constant 0 : i32
    return %c0_i32, %c0_i32_0 : i32, i32
  }
  func.func @transform_2(%arg0: i32) -> (i32, i32) {
    %c0_i32 = arith.constant 0 : i32
    %c0_i32_0 = arith.constant 0 : i32
    %c0_i32_1 = arith.constant 0 : i32
    return %c0_i32, %c0_i32_0 : i32, i32
  }
  func.func @transform_3(%arg0: i32) -> (i32, i32) {
    %c0_i32 = arith.constant 0 : i32
    %c0_i32_0 = arith.constant 0 : i32
    %c0_i32_1 = arith.constant 0 : i32
    return %c0_i32, %c0_i32_0 : i32, i32
  }
  func.func @transform_4(%arg0: i32) -> (i32, i32) {
    %c0_i32 = arith.constant 0 : i32
    %c0_i32_0 = arith.constant 0 : i32
    %c0_i32_1 = arith.constant 0 : i32
    return %c0_i32, %c0_i32_0 : i32, i32
  }
  func.func @transform_5(%arg0: i32) -> (i32, i32) {
    %c0_i32 = arith.constant 0 : i32
    %c0_i32_0 = arith.constant 0 : i32
    %c0_i32_1 = arith.constant 0 : i32
    return %c0_i32, %c0_i32_0 : i32, i32
  }
}

module attributes {stable_mosaic.version = 11 : i64} {
  func.func @_conv_bn_relu_kernel(%arg0: i32, %arg1: memref<32x256xbf16, #tpu.memory_space<vmem>>, %arg2: memref<256x32xbf16, #tpu.memory_space<vmem>>, %arg3: memref<1x32xf32, #tpu.memory_space<vmem>>, %arg4: memref<1x32xf32, #tpu.memory_space<vmem>>, %arg5: memref<1x32xf32, #tpu.memory_space<vmem>>, %arg6: memref<32x32xbf16, #tpu.memory_space<vmem>>) attributes {dimension_semantics = [#tpu.dimension_semantics<arbitrary>], iteration_bounds = array<i64: 1>, scalar_prefetch = 0 : i64, scratch_operands = 0 : i64, tpu.core_type = #tpu.core_type<tc>, window_params = [{pipeline_mode = #tpu.pipeline_mode<synchronous>, transform_indices = @transform_0, window_bounds = array<i64: 32, 256>}, {pipeline_mode = #tpu.pipeline_mode<synchronous>, transform_indices = @transform_1, window_bounds = array<i64: 256, 32>}, {pipeline_mode = #tpu.pipeline_mode<synchronous>, transform_indices = @transform_2, window_bounds = array<i64: 1, 32>}, {pipeline_mode = #tpu.pipeline_mode<synchronous>, transform_indices = @transform_3, window_bounds = array<i64: 1, 32>}, {pipeline_mode = #tpu.pipeline_mode<synchronous>, transform_indices = @transform_4, window_bounds = array<i64: 1, 32>}, {pipeline_mode = #tpu.pipeline_mode<synchronous>, transform_indices = @transform_5, window_bounds = array<i64: 32, 32>}]} {
    %c0 = arith.constant 0 : index
    %c0_0 = arith.constant 0 : index
    %0 = vector.load %arg1[%c0, %c0_0] : memref<32x256xbf16, #tpu.memory_space<vmem>>, vector<32x256xbf16>
    %c0_1 = arith.constant 0 : index
    %c0_2 = arith.constant 0 : index
    %1 = vector.load %arg2[%c0_1, %c0_2] : memref<256x32xbf16, #tpu.memory_space<vmem>>, vector<256x32xbf16>
    %cst = arith.constant dense<0.000000e+00> : vector<32x32xf32>
    %2 = tpu.matmul %0, %1, %cst {dimension_numbers = #tpu.dot_dimension_numbers<[1], [0], [0], [1], [0, 0, 1, 1], [], []>} : vector<32x256xbf16>, vector<256x32xbf16>, vector<32x32xf32> -> vector<32x32xf32>
    %c0_3 = arith.constant 0 : index
    %c0_4 = arith.constant 0 : index
    %3 = vector.load %arg3[%c0_3, %c0_4] : memref<1x32xf32, #tpu.memory_space<vmem>>, vector<1x32xf32>
    %4 = vector.broadcast %3 : vector<1x32xf32> to vector<32x32xf32>
    %5 = arith.addf %2, %4 : vector<32x32xf32>
    %cst_5 = arith.constant dense<0.000000e+00> : vector<32xf32>
    %6 = vector.multi_reduction <add>, %5, %cst_5 [0] : vector<32x32xf32> to vector<32xf32>
    %7 = vector.shape_cast %6 : vector<32xf32> to vector<1x32xf32>
    %cst_6 = arith.constant 3.125000e-02 : f32
    %8 = vector.broadcast %cst_6 : f32 to vector<1x32xf32>
    %9 = arith.mulf %7, %8 : vector<1x32xf32>
    %10 = vector.broadcast %9 : vector<1x32xf32> to vector<32x32xf32>
    %11 = arith.subf %5, %10 : vector<32x32xf32>
    %12 = arith.mulf %11, %11 : vector<32x32xf32>
    %cst_7 = arith.constant dense<0.000000e+00> : vector<32xf32>
    %13 = vector.multi_reduction <add>, %12, %cst_7 [0] : vector<32x32xf32> to vector<32xf32>
    %14 = vector.shape_cast %13 : vector<32xf32> to vector<1x32xf32>
    %cst_8 = arith.constant 3.125000e-02 : f32
    %15 = vector.broadcast %cst_8 : f32 to vector<1x32xf32>
    %16 = arith.mulf %14, %15 : vector<1x32xf32>
    %c0_9 = arith.constant 0 : index
    %c0_10 = arith.constant 0 : index
    %17 = vector.load %arg4[%c0_9, %c0_10] : memref<1x32xf32, #tpu.memory_space<vmem>>, vector<1x32xf32>
    %cst_11 = arith.constant 9.99999974E-6 : f32
    %18 = vector.broadcast %cst_11 : f32 to vector<1x32xf32>
    %19 = arith.addf %16, %18 : vector<1x32xf32>
    %20 = math.rsqrt %19 : vector<1x32xf32>
    %21 = arith.mulf %17, %20 : vector<1x32xf32>
    %22 = vector.broadcast %21 : vector<1x32xf32> to vector<32x32xf32>
    %23 = arith.mulf %11, %22 : vector<32x32xf32>
    %c0_12 = arith.constant 0 : index
    %c0_13 = arith.constant 0 : index
    %24 = vector.load %arg5[%c0_12, %c0_13] : memref<1x32xf32, #tpu.memory_space<vmem>>, vector<1x32xf32>
    %25 = vector.broadcast %24 : vector<1x32xf32> to vector<32x32xf32>
    %26 = arith.addf %23, %25 : vector<32x32xf32>
    %cst_14 = arith.constant 0.000000e+00 : f32
    %27 = vector.broadcast %cst_14 : f32 to vector<32x32xf32>
    %28 = arith.maximumf %26, %27 : vector<32x32xf32>
    %29 = arith.truncf %28 : vector<32x32xf32> to vector<32x32xbf16>
    %c0_15 = arith.constant 0 : index
    %c0_16 = arith.constant 0 : index
    %30 = vector.load %arg6[%c0_15, %c0_16] : memref<32x32xbf16, #tpu.memory_space<vmem>>, vector<32x32xbf16>
    tpu.vector_store %arg6[%c0_15, %c0_16], %29 {strides = array<i32>} : memref<32x32xbf16, #tpu.memory_space<vmem>>, vector<32x32xbf16>,
    return
  }
  func.func @transform_0(%arg0: i32) -> (i32, i32) {
    %c0_i32 = arith.constant 0 : i32
    %c0_i32_0 = arith.constant 0 : i32
    %c0_i32_1 = arith.constant 0 : i32
    return %c0_i32, %c0_i32_0 : i32, i32
  }
  func.func @transform_1(%arg0: i32) -> (i32, i32) {
    %c0_i32 = arith.constant 0 : i32
    %c0_i32_0 = arith.constant 0 : i32
    %c0_i32_1 = arith.constant 0 : i32
    return %c0_i32, %c0_i32_0 : i32, i32
  }
  func.func @transform_2(%arg0: i32) -> (i32, i32) {
    %c0_i32 = arith.constant 0 : i32
    %c0_i32_0 = arith.constant 0 : i32
    %c0_i32_1 = arith.constant 0 : i32
    return %c0_i32, %c0_i32_0 : i32, i32
  }
  func.func @transform_3(%arg0: i32) -> (i32, i32) {
    %c0_i32 = arith.constant 0 : i32
    %c0_i32_0 = arith.constant 0 : i32
    %c0_i32_1 = arith.constant 0 : i32
    return %c0_i32, %c0_i32_0 : i32, i32
  }
  func.func @transform_4(%arg0: i32) -> (i32, i32) {
    %c0_i32 = arith.constant 0 : i32
    %c0_i32_0 = arith.constant 0 : i32
    %c0_i32_1 = arith.constant 0 : i32
    return %c0_i32, %c0_i32_0 : i32, i32
  }
  func.func @transform_5(%arg0: i32) -> (i32, i32) {
    %c0_i32 = arith.constant 0 : i32
    %c0_i32_0 = arith.constant 0 : i32
    %c0_i32_1 = arith.constant 0 : i32
    return %c0_i32, %c0_i32_0 : i32, i32
  }
}

module attributes {stable_mosaic.version = 11 : i64} {
  func.func @_head_reparam_fc_kernel(%arg0: i32, %arg1: memref<2x512xbf16, #tpu.memory_space<vmem>>, %arg2: memref<512x32xbf16, #tpu.memory_space<vmem>>, %arg3: memref<1x32xf32, #tpu.memory_space<vmem>>, %arg4: memref<2x16xf32, #tpu.memory_space<vmem>>, %arg5: memref<16x512xbf16, #tpu.memory_space<vmem>>, %arg6: memref<1x512xf32, #tpu.memory_space<vmem>>, %arg7: memref<2x16xf32, #tpu.memory_space<vmem>>, %arg8: memref<2x16xf32, #tpu.memory_space<vmem>>, %arg9: memref<2x512xbf16, #tpu.memory_space<vmem>>) attributes {dimension_semantics = [#tpu.dimension_semantics<arbitrary>], iteration_bounds = array<i64: 1>, scalar_prefetch = 0 : i64, scratch_operands = 0 : i64, tpu.core_type = #tpu.core_type<tc>, window_params = [{pipeline_mode = #tpu.pipeline_mode<synchronous>, transform_indices = @transform_0, window_bounds = array<i64: 2, 512>}, {pipeline_mode = #tpu.pipeline_mode<synchronous>, transform_indices = @transform_1, window_bounds = array<i64: 512, 32>}, {pipeline_mode = #tpu.pipeline_mode<synchronous>, transform_indices = @transform_2, window_bounds = array<i64: 1, 32>}, {pipeline_mode = #tpu.pipeline_mode<synchronous>, transform_indices = @transform_3, window_bounds = array<i64: 2, 16>}, {pipeline_mode = #tpu.pipeline_mode<synchronous>, transform_indices = @transform_4, window_bounds = array<i64: 16, 512>}, {pipeline_mode = #tpu.pipeline_mode<synchronous>, transform_indices = @transform_5, window_bounds = array<i64: 1, 512>}, {pipeline_mode = #tpu.pipeline_mode<synchronous>, transform_indices = @transform_6, window_bounds = array<i64: 2, 16>}, {pipeline_mode = #tpu.pipeline_mode<synchronous>, transform_indices = @transform_7, window_bounds = array<i64: 2, 16>}, {pipeline_mode = #tpu.pipeline_mode<synchronous>, transform_indices = @transform_8, window_bounds = array<i64: 2, 512>}]} {
    %c0 = arith.constant 0 : index
    %c0_0 = arith.constant 0 : index
    %0 = vector.load %arg1[%c0, %c0_0] : memref<2x512xbf16, #tpu.memory_space<vmem>>, vector<2x512xbf16>
    %c0_1 = arith.constant 0 : index
    %c0_2 = arith.constant 0 : index
    %1 = vector.load %arg2[%c0_1, %c0_2] : memref<512x32xbf16, #tpu.memory_space<vmem>>, vector<512x32xbf16>
    %cst = arith.constant dense<0.000000e+00> : vector<2x32xf32>
    %2 = tpu.matmul %0, %1, %cst {dimension_numbers = #tpu.dot_dimension_numbers<[1], [0], [0], [1], [0, 0, 1, 1], [], []>} : vector<2x512xbf16>, vector<512x32xbf16>, vector<2x32xf32> -> vector<2x32xf32>
    %c0_3 = arith.constant 0 : index
    %c0_4 = arith.constant 0 : index
    %3 = vector.load %arg3[%c0_3, %c0_4] : memref<1x32xf32, #tpu.memory_space<vmem>>, vector<1x32xf32>
    %4 = vector.broadcast %3 : vector<1x32xf32> to vector<2x32xf32>
    %5 = arith.addf %2, %4 : vector<2x32xf32>
    %6 = vector.extract_strided_slice %5 {offsets = [0, 0], sizes = [2, 16], strides = [1, 1]} : vector<2x32xf32> to vector<2x16xf32>
    %7 = vector.extract_strided_slice %5 {offsets = [0, 16], sizes = [2, 16], strides = [1, 1]} : vector<2x32xf32> to vector<2x16xf32>
    %cst_5 = arith.constant 5.000000e-01 : f32
    %8 = vector.broadcast %cst_5 : f32 to vector<2x16xf32>
    %9 = arith.mulf %8, %7 : vector<2x16xf32>
    %10 = math.exp %9 : vector<2x16xf32>
    %c0_6 = arith.constant 0 : index
    %c0_7 = arith.constant 0 : index
    %11 = vector.load %arg4[%c0_6, %c0_7] : memref<2x16xf32, #tpu.memory_space<vmem>>, vector<2x16xf32>
    %12 = arith.mulf %10, %11 : vector<2x16xf32>
    %13 = arith.addf %6, %12 : vector<2x16xf32>
    %14 = arith.truncf %13 : vector<2x16xf32> to vector<2x16xbf16>
    %c0_8 = arith.constant 0 : index
    %c0_9 = arith.constant 0 : index
    %15 = vector.load %arg5[%c0_8, %c0_9] : memref<16x512xbf16, #tpu.memory_space<vmem>>, vector<16x512xbf16>
    %cst_10 = arith.constant dense<0.000000e+00> : vector<2x512xf32>
    %16 = tpu.matmul %14, %15, %cst_10 {dimension_numbers = #tpu.dot_dimension_numbers<[1], [0], [0], [1], [0, 0, 1, 1], [], []>} : vector<2x16xbf16>, vector<16x512xbf16>, vector<2x512xf32> -> vector<2x512xf32>
    %c0_11 = arith.constant 0 : index
    %c0_12 = arith.constant 0 : index
    %17 = vector.load %arg6[%c0_11, %c0_12] : memref<1x512xf32, #tpu.memory_space<vmem>>, vector<1x512xf32>
    %18 = vector.broadcast %17 : vector<1x512xf32> to vector<2x512xf32>
    %19 = arith.addf %16, %18 : vector<2x512xf32>
    %c0_13 = arith.constant 0 : index
    %c0_14 = arith.constant 0 : index
    %20 = vector.load %arg7[%c0_13, %c0_14] : memref<2x16xf32, #tpu.memory_space<vmem>>, vector<2x16xf32>
    tpu.vector_store %arg7[%c0_13, %c0_14], %6 {strides = array<i32>} : memref<2x16xf32, #tpu.memory_space<vmem>>, vector<2x16xf32>,
    %c0_15 = arith.constant 0 : index
    %c0_16 = arith.constant 0 : index
    %21 = vector.load %arg8[%c0_15, %c0_16] : memref<2x16xf32, #tpu.memory_space<vmem>>, vector<2x16xf32>
    tpu.vector_store %arg8[%c0_15, %c0_16], %7 {strides = array<i32>} : memref<2x16xf32, #tpu.memory_space<vmem>>, vector<2x16xf32>,
    %22 = arith.truncf %19 : vector<2x512xf32> to vector<2x512xbf16>
    %c0_17 = arith.constant 0 : index
    %c0_18 = arith.constant 0 : index
    %23 = vector.load %arg9[%c0_17, %c0_18] : memref<2x512xbf16, #tpu.memory_space<vmem>>, vector<2x512xbf16>
    tpu.vector_store %arg9[%c0_17, %c0_18], %22 {strides = array<i32>} : memref<2x512xbf16, #tpu.memory_space<vmem>>, vector<2x512xbf16>,
    return
  }
  func.func @transform_0(%arg0: i32) -> (i32, i32) {
    %c0_i32 = arith.constant 0 : i32
    %c0_i32_0 = arith.constant 0 : i32
    %c0_i32_1 = arith.constant 0 : i32
    return %c0_i32, %c0_i32_0 : i32, i32
  }
  func.func @transform_1(%arg0: i32) -> (i32, i32) {
    %c0_i32 = arith.constant 0 : i32
    %c0_i32_0 = arith.constant 0 : i32
    %c0_i32_1 = arith.constant 0 : i32
    return %c0_i32, %c0_i32_0 : i32, i32
  }
  func.func @transform_2(%arg0: i32) -> (i32, i32) {
    %c0_i32 = arith.constant 0 : i32
    %c0_i32_0 = arith.constant 0 : i32
    %c0_i32_1 = arith.constant 0 : i32
    return %c0_i32, %c0_i32_0 : i32, i32
  }
  func.func @transform_3(%arg0: i32) -> (i32, i32) {
    %c0_i32 = arith.constant 0 : i32
    %c0_i32_0 = arith.constant 0 : i32
    %c0_i32_1 = arith.constant 0 : i32
    return %c0_i32, %c0_i32_0 : i32, i32
  }
  func.func @transform_4(%arg0: i32) -> (i32, i32) {
    %c0_i32 = arith.constant 0 : i32
    %c0_i32_0 = arith.constant 0 : i32
    %c0_i32_1 = arith.constant 0 : i32
    return %c0_i32, %c0_i32_0 : i32, i32
  }
  func.func @transform_5(%arg0: i32) -> (i32, i32) {
    %c0_i32 = arith.constant 0 : i32
    %c0_i32_0 = arith.constant 0 : i32
    %c0_i32_1 = arith.constant 0 : i32
    return %c0_i32, %c0_i32_0 : i32, i32
  }
  func.func @transform_6(%arg0: i32) -> (i32, i32) {
    %c0_i32 = arith.constant 0 : i32
    %c0_i32_0 = arith.constant 0 : i32
    %c0_i32_1 = arith.constant 0 : i32
    return %c0_i32, %c0_i32_0 : i32, i32
  }
  func.func @transform_7(%arg0: i32) -> (i32, i32) {
    %c0_i32 = arith.constant 0 : i32
    %c0_i32_0 = arith.constant 0 : i32
    %c0_i32_1 = arith.constant 0 : i32
    return %c0_i32, %c0_i32_0 : i32, i32
  }
  func.func @transform_8(%arg0: i32) -> (i32, i32) {
    %c0_i32 = arith.constant 0 : i32
    %c0_i32_0 = arith.constant 0 : i32
    %c0_i32_1 = arith.constant 0 : i32
    return %c0_i32, %c0_i32_0 : i32, i32
  }
}

module attributes {stable_mosaic.version = 11 : i64} {
  func.func @_conv_bn_relu_kernel(%arg0: i32, %arg1: memref<32x288xbf16, #tpu.memory_space<vmem>>, %arg2: memref<288x64xbf16, #tpu.memory_space<vmem>>, %arg3: memref<1x64xf32, #tpu.memory_space<vmem>>, %arg4: memref<1x16xf32, #tpu.memory_space<vmem>>, %arg5: memref<1x16xf32, #tpu.memory_space<vmem>>, %arg6: memref<32x64xbf16, #tpu.memory_space<vmem>>) attributes {dimension_semantics = [#tpu.dimension_semantics<arbitrary>], iteration_bounds = array<i64: 1>, scalar_prefetch = 0 : i64, scratch_operands = 0 : i64, tpu.core_type = #tpu.core_type<tc>, window_params = [{pipeline_mode = #tpu.pipeline_mode<synchronous>, transform_indices = @transform_0, window_bounds = array<i64: 32, 288>}, {pipeline_mode = #tpu.pipeline_mode<synchronous>, transform_indices = @transform_1, window_bounds = array<i64: 288, 64>}, {pipeline_mode = #tpu.pipeline_mode<synchronous>, transform_indices = @transform_2, window_bounds = array<i64: 1, 64>}, {pipeline_mode = #tpu.pipeline_mode<synchronous>, transform_indices = @transform_3, window_bounds = array<i64: 1, 16>}, {pipeline_mode = #tpu.pipeline_mode<synchronous>, transform_indices = @transform_4, window_bounds = array<i64: 1, 16>}, {pipeline_mode = #tpu.pipeline_mode<synchronous>, transform_indices = @transform_5, window_bounds = array<i64: 32, 64>}]} {
    %c0 = arith.constant 0 : index
    %c0_0 = arith.constant 0 : index
    %0 = vector.load %arg1[%c0, %c0_0] : memref<32x288xbf16, #tpu.memory_space<vmem>>, vector<32x288xbf16>
    %c0_1 = arith.constant 0 : index
    %c0_2 = arith.constant 0 : index
    %1 = vector.load %arg2[%c0_1, %c0_2] : memref<288x64xbf16, #tpu.memory_space<vmem>>, vector<288x64xbf16>
    %cst = arith.constant dense<0.000000e+00> : vector<32x64xf32>
    %2 = tpu.matmul %0, %1, %cst {dimension_numbers = #tpu.dot_dimension_numbers<[1], [0], [0], [1], [0, 0, 1, 1], [], []>} : vector<32x288xbf16>, vector<288x64xbf16>, vector<32x64xf32> -> vector<32x64xf32>
    %c0_3 = arith.constant 0 : index
    %c0_4 = arith.constant 0 : index
    %3 = vector.load %arg3[%c0_3, %c0_4] : memref<1x64xf32, #tpu.memory_space<vmem>>, vector<1x64xf32>
    %4 = vector.broadcast %3 : vector<1x64xf32> to vector<32x64xf32>
    %5 = arith.addf %2, %4 : vector<32x64xf32>
    %cst_5 = arith.constant dense<0.000000e+00> : vector<64xf32>
    %6 = vector.multi_reduction <add>, %5, %cst_5 [0] : vector<32x64xf32> to vector<64xf32>
    %7 = vector.shape_cast %6 : vector<64xf32> to vector<1x64xf32>
    %8 = vector.extract_strided_slice %7 {offsets = [0, 0], sizes = [1, 16], strides = [1, 1]} : vector<1x64xf32> to vector<1x16xf32>
    %9 = vector.extract_strided_slice %7 {offsets = [0, 16], sizes = [1, 16], strides = [1, 1]} : vector<1x64xf32> to vector<1x16xf32>
    %10 = arith.addf %8, %9 : vector<1x16xf32>
    %11 = vector.extract_strided_slice %7 {offsets = [0, 32], sizes = [1, 16], strides = [1, 1]} : vector<1x64xf32> to vector<1x16xf32>
    %12 = arith.addf %10, %11 : vector<1x16xf32>
    %13 = vector.extract_strided_slice %7 {offsets = [0, 48], sizes = [1, 16], strides = [1, 1]} : vector<1x64xf32> to vector<1x16xf32>
    %14 = arith.addf %12, %13 : vector<1x16xf32>
    %cst_6 = arith.constant 7.812500e-03 : f32
    %15 = vector.broadcast %cst_6 : f32 to vector<1x16xf32>
    %16 = arith.mulf %14, %15 : vector<1x16xf32>
    %17 = tpu.concatenate %16, %16, %16, %16 in 1 : vector<1x16xf32>, vector<1x16xf32>, vector<1x16xf32>, vector<1x16xf32> -> vector<1x64xf32>
    %18 = vector.broadcast %17 : vector<1x64xf32> to vector<32x64xf32>
    %19 = arith.subf %5, %18 : vector<32x64xf32>
    %20 = arith.mulf %19, %19 : vector<32x64xf32>
    %cst_7 = arith.constant dense<0.000000e+00> : vector<64xf32>
    %21 = vector.multi_reduction <add>, %20, %cst_7 [0] : vector<32x64xf32> to vector<64xf32>
    %22 = vector.shape_cast %21 : vector<64xf32> to vector<1x64xf32>
    %23 = vector.extract_strided_slice %22 {offsets = [0, 0], sizes = [1, 16], strides = [1, 1]} : vector<1x64xf32> to vector<1x16xf32>
    %24 = vector.extract_strided_slice %22 {offsets = [0, 16], sizes = [1, 16], strides = [1, 1]} : vector<1x64xf32> to vector<1x16xf32>
    %25 = arith.addf %23, %24 : vector<1x16xf32>
    %26 = vector.extract_strided_slice %22 {offsets = [0, 32], sizes = [1, 16], strides = [1, 1]} : vector<1x64xf32> to vector<1x16xf32>
    %27 = arith.addf %25, %26 : vector<1x16xf32>
    %28 = vector.extract_strided_slice %22 {offsets = [0, 48], sizes = [1, 16], strides = [1, 1]} : vector<1x64xf32> to vector<1x16xf32>
    %29 = arith.addf %27, %28 : vector<1x16xf32>
    %cst_8 = arith.constant 7.812500e-03 : f32
    %30 = vector.broadcast %cst_8 : f32 to vector<1x16xf32>
    %31 = arith.mulf %29, %30 : vector<1x16xf32>
    %c0_9 = arith.constant 0 : index
    %c0_10 = arith.constant 0 : index
    %32 = vector.load %arg4[%c0_9, %c0_10] : memref<1x16xf32, #tpu.memory_space<vmem>>, vector<1x16xf32>
    %cst_11 = arith.constant 9.99999974E-6 : f32
    %33 = vector.broadcast %cst_11 : f32 to vector<1x16xf32>
    %34 = arith.addf %31, %33 : vector<1x16xf32>
    %35 = math.rsqrt %34 : vector<1x16xf32>
    %36 = arith.mulf %32, %35 : vector<1x16xf32>
    %37 = tpu.concatenate %36, %36, %36, %36 in 1 : vector<1x16xf32>, vector<1x16xf32>, vector<1x16xf32>, vector<1x16xf32> -> vector<1x64xf32>
    %38 = vector.broadcast %37 : vector<1x64xf32> to vector<32x64xf32>
    %39 = arith.mulf %19, %38 : vector<32x64xf32>
    %c0_12 = arith.constant 0 : index
    %c0_13 = arith.constant 0 : index
    %40 = vector.load %arg5[%c0_12, %c0_13] : memref<1x16xf32, #tpu.memory_space<vmem>>, vector<1x16xf32>
    %41 = tpu.concatenate %40, %40, %40, %40 in 1 : vector<1x16xf32>, vector<1x16xf32>, vector<1x16xf32>, vector<1x16xf32> -> vector<1x64xf32>
    %42 = vector.broadcast %41 : vector<1x64xf32> to vector<32x64xf32>
    %43 = arith.addf %39, %42 : vector<32x64xf32>
    %cst_14 = arith.constant 0.000000e+00 : f32
    %44 = vector.broadcast %cst_14 : f32 to vector<32x64xf32>
    %45 = arith.maximumf %43, %44 : vector<32x64xf32>
    %46 = arith.truncf %45 : vector<32x64xf32> to vector<32x64xbf16>
    %c0_15 = arith.constant 0 : index
    %c0_16 = arith.constant 0 : index
    %47 = vector.load %arg6[%c0_15, %c0_16] : memref<32x64xbf16, #tpu.memory_space<vmem>>, vector<32x64xbf16>
    tpu.vector_store %arg6[%c0_15, %c0_16], %46 {strides = array<i32>} : memref<32x64xbf16, #tpu.memory_space<vmem>>, vector<32x64xbf16>,
    return
  }
  func.func @transform_0(%arg0: i32) -> (i32, i32) {
    %c0_i32 = arith.constant 0 : i32
    %c0_i32_0 = arith.constant 0 : i32
    %c0_i32_1 = arith.constant 0 : i32
    return %c0_i32, %c0_i32_0 : i32, i32
  }
  func.func @transform_1(%arg0: i32) -> (i32, i32) {
    %c0_i32 = arith.constant 0 : i32
    %c0_i32_0 = arith.constant 0 : i32
    %c0_i32_1 = arith.constant 0 : i32
    return %c0_i32, %c0_i32_0 : i32, i32
  }
  func.func @transform_2(%arg0: i32) -> (i32, i32) {
    %c0_i32 = arith.constant 0 : i32
    %c0_i32_0 = arith.constant 0 : i32
    %c0_i32_1 = arith.constant 0 : i32
    return %c0_i32, %c0_i32_0 : i32, i32
  }
  func.func @transform_3(%arg0: i32) -> (i32, i32) {
    %c0_i32 = arith.constant 0 : i32
    %c0_i32_0 = arith.constant 0 : i32
    %c0_i32_1 = arith.constant 0 : i32
    return %c0_i32, %c0_i32_0 : i32, i32
  }
  func.func @transform_4(%arg0: i32) -> (i32, i32) {
    %c0_i32 = arith.constant 0 : i32
    %c0_i32_0 = arith.constant 0 : i32
    %c0_i32_1 = arith.constant 0 : i32
    return %c0_i32, %c0_i32_0 : i32, i32
  }
  func.func @transform_5(%arg0: i32) -> (i32, i32) {
    %c0_i32 = arith.constant 0 : i32
    %c0_i32_0 = arith.constant 0 : i32
    %c0_i32_1 = arith.constant 0 : i32
    return %c0_i32, %c0_i32_0 : i32, i32
  }
}

module attributes {stable_mosaic.version = 11 : i64} {
  func.func @_conv_bn_relu_kernel(%arg0: i32, %arg1: memref<128x144xbf16, #tpu.memory_space<vmem>>, %arg2: memref<144x32xbf16, #tpu.memory_space<vmem>>, %arg3: memref<1x32xf32, #tpu.memory_space<vmem>>, %arg4: memref<1x8xf32, #tpu.memory_space<vmem>>, %arg5: memref<1x8xf32, #tpu.memory_space<vmem>>, %arg6: memref<128x32xbf16, #tpu.memory_space<vmem>>) attributes {dimension_semantics = [#tpu.dimension_semantics<arbitrary>], iteration_bounds = array<i64: 1>, scalar_prefetch = 0 : i64, scratch_operands = 0 : i64, tpu.core_type = #tpu.core_type<tc>, window_params = [{pipeline_mode = #tpu.pipeline_mode<synchronous>, transform_indices = @transform_0, window_bounds = array<i64: 128, 144>}, {pipeline_mode = #tpu.pipeline_mode<synchronous>, transform_indices = @transform_1, window_bounds = array<i64: 144, 32>}, {pipeline_mode = #tpu.pipeline_mode<synchronous>, transform_indices = @transform_2, window_bounds = array<i64: 1, 32>}, {pipeline_mode = #tpu.pipeline_mode<synchronous>, transform_indices = @transform_3, window_bounds = array<i64: 1, 8>}, {pipeline_mode = #tpu.pipeline_mode<synchronous>, transform_indices = @transform_4, window_bounds = array<i64: 1, 8>}, {pipeline_mode = #tpu.pipeline_mode<synchronous>, transform_indices = @transform_5, window_bounds = array<i64: 128, 32>}]} {
    %c0 = arith.constant 0 : index
    %c0_0 = arith.constant 0 : index
    %0 = vector.load %arg1[%c0, %c0_0] : memref<128x144xbf16, #tpu.memory_space<vmem>>, vector<128x144xbf16>
    %c0_1 = arith.constant 0 : index
    %c0_2 = arith.constant 0 : index
    %1 = vector.load %arg2[%c0_1, %c0_2] : memref<144x32xbf16, #tpu.memory_space<vmem>>, vector<144x32xbf16>
    %cst = arith.constant dense<0.000000e+00> : vector<128x32xf32>
    %2 = tpu.matmul %0, %1, %cst {dimension_numbers = #tpu.dot_dimension_numbers<[1], [0], [0], [1], [0, 0, 1, 1], [], []>} : vector<128x144xbf16>, vector<144x32xbf16>, vector<128x32xf32> -> vector<128x32xf32>
    %c0_3 = arith.constant 0 : index
    %c0_4 = arith.constant 0 : index
    %3 = vector.load %arg3[%c0_3, %c0_4] : memref<1x32xf32, #tpu.memory_space<vmem>>, vector<1x32xf32>
    %4 = vector.broadcast %3 : vector<1x32xf32> to vector<128x32xf32>
    %5 = arith.addf %2, %4 : vector<128x32xf32>
    %cst_5 = arith.constant dense<0.000000e+00> : vector<32xf32>
    %6 = vector.multi_reduction <add>, %5, %cst_5 [0] : vector<128x32xf32> to vector<32xf32>
    %7 = vector.shape_cast %6 : vector<32xf32> to vector<1x32xf32>
    %8 = vector.extract_strided_slice %7 {offsets = [0, 0], sizes = [1, 8], strides = [1, 1]} : vector<1x32xf32> to vector<1x8xf32>
    %9 = vector.extract_strided_slice %7 {offsets = [0, 8], sizes = [1, 8], strides = [1, 1]} : vector<1x32xf32> to vector<1x8xf32>
    %10 = arith.addf %8, %9 : vector<1x8xf32>
    %11 = vector.extract_strided_slice %7 {offsets = [0, 16], sizes = [1, 8], strides = [1, 1]} : vector<1x32xf32> to vector<1x8xf32>
    %12 = arith.addf %10, %11 : vector<1x8xf32>
    %13 = vector.extract_strided_slice %7 {offsets = [0, 24], sizes = [1, 8], strides = [1, 1]} : vector<1x32xf32> to vector<1x8xf32>
    %14 = arith.addf %12, %13 : vector<1x8xf32>
    %cst_6 = arith.constant 0.001953125 : f32
    %15 = vector.broadcast %cst_6 : f32 to vector<1x8xf32>
    %16 = arith.mulf %14, %15 : vector<1x8xf32>
    %17 = tpu.concatenate %16, %16, %16, %16 in 1 : vector<1x8xf32>, vector<1x8xf32>, vector<1x8xf32>, vector<1x8xf32> -> vector<1x32xf32>
    %18 = vector.broadcast %17 : vector<1x32xf32> to vector<128x32xf32>
    %19 = arith.subf %5, %18 : vector<128x32xf32>
    %20 = arith.mulf %19, %19 : vector<128x32xf32>
    %cst_7 = arith.constant dense<0.000000e+00> : vector<32xf32>
    %21 = vector.multi_reduction <add>, %20, %cst_7 [0] : vector<128x32xf32> to vector<32xf32>
    %22 = vector.shape_cast %21 : vector<32xf32> to vector<1x32xf32>
    %23 = vector.extract_strided_slice %22 {offsets = [0, 0], sizes = [1, 8], strides = [1, 1]} : vector<1x32xf32> to vector<1x8xf32>
    %24 = vector.extract_strided_slice %22 {offsets = [0, 8], sizes = [1, 8], strides = [1, 1]} : vector<1x32xf32> to vector<1x8xf32>
    %25 = arith.addf %23, %24 : vector<1x8xf32>
    %26 = vector.extract_strided_slice %22 {offsets = [0, 16], sizes = [1, 8], strides = [1, 1]} : vector<1x32xf32> to vector<1x8xf32>
    %27 = arith.addf %25, %26 : vector<1x8xf32>
    %28 = vector.extract_strided_slice %22 {offsets = [0, 24], sizes = [1, 8], strides = [1, 1]} : vector<1x32xf32> to vector<1x8xf32>
    %29 = arith.addf %27, %28 : vector<1x8xf32>
    %cst_8 = arith.constant 0.001953125 : f32
    %30 = vector.broadcast %cst_8 : f32 to vector<1x8xf32>
    %31 = arith.mulf %29, %30 : vector<1x8xf32>
    %c0_9 = arith.constant 0 : index
    %c0_10 = arith.constant 0 : index
    %32 = vector.load %arg4[%c0_9, %c0_10] : memref<1x8xf32, #tpu.memory_space<vmem>>, vector<1x8xf32>
    %cst_11 = arith.constant 9.99999974E-6 : f32
    %33 = vector.broadcast %cst_11 : f32 to vector<1x8xf32>
    %34 = arith.addf %31, %33 : vector<1x8xf32>
    %35 = math.rsqrt %34 : vector<1x8xf32>
    %36 = arith.mulf %32, %35 : vector<1x8xf32>
    %37 = tpu.concatenate %36, %36, %36, %36 in 1 : vector<1x8xf32>, vector<1x8xf32>, vector<1x8xf32>, vector<1x8xf32> -> vector<1x32xf32>
    %38 = vector.broadcast %37 : vector<1x32xf32> to vector<128x32xf32>
    %39 = arith.mulf %19, %38 : vector<128x32xf32>
    %c0_12 = arith.constant 0 : index
    %c0_13 = arith.constant 0 : index
    %40 = vector.load %arg5[%c0_12, %c0_13] : memref<1x8xf32, #tpu.memory_space<vmem>>, vector<1x8xf32>
    %41 = tpu.concatenate %40, %40, %40, %40 in 1 : vector<1x8xf32>, vector<1x8xf32>, vector<1x8xf32>, vector<1x8xf32> -> vector<1x32xf32>
    %42 = vector.broadcast %41 : vector<1x32xf32> to vector<128x32xf32>
    %43 = arith.addf %39, %42 : vector<128x32xf32>
    %cst_14 = arith.constant 0.000000e+00 : f32
    %44 = vector.broadcast %cst_14 : f32 to vector<128x32xf32>
    %45 = arith.maximumf %43, %44 : vector<128x32xf32>
    %46 = arith.truncf %45 : vector<128x32xf32> to vector<128x32xbf16>
    %c0_15 = arith.constant 0 : index
    %c0_16 = arith.constant 0 : index
    %47 = vector.load %arg6[%c0_15, %c0_16] : memref<128x32xbf16, #tpu.memory_space<vmem>>, vector<128x32xbf16>
    tpu.vector_store %arg6[%c0_15, %c0_16], %46 {strides = array<i32>} : memref<128x32xbf16, #tpu.memory_space<vmem>>, vector<128x32xbf16>,
    return
  }
  func.func @transform_0(%arg0: i32) -> (i32, i32) {
    %c0_i32 = arith.constant 0 : i32
    %c0_i32_0 = arith.constant 0 : i32
    %c0_i32_1 = arith.constant 0 : i32
    return %c0_i32, %c0_i32_0 : i32, i32
  }
  func.func @transform_1(%arg0: i32) -> (i32, i32) {
    %c0_i32 = arith.constant 0 : i32
    %c0_i32_0 = arith.constant 0 : i32
    %c0_i32_1 = arith.constant 0 : i32
    return %c0_i32, %c0_i32_0 : i32, i32
  }
  func.func @transform_2(%arg0: i32) -> (i32, i32) {
    %c0_i32 = arith.constant 0 : i32
    %c0_i32_0 = arith.constant 0 : i32
    %c0_i32_1 = arith.constant 0 : i32
    return %c0_i32, %c0_i32_0 : i32, i32
  }
  func.func @transform_3(%arg0: i32) -> (i32, i32) {
    %c0_i32 = arith.constant 0 : i32
    %c0_i32_0 = arith.constant 0 : i32
    %c0_i32_1 = arith.constant 0 : i32
    return %c0_i32, %c0_i32_0 : i32, i32
  }
  func.func @transform_4(%arg0: i32) -> (i32, i32) {
    %c0_i32 = arith.constant 0 : i32
    %c0_i32_0 = arith.constant 0 : i32
    %c0_i32_1 = arith.constant 0 : i32
    return %c0_i32, %c0_i32_0 : i32, i32
  }
  func.func @transform_5(%arg0: i32) -> (i32, i32) {
    %c0_i32 = arith.constant 0 : i32
    %c0_i32_0 = arith.constant 0 : i32
    %c0_i32_1 = arith.constant 0 : i32
    return %c0_i32, %c0_i32_0 : i32, i32
  }
}

module attributes {stable_mosaic.version = 11 : i64} {
  func.func @_mm_bias_tanh_kernel(%arg0: i32, %arg1: memref<512x72xbf16, #tpu.memory_space<vmem>>, %arg2: memref<72x12xbf16, #tpu.memory_space<vmem>>, %arg3: memref<1x12xf32, #tpu.memory_space<vmem>>, %arg4: memref<512x12xf32, #tpu.memory_space<vmem>>) attributes {dimension_semantics = [#tpu.dimension_semantics<arbitrary>], iteration_bounds = array<i64: 1>, scalar_prefetch = 0 : i64, scratch_operands = 0 : i64, tpu.core_type = #tpu.core_type<tc>, window_params = [{pipeline_mode = #tpu.pipeline_mode<synchronous>, transform_indices = @transform_0, window_bounds = array<i64: 512, 72>}, {pipeline_mode = #tpu.pipeline_mode<synchronous>, transform_indices = @transform_1, window_bounds = array<i64: 72, 12>}, {pipeline_mode = #tpu.pipeline_mode<synchronous>, transform_indices = @transform_2, window_bounds = array<i64: 1, 12>}, {pipeline_mode = #tpu.pipeline_mode<synchronous>, transform_indices = @transform_3, window_bounds = array<i64: 512, 12>}]} {
    %c0 = arith.constant 0 : index
    %c0_0 = arith.constant 0 : index
    %0 = vector.load %arg1[%c0, %c0_0] : memref<512x72xbf16, #tpu.memory_space<vmem>>, vector<512x72xbf16>
    %c0_1 = arith.constant 0 : index
    %c0_2 = arith.constant 0 : index
    %1 = vector.load %arg2[%c0_1, %c0_2] : memref<72x12xbf16, #tpu.memory_space<vmem>>, vector<72x12xbf16>
    %cst = arith.constant dense<0.000000e+00> : vector<512x12xf32>
    %2 = tpu.matmul %0, %1, %cst {dimension_numbers = #tpu.dot_dimension_numbers<[1], [0], [0], [1], [0, 0, 1, 1], [], []>} : vector<512x72xbf16>, vector<72x12xbf16>, vector<512x12xf32> -> vector<512x12xf32>
    %c0_3 = arith.constant 0 : index
    %c0_4 = arith.constant 0 : index
    %3 = vector.load %arg3[%c0_3, %c0_4] : memref<1x12xf32, #tpu.memory_space<vmem>>, vector<1x12xf32>
    %4 = vector.broadcast %3 : vector<1x12xf32> to vector<512x12xf32>
    %5 = arith.addf %2, %4 : vector<512x12xf32>
    %6 = math.tanh %5 : vector<512x12xf32>
    %c0_5 = arith.constant 0 : index
    %c0_6 = arith.constant 0 : index
    %7 = vector.load %arg4[%c0_5, %c0_6] : memref<512x12xf32, #tpu.memory_space<vmem>>, vector<512x12xf32>
    tpu.vector_store %arg4[%c0_5, %c0_6], %6 {strides = array<i32>} : memref<512x12xf32, #tpu.memory_space<vmem>>, vector<512x12xf32>,
    return
  }
  func.func @transform_0(%arg0: i32) -> (i32, i32) {
    %c0_i32 = arith.constant 0 : i32
    %c0_i32_0 = arith.constant 0 : i32
    %c0_i32_1 = arith.constant 0 : i32
    return %c0_i32, %c0_i32_0 : i32, i32
  }
  func.func @transform_1(%arg0: i32) -> (i32, i32) {
    %c0_i32 = arith.constant 0 : i32
    %c0_i32_0 = arith.constant 0 : i32
    %c0_i32_1 = arith.constant 0 : i32
    return %c0_i32, %c0_i32_0 : i32, i32
  }
  func.func @transform_2(%arg0: i32) -> (i32, i32) {
    %c0_i32 = arith.constant 0 : i32
    %c0_i32_0 = arith.constant 0 : i32
    %c0_i32_1 = arith.constant 0 : i32
    return %c0_i32, %c0_i32_0 : i32, i32
  }
  func.func @transform_3(%arg0: i32) -> (i32, i32) {
    %c0_i32 = arith.constant 0 : i32
    %c0_i32_0 = arith.constant 0 : i32
    %c0_i32_1 = arith.constant 0 : i32
    return %c0_i32, %c0_i32_0 : i32, i32
  }
}

</mosaic_0001>

<bundles_post_ra>
// kernel: vae_forward.7
= control target key start
LH: loop header
LB: loop body
LE: loop exit
PB: predicated region body
PF: predicated region fallthrough
CT: control target
= control target key end

     0   :  { %vm276_vm0 = vcmask 392192   ;;  %vm662_vm1 = vcmask 64512   ;;  %vm1524_vm2 = vcmask 60416   ;;  %s4010_s1 = inlined_call_operand.vmem [shape: bf16[48,8], index: 1, kind: input, shape index: {}]   ;;  %s4011_s0 = inlined_call_operand.vmem [shape: bf16[512,48], index: 0, kind: input, shape index: {}]   ;;  %s4012_s2 = inlined_call_operand.vmem [shape: f32[1,8], index: 2, kind: input, shape index: {}]   ;;  %s4013_s3 = inlined_call_operand.vmem [shape: f32[1,8], index: 3, kind: input, shape index: {}]   ;;  %s4014_s4 = inlined_call_operand.vmem [shape: f32[1,8], index: 4, kind: input, shape index: {}]   ;;  %s4015_s5 = inlined_call_operand.vmem [shape: bf16[512,8], index: 5, kind: output, shape index: {}]  }
   0x1   :  { %v1901_v0 = vld [vmem:[%s4010_s1] sm:$0xff]   ;;  %v1902_v1 = vld [vmem:[%s4010_s1 + $0x8] sm:$0xff]   ;;  %v1903_v3 = vld [vmem:[%s4010_s1 + $0x10] sm:$0xff]  }
   0x2   :  { %1825 = vmatprep.subr.bf16.mxu0 %v1901_v0  ;;  %1895 = vmatprep.subr.bf16.mxu1 %v1901_v0  ;;  %v1904_v2 = vld [vmem:[%s4011_s0] sm:$0xff]   ;;  %v1905_v4 = vld [vmem:[%s4011_s0 + $0x8] sm:$0xff]   ;;  %v1906_v5 = vld [vmem:[%s4011_s0 + $0x10] sm:$0xff]  }
   0x3   :  { %1826 = vmatpush3.bf16.msra.mxu0 %v1901_v0  ;;  %1898 = vmatpush3.bf16.msra.mxu1 %v1901_v0  ;;  %v1907_v6 = vld [vmem:[%s4011_s0 + $0x18] sm:$0xff]   ;;  %v1908_v7 = vld [vmem:[%s4011_s0 + $0x20] sm:$0xff]   ;;  %v1921_v9 = vld [vmem:[%s4011_s0 + $0x88] sm:$0xff]  }
   0x4   :  { %1827 = vmatprep.subr.bf16.mxu0 %v1902_v1  ;;  %1896 = vmatprep.subr.bf16.mxu1 %v1902_v1  ;;  %v1920_v8 = vld [vmem:[%s4011_s0 + $0x80] sm:$0xff]   ;;  %v1922_v10 = vld [vmem:[%s4011_s0 + $0x90] sm:$0xff]   ;;  %v1909_v11 = vld [vmem:[%s4011_s0 + $0x28] sm:$0xff]  }
   0x5   :  { %1831 = vmatprep.mubr.msk.bf16.mxu0 %vm276_vm0, %v1904_v2  ;;  %1863 = vmatprep.mubr.msk.bf16.mxu1 %vm276_vm0, %v1920_v8  ;;  %v1910_v12 = vld [vmem:[%s4011_s0 + $0x30] sm:$0xff]   ;;  %v1923_v13 = vld [vmem:[%s4011_s0 + $0x98] sm:$0xff]   ;;  %v1924_v14 = vld [vmem:[%s4011_s0 + $0xa0] sm:$0xff]  }
   0x6   :  { %v1911_v15 = vld [vmem:[%s4011_s0 + $0x38] sm:$0xff]   ;;  %v1925_v16 = vld [vmem:[%s4011_s0 + $0xa8] sm:$0xff]   ;;  %v1912_v17 = vld [vmem:[%s4011_s0 + $0x40] sm:$0xff]  }
   0x7   :  { %1828 = vmatpush3.bf16.msra.mxu0 %v1902_v1  ;;  %1899 = vmatpush3.bf16.msra.mxu1 %v1902_v1  ;;  %v1926_v18 = vld [vmem:[%s4011_s0 + $0xb0] sm:$0xff]   ;;  %v1913_v19 = vld [vmem:[%s4011_s0 + $0x48] sm:$0xff]   ;;  %v1927_v20 = vld [vmem:[%s4011_s0 + $0xb8] sm:$0xff]  }
   0x8   :  { %1829 = vmatprep.subr.bf16.mxu0 %v1903_v3  ;;  %1897 = vmatprep.subr.bf16.mxu1 %v1903_v3  ;;  %v1914_v21 = vld [vmem:[%s4011_s0 + $0x50] sm:$0xff]   ;;  %v1928_v22 = vld [vmem:[%s4011_s0 + $0xc0] sm:$0xff]   ;;  %v1915_v23 = vld [vmem:[%s4011_s0 + $0x58] sm:$0xff]  }
   0x9   :  { %v1929_v24 = vld [vmem:[%s4011_s0 + $0xc8] sm:$0xff]   ;;  %v1916_v25 = vld [vmem:[%s4011_s0 + $0x60] sm:$0xff]   ;;  %v1930_v26 = vld [vmem:[%s4011_s0 + $0xd0] sm:$0xff]  }
   0xa   :  { %v1917_v27 = vld [vmem:[%s4011_s0 + $0x68] sm:$0xff]   ;;  %v1931_v28 = vld [vmem:[%s4011_s0 + $0xd8] sm:$0xff]   ;;  %v1918_v29 = vld [vmem:[%s4011_s0 + $0x70] sm:$0xff]  }
   0xb   :  { %1830 = vmatpush3.bf16.msra.mxu0 %v1903_v3  ;;  %1900 = vmatpush3.bf16.msra.mxu1 %v1903_v3  ;;  %v1932_v30 = vld [vmem:[%s4011_s0 + $0xe0] sm:$0xff]   ;;  %v1919_v31 = vld [vmem:[%s4011_s0 + $0x78] sm:$0xff]   ;;  %v1933_v32 = vld [vmem:[%s4011_s0 + $0xe8] sm:$0xff]  }
   0xc   :  { %v1934_v33 = vld [vmem:[%s4011_s0 + $0xf0] sm:$0xff]   ;;  %v1935_v34 = vld [vmem:[%s4011_s0 + $0xf8] sm:$0xff]   ;;  %v2108_v35 = vld [vmem:[%s4012_s2] ss:$0 sm:$0xff] }
   0xe   :  { %1832 = vmatmul.mubr.msk.bf16.vlgmr.msra.gmra.mrb[0].mxu0 %vm276_vm0, %v1905_v4  ;;  %1864 = vmatmul.mubr.msk.bf16.vlgmr.msra.gmra.mrb[0].mxu1 %vm276_vm0, %v1921_v9 }
   0xf   :  { %1835 = vmatprep.mubr.msk.bf16.mxu0 %vm276_vm0, %v1906_v5  ;;  %1867 = vmatprep.mubr.msk.bf16.mxu1 %vm276_vm0, %v1922_v10 }
  0x16   :  { %1836 = vmatmul.mubr.msk.bf16.gmra.mrb[4].mxu0 %vm276_vm0, %v1907_v6  ;;  %1868 = vmatmul.mubr.msk.bf16.gmra.mrb[4].mxu1 %vm276_vm0, %v1923_v13 }
  0x17   :  { %1839 = vmatprep.mubr.msk.bf16.mxu0 %vm276_vm0, %v1908_v7  ;;  %1871 = vmatprep.mubr.msk.bf16.mxu1 %vm276_vm0, %v1924_v14 }
  0x1e   :  { %1840 = vmatmul.mubr.msk.bf16.gmra.mrb[8].mxu0 %vm276_vm0, %v1909_v11  ;;  %1872 = vmatmul.mubr.msk.bf16.gmra.mrb[8].mxu1 %vm276_vm0, %v1925_v16 }
  0x1f   :  { %1843 = vmatprep.mubr.msk.bf16.mxu0 %vm276_vm0, %v1910_v12  ;;  %1875 = vmatprep.mubr.msk.bf16.mxu1 %vm276_vm0, %v1926_v18 }
  0x26   :  { %1844 = vmatmul.mubr.msk.bf16.gmra.mrb[12].mxu0 %vm276_vm0, %v1911_v15  ;;  %1876 = vmatmul.mubr.msk.bf16.gmra.mrb[12].mxu1 %vm276_vm0, %v1927_v20 }
  0x27   :  { %1847 = vmatprep.mubr.msk.bf16.mxu0 %vm276_vm0, %v1912_v17  ;;  %1879 = vmatprep.mubr.msk.bf16.mxu1 %vm276_vm0, %v1928_v22 }
  0x2e   :  { %1848 = vmatmul.mubr.msk.bf16.gmra.mrb[16].mxu0 %vm276_vm0, %v1913_v19  ;;  %1880 = vmatmul.mubr.msk.bf16.gmra.mrb[16].mxu1 %vm276_vm0, %v1929_v24 }
  0x2f   :  { %1851 = vmatprep.mubr.msk.bf16.mxu0 %vm276_vm0, %v1914_v21  ;;  %1883 = vmatprep.mubr.msk.bf16.mxu1 %vm276_vm0, %v1930_v26 }
  0x36   :  { %1852 = vmatmul.mubr.msk.bf16.gmra.mrb[20].mxu0 %vm276_vm0, %v1915_v23  ;;  %1884 = vmatmul.mubr.msk.bf16.gmra.mrb[20].mxu1 %vm276_vm0, %v1931_v28 }
  0x37   :  { %1855 = vmatprep.mubr.msk.bf16.mxu0 %vm276_vm0, %v1916_v25  ;;  %1887 = vmatprep.mubr.msk.bf16.mxu1 %vm276_vm0, %v1932_v30 }
  0x3e   :  { %1856 = vmatmul.mubr.msk.bf16.gmra.mrb[24].mxu0 %vm276_vm0, %v1917_v27  ;;  %1888 = vmatmul.mubr.msk.bf16.gmra.mrb[24].mxu1 %vm276_vm0, %v1933_v32 }
  0x3f   :  { %1859 = vmatprep.mubr.msk.bf16.mxu0 %vm276_vm0, %v1918_v29  ;;  %1891 = vmatprep.mubr.msk.bf16.mxu1 %vm276_vm0, %v1934_v33 }
  0x46   :  { %1860 = vmatmul.mubr.msk.bf16.gmra.mrb[28].mxu0 %vm276_vm0, %v1919_v31  ;;  %1892 = vmatmul.mubr.msk.bf16.gmra.mrb[28].mxu1 %vm276_vm0, %v1935_v34 }
  0xe1   :  { %v1833_v36 = vpop.f32.mrb[0].mxu0  ;;  %v2128_v49 = vpop.f32.mrb[0].mxu1 }
  0xe2   :  { %v407_v37 = vpop.f32.mrb[1].mxu0  ;;  %v2114_v41 = vadd.f32 %v1833_v36, %v2108_v35  ;;  %v2130_v52 = vpop.f32.mrb[1].mxu1 }
  0xe3   :  { %v2111_v38 = vadd.f32 %v2108_v35, %v407_v37  ;;  %v1834_v39 = vpop.f32.mrb[2].mxu0  ;;  %v2137_v56 = vpop.f32.mrb[2].mxu1 }
  0xe4   :  { %v410_v40 = vpop.f32.mrb[3].mxu0  ;;  %v2122_v44 = vadd.f32 %v1834_v39, %v2108_v35  ;;  %v666_v47 = vsel %vm662_vm1, %v2114_v41, 0.0  ;;  %v2139_v59 = vpop.f32.mrb[3].mxu1 }
  0xe5   :  { %v2117_v42 = vadd.f32 %v2108_v35, %v410_v40  ;;  %v663_v43 = vsel %vm662_vm1, %v2111_v38, 0.0 }
  0xe6   :  { %v668_v53 = vsel %vm662_vm1, %v2122_v44, 0.0 }
  0xe7   :  { %v664_v45 = vsel %vm662_vm1, %v2117_v42, 0.0 }
  0xe8   :  { %v665_v46 = vadd.f32 %v664_v45, %v663_v43 }
  0xe9   :  { %v1837_v48 = vpop.f32.mrb[4].mxu0  ;;  %v2156_v5 = vpop.f32.mrb[4].mxu1 }
  0xea   :  { %v667_v50 = vadd.f32 %v666_v47, %v665_v46  ;;  %v423_v51 = vpop.f32.mrb[5].mxu0  ;;  %v2142_v60 = vadd.f32 %v1837_v48, %v2108_v35  ;;  %v2158_v8 = vpop.f32.mrb[5].mxu1 }
  0xeb   :  { %v2135_v54 = vadd.f32 %v2108_v35, %v423_v51  ;;  %v1838_v55 = vpop.f32.mrb[6].mxu0  ;;  %v2165_v12 = vpop.f32.mrb[6].mxu1 }
  0xec   :  { %v669_v57 = vadd.f32 %v668_v53, %v667_v50  ;;  %v426_v58 = vpop.f32.mrb[7].mxu0  ;;  %v2150_v0 = vadd.f32 %v1838_v55, %v2108_v35  ;;  %v674_v3 = vsel %vm662_vm1, %v2142_v60, 0.0  ;;  %v2167_v15 = vpop.f32.mrb[7].mxu1 }
  0xed   :  { %v670_v61 = vsel %vm662_vm1, %v2135_v54, 0.0  ;;  %v2147_v62 = vadd.f32 %v2108_v35, %v426_v58 }
  0xee   :  { %v671_v63 = vadd.f32 %v670_v61, %v669_v57  ;;  %v676_v9 = vsel %vm662_vm1, %v2150_v0, 0.0 }
  0xef   :  { %v672_v1 = vsel %vm662_vm1, %v2147_v62, 0.0 }
  0xf0   :  { %v673_v2 = vadd.f32 %v672_v1, %v671_v63 }
  0xf1   :  { %v1841_v4 = vpop.f32.mrb[8].mxu0  ;;  %v2184_v25 = vpop.f32.mrb[8].mxu1 }
  0xf2   :  { %v675_v6 = vadd.f32 %v674_v3, %v673_v2  ;;  %v439_v7 = vpop.f32.mrb[9].mxu0  ;;  %v2170_v16 = vadd.f32 %v1841_v4, %v2108_v35  ;;  %v2186_v28 = vpop.f32.mrb[9].mxu1 }
  0xf3   :  { %v2163_v10 = vadd.f32 %v2108_v35, %v439_v7  ;;  %v1842_v11 = vpop.f32.mrb[10].mxu0  ;;  %v2193_v32 = vpop.f32.mrb[10].mxu1 }
  0xf4   :  { %v677_v13 = vadd.f32 %v676_v9, %v675_v6  ;;  %v442_v14 = vpop.f32.mrb[11].mxu0  ;;  %v2178_v20 = vadd.f32 %v1842_v11, %v2108_v35  ;;  %v682_v23 = vsel %vm662_vm1, %v2170_v16, 0.0  ;;  %v2195_v36 = vpop.f32.mrb[11].mxu1 }
  0xf5   :  { %v678_v17 = vsel %vm662_vm1, %v2163_v10, 0.0  ;;  %v2175_v18 = vadd.f32 %v2108_v35, %v442_v14 }
  0xf6   :  { %v679_v19 = vadd.f32 %v678_v17, %v677_v13  ;;  %v684_v29 = vsel %vm662_vm1, %v2178_v20, 0.0 }
  0xf7   :  { %v680_v21 = vsel %vm662_vm1, %v2175_v18, 0.0 }
  0xf8   :  { %v681_v22 = vadd.f32 %v680_v21, %v679_v19 }
  0xf9   :  { %v1845_v24 = vpop.f32.mrb[12].mxu0  ;;  %v2212_v51 = vpop.f32.mrb[12].mxu1 }
  0xfa   :  { %v683_v26 = vadd.f32 %v682_v23, %v681_v22  ;;  %v455_v27 = vpop.f32.mrb[13].mxu0  ;;  %v2198_v37 = vadd.f32 %v1845_v24, %v2108_v35  ;;  %v2214_v57 = vpop.f32.mrb[13].mxu1 }
  0xfb   :  { %v2191_v30 = vadd.f32 %v2108_v35, %v455_v27  ;;  %v1846_v31 = vpop.f32.mrb[14].mxu0  ;;  %v2221_v1 = vpop.f32.mrb[14].mxu1 }
  0xfc   :  { %v685_v33 = vadd.f32 %v684_v29, %v683_v26  ;;  %v458_v34 = vpop.f32.mrb[15].mxu0  ;;  %v2206_v45 = vadd.f32 %v1846_v31, %v2108_v35  ;;  %v690_v48 = vsel %vm662_vm1, %v2198_v37, 0.0  ;;  %v2223_v4 = vpop.f32.mrb[15].mxu1 }
  0xfd   :  { %v686_v39 = vsel %vm662_vm1, %v2191_v30, 0.0  ;;  %v2203_v40 = vadd.f32 %v2108_v35, %v458_v34 }
  0xfe   :  { %v687_v43 = vadd.f32 %v686_v39, %v685_v33  ;;  %v692_v58 = vsel %vm662_vm1, %v2206_v45, 0.0 }
  0xff   :  { %v688_v46 = vsel %vm662_vm1, %v2203_v40, 0.0 }
 0x100   :  { %v689_v47 = vadd.f32 %v688_v46, %v687_v43 }
 0x101   :  { %v1849_v50 = vpop.f32.mrb[16].mxu0  ;;  %v2240_v22 = vpop.f32.mrb[16].mxu1 }
 0x102   :  { %v691_v53 = vadd.f32 %v690_v48, %v689_v47  ;;  %v471_v55 = vpop.f32.mrb[17].mxu0  ;;  %v2226_v6 = vadd.f32 %v1849_v50, %v2108_v35  ;;  %v2242_v26 = vpop.f32.mrb[17].mxu1 }
 0x103   :  { %v2219_v61 = vadd.f32 %v2108_v35, %v471_v55  ;;  %v1850_v63 = vpop.f32.mrb[18].mxu0  ;;  %v2249_v33 = vpop.f32.mrb[18].mxu1 }
 0x104   :  { %v693_v2 = vadd.f32 %v692_v58, %v691_v53  ;;  %v474_v3 = vpop.f32.mrb[19].mxu0  ;;  %v2234_v13 = vadd.f32 %v1850_v63, %v2108_v35  ;;  %v698_v19 = vsel %vm662_vm1, %v2226_v6, 0.0  ;;  %v2251_v43 = vpop.f32.mrb[19].mxu1 }
 0x105   :  { %v694_v7 = vsel %vm662_vm1, %v2219_v61, 0.0  ;;  %v2231_v9 = vadd.f32 %v2108_v35, %v474_v3 }
 0x106   :  { %v695_v11 = vadd.f32 %v694_v7, %v693_v2  ;;  %v700_v27 = vsel %vm662_vm1, %v2234_v13, 0.0 }
 0x107   :  { %v696_v14 = vsel %vm662_vm1, %v2231_v9, 0.0 }
 0x108   :  { %v697_v17 = vadd.f32 %v696_v14, %v695_v11 }
 0x109   :  { %v1853_v21 = vpop.f32.mrb[20].mxu0  ;;  %v2268_v3 = vpop.f32.mrb[20].mxu1 }
 0x10a   :  { %v699_v23 = vadd.f32 %v698_v19, %v697_v17  ;;  %v487_v24 = vpop.f32.mrb[21].mxu0  ;;  %v2254_v46 = vadd.f32 %v1853_v21, %v2108_v35  ;;  %v2270_v14 = vpop.f32.mrb[21].mxu1 }
 0x10b   :  { %v2247_v29 = vadd.f32 %v2108_v35, %v487_v24  ;;  %v1854_v31 = vpop.f32.mrb[22].mxu0 }
 0x10c   :  { %v701_v34 = vadd.f32 %v700_v27, %v699_v23  ;;  %v490_v39 = vpop.f32.mrb[23].mxu0  ;;  %4068 = vst [vmem:[#allocation2_spill] sm:$0xff] %v2254_v46  ;;  %v2262_v53 = vadd.f32 %v1854_v31, %v2108_v35  ;;  %v706_v63 = vsel %vm662_vm1, %v2254_v46, 0.0  ;;  %v2277_v23 = vpop.f32.mrb[22].mxu1 }
 0x10d   :  { %v702_v47 = vsel %vm662_vm1, %v2247_v29, 0.0  ;;  %v2259_v48 = vadd.f32 %v2108_v35, %v490_v39  ;;  %v2279_v31 = vpop.f32.mrb[23].mxu1 }
 0x10e   :  { %v703_v50 = vadd.f32 %v702_v47, %v701_v34  ;;  %4070 = vst [vmem:[#allocation4_spill] sm:$0xff] %v2262_v53  ;;  %v708_v17 = vsel %vm662_vm1, %v2262_v53, 0.0 }
 0x10f   :  { %4069 = vst [vmem:[#allocation3_spill] sm:$0xff] %v2259_v48  ;;  %v704_v55 = vsel %vm662_vm1, %v2259_v48, 0.0 }
 0x110   :  { %v705_v58 = vadd.f32 %v704_v55, %v703_v50 }
 0x111   :  { %v1857_v2 = vpop.f32.mrb[24].mxu0 }
 0x112   :  { %v707_v7 = vadd.f32 %v706_v63, %v705_v58  ;;  %v503_v11 = vpop.f32.mrb[25].mxu0  ;;  %v2282_v34 = vadd.f32 %v1857_v2, %v2108_v35  ;;  %v2296_v2 = vpop.f32.mrb[24].mxu1 }
 0x113   :  { %v2275_v19 = vadd.f32 %v2108_v35, %v503_v11  ;;  %v1858_v21 = vpop.f32.mrb[26].mxu0 }
 0x114   :  { %v709_v24 = vadd.f32 %v708_v17, %v707_v7  ;;  %v506_v27 = vpop.f32.mrb[27].mxu0  ;;  %4072 = vst [vmem:[#allocation6_spill] sm:$0xff] %v2282_v34  ;;  %v2290_v55 = vadd.f32 %v1858_v21, %v2108_v35  ;;  %v714_v7 = vsel %vm662_vm1, %v2282_v34, 0.0 }
 0x115   :  { %4071 = vst [vmem:[#allocation5_spill] sm:$0xff] %v2275_v19  ;;  %v710_v39 = vsel %vm662_vm1, %v2275_v19, 0.0  ;;  %v2287_v47 = vadd.f32 %v2108_v35, %v506_v27  ;;  %v2298_v19 = vpop.f32.mrb[25].mxu1 }
 0x116   :  { %v711_v50 = vadd.f32 %v710_v39, %v709_v24  ;;  %4074 = vst [vmem:[#allocation8_spill] sm:$0xff] %v2290_v55  ;;  %v716_v24 = vsel %vm662_vm1, %v2290_v55, 0.0  ;;  %v2305_v39 = vpop.f32.mrb[26].mxu1 }
 0x117   :  { %4073 = vst [vmem:[#allocation7_spill] sm:$0xff] %v2287_v47  ;;  %v712_v58 = vsel %vm662_vm1, %v2287_v47, 0.0  ;;  %v2307_v47 = vpop.f32.mrb[27].mxu1 }
 0x118   :  { %v713_v63 = vadd.f32 %v712_v58, %v711_v50 }
 0x119   :  { %v1861_v11 = vpop.f32.mrb[28].mxu0  ;;  %v2328_v48 = vpop.f32.mrb[28].mxu1 }
 0x11a   :  { %v715_v17 = vadd.f32 %v714_v7, %v713_v63  ;;  %v519_v53 = vpop.f32.mrb[29].mxu0  ;;  %v2310_v34 = vadd.f32 %v1861_v11, %v2108_v35 }
 0x11b   :  { %v2303_v21 = vadd.f32 %v2108_v35, %v519_v53  ;;  %v1862_v27 = vpop.f32.mrb[30].mxu0 }
 0x11c   :  { %v717_v50 = vadd.f32 %v716_v24, %v715_v17  ;;  %v522_v58 = vpop.f32.mrb[31].mxu0  ;;  %4076 = vst [vmem:[#allocation10_spill] sm:$0xff] %v2310_v34  ;;  %v2318_v53 = vadd.f32 %v1862_v27, %v2108_v35  ;;  %v2324_v17 = vadd.f32 %v2108_v35, %v2130_v52  ;;  %v722_v11 = vsel %vm662_vm1, %v2310_v34, 0.0 }
 0x11d   :  { %4075 = vst [vmem:[#allocation9_spill] sm:$0xff] %v2303_v21  ;;  %v718_v63 = vsel %vm662_vm1, %v2303_v21, 0.0  ;;  %v2315_v7 = vadd.f32 %v2108_v35, %v522_v58  ;;  %v2330_v58 = vpop.f32.mrb[29].mxu1 }
 0x11e   :  { %v719_v55 = vadd.f32 %v718_v63, %v717_v50  ;;  %4077 = vst [vmem:[#allocation11_spill] sm:$0xff] %v2318_v53  ;;  %4078 = vst [vmem:[#allocation12_spill] sm:$0xff] %v2324_v17  ;;  %v724_v27 = vsel %vm662_vm1, %v2318_v53, 0.0  ;;  %v726_v50 = vsel %vm662_vm1, %v2324_v17, 0.0  ;;  %v2338_v63 = vadd.f32 %v2108_v35, %v2139_v59  ;;  %v2340_v52 = vpop.f32.mrb[30].mxu1 }
 0x11f   :  { %v720_v46 = vsel %vm662_vm1, %v2315_v7, 0.0  ;;  %v2350_v53 = vadd.f32 %v2137_v56, %v2108_v35  ;;  %v2356_v59 = vadd.f32 %v2108_v35, %v2158_v8  ;;  %v2366_v56 = vadd.f32 %v2108_v35, %v2167_v15 }
 0x120   :  { %v721_v24 = vadd.f32 %v720_v46, %v719_v55  ;;  %v2342_v55 = vpop.f32.mrb[31].mxu1  ;;  %v728_v17 = vsel %vm662_vm1, %v2338_v63, 0.0  ;;  %v2370_v8 = vadd.f32 %v2156_v5, %v2108_v35 }
 0x121   :  { %4079 = vst [vmem:[#allocation13_spill] sm:$0xff] %v2356_v59 }
 0x122   :  { %v723_v21 = vadd.f32 %v722_v11, %v721_v24  ;;  %v2346_v24 = vadd.f32 %v2128_v49, %v2108_v35  ;;  %v732_v49 = vsel %vm662_vm1, %v2350_v53, 0.0  ;;  %v738_v15 = vsel %vm662_vm1, %v2370_v8, 0.0 }
 0x124   :  { %v725_v46 = vadd.f32 %v724_v27, %v723_v21  ;;  %v730_v21 = vsel %vm662_vm1, %v2346_v24, 0.0 }
 0x126   :  { %v727_v11 = vadd.f32 %v726_v50, %v725_v46  ;;  %v734_v50 = vsel %vm662_vm1, %v2356_v59, 0.0 }
 0x128   :  { %v729_v34 = vadd.f32 %v728_v17, %v727_v11  ;;  %v2374_v11 = vadd.f32 %v2165_v12, %v2108_v35  ;;  %v2390_v12 = vadd.f32 %v2108_v35, %v2195_v36 }
 0x12a   :  { %v731_v27 = vadd.f32 %v730_v21, %v729_v34  ;;  %v736_v34 = vsel %vm662_vm1, %v2366_v56, 0.0  ;;  %v2380_v21 = vadd.f32 %v2108_v35, %v2186_v28  ;;  %v740_v5 = vsel %vm662_vm1, %v2374_v11, 0.0 }
 0x12b   :  { %v2394_v28 = vadd.f32 %v2184_v25, %v2108_v35 }
 0x12c   :  { %v733_v46 = vadd.f32 %v732_v49, %v731_v27  ;;  %v742_v49 = vsel %vm662_vm1, %v2380_v21, 0.0 }
 0x12d   :  { %v746_v36 = vsel %vm662_vm1, %v2394_v28, 0.0 }
 0x12e   :  { %v735_v17 = vadd.f32 %v734_v50, %v733_v46 }
 0x130   :  { %v737_v59 = vadd.f32 %v736_v34, %v735_v17  ;;  %v2398_v17 = vadd.f32 %v2193_v32, %v2108_v35  ;;  %v2404_v34 = vadd.f32 %v2108_v35, %v2214_v57  ;;  %v2414_v32 = vadd.f32 %v2108_v35, %v2223_v4 }
 0x131   :  { %v2418_v57 = vadd.f32 %v2212_v51, %v2108_v35 }
 0x132   :  { %v739_v27 = vadd.f32 %v738_v15, %v737_v59  ;;  %v744_v59 = vsel %vm662_vm1, %v2390_v12, 0.0  ;;  %v748_v25 = vsel %vm662_vm1, %v2398_v17, 0.0 }
 0x133   :  { %v754_v4 = vsel %vm662_vm1, %v2418_v57, 0.0 }
 0x134   :  { %v741_v50 = vadd.f32 %v740_v5, %v739_v27  ;;  %v750_v5 = vsel %vm662_vm1, %v2404_v34, 0.0 }
 0x136   :  { %v743_v46 = vadd.f32 %v742_v49, %v741_v50 }
 0x138   :  { %v745_v15 = vadd.f32 %v744_v59, %v743_v46  ;;  %v2422_v46 = vadd.f32 %v2221_v1, %v2108_v35  ;;  %v752_v59 = vsel %vm662_vm1, %v2414_v32, 0.0  ;;  %v2438_v1 = vadd.f32 %v2108_v35, %v2251_v43 }
 0x13a   :  { %v747_v27 = vadd.f32 %v746_v36, %v745_v15  ;;  %v2428_v15 = vadd.f32 %v2108_v35, %v2242_v26  ;;  %v756_v51 = vsel %vm662_vm1, %v2422_v46, 0.0  ;;  %v2442_v26 = vadd.f32 %v2240_v22, %v2108_v35 }
 0x13c   :  { %v749_v49 = vadd.f32 %v748_v25, %v747_v27  ;;  %v758_v25 = vsel %vm662_vm1, %v2428_v15, 0.0  ;;  %v762_v43 = vsel %vm662_vm1, %v2442_v26, 0.0 }
 0x13e   :  { %v751_v50 = vadd.f32 %v750_v5, %v749_v49 }
 0x140   :  { %v753_v36 = vadd.f32 %v752_v59, %v751_v50  ;;  %v2446_v50 = vadd.f32 %v2249_v33, %v2108_v35  ;;  %v760_v59 = vsel %vm662_vm1, %v2438_v1, 0.0  ;;  %v2462_v33 = vadd.f32 %v2108_v35, %v2279_v31 }
 0x142   :  { %v755_v27 = vadd.f32 %v754_v4, %v753_v36  ;;  %v2452_v36 = vadd.f32 %v2108_v35, %v2270_v14  ;;  %v764_v22 = vsel %vm662_vm1, %v2446_v50, 0.0  ;;  %v2466_v14 = vadd.f32 %v2268_v3, %v2108_v35 }
 0x144   :  { %v757_v5 = vadd.f32 %v756_v51, %v755_v27  ;;  %v766_v51 = vsel %vm662_vm1, %v2452_v36, 0.0  ;;  %v770_v31 = vsel %vm662_vm1, %v2466_v14, 0.0 }
 0x146   :  { %v759_v49 = vadd.f32 %v758_v25, %v757_v5 }
 0x148   :  { %v761_v4 = vadd.f32 %v760_v59, %v759_v49  ;;  %v2470_v49 = vadd.f32 %v2277_v23, %v2108_v35  ;;  %v768_v59 = vsel %vm662_vm1, %v2462_v33, 0.0  ;;  %v2486_v23 = vadd.f32 %v2108_v35, %v2307_v47 }
 0x149   :  { %v2502_v47 = vadd.f32 %v2108_v35, %v2330_v58 }
 0x14a   :  { %v763_v27 = vadd.f32 %v762_v43, %v761_v4  ;;  %v2476_v4 = vadd.f32 %v2108_v35, %v2298_v19  ;;  %v772_v3 = vsel %vm662_vm1, %v2470_v49, 0.0  ;;  %v2490_v19 = vadd.f32 %v2296_v2, %v2108_v35 }
 0x14b   :  { %4082 = vst [vmem:[#allocation16_spill] sm:$0xff] %v2502_v47 }
 0x14c   :  { %v765_v25 = vadd.f32 %v764_v22, %v763_v27  ;;  %v774_v22 = vsel %vm662_vm1, %v2476_v4, 0.0  ;;  %4080 = vst [vmem:[#allocation14_spill] sm:$0xff] %v2490_v19 }
 0x14e   :  { %v767_v5 = vadd.f32 %v766_v51, %v765_v25 }
 0x150   :  { %v769_v43 = vadd.f32 %v768_v59, %v767_v5  ;;  %v2494_v5 = vadd.f32 %v2305_v39, %v2108_v35  ;;  %v776_v59 = vsel %vm662_vm1, %v2486_v23, 0.0  ;;  %v782_v39 = vsel %vm662_vm1, %v2502_v47, 0.0 }
 0x152   :  { %v771_v27 = vadd.f32 %v770_v31, %v769_v43  ;;  %4081 = vst [vmem:[#allocation15_spill] sm:$0xff] %v2494_v5  ;;  %v778_v31 = vsel %vm662_vm1, %v2490_v19, 0.0  ;;  %v780_v2 = vsel %vm662_vm1, %v2494_v5, 0.0 }
 0x154   :  { %v773_v51 = vadd.f32 %v772_v3, %v771_v27 }
 0x156   :  { %v775_v25 = vadd.f32 %v774_v22, %v773_v51  ;;  %v2510_v22 = vadd.f32 %v2108_v35, %v2342_v55 }
 0x158   :  { %v777_v43 = vadd.f32 %v776_v59, %v775_v25  ;;  %4083 = vst [vmem:[#allocation17_spill] sm:$0xff] %v2510_v22  ;;  %v2514_v25 = vadd.f32 %v2328_v48, %v2108_v35  ;;  %v784_v58 = vsel %vm662_vm1, %v2510_v22, 0.0 }
 0x15a   :  { %v779_v27 = vadd.f32 %v778_v31, %v777_v43  ;;  %v786_v43 = vsel %vm662_vm1, %v2514_v25, 0.0  ;;  %v2522_v31 = vadd.f32 %v2340_v52, %v2108_v35 }
 0x15c   :  { %v781_v3 = vadd.f32 %v780_v2, %v779_v27  ;;  %v788_v55 = vsel %vm662_vm1, %v2522_v31, 0.0 }
 0x15e   :  { %v783_v51 = vadd.f32 %v782_v39, %v781_v3 }
 0x160   :  { %v785_v59 = vadd.f32 %v784_v58, %v783_v51 }
 0x162   :  { %v787_v27 = vadd.f32 %v786_v43, %v785_v59 }
 0x164   :  { %v789_v2 = vadd.f32 %v788_v55, %v787_v27 }
 0x166   :  { %v790_v3 = vrot.slane %v789_v2, 4 }
 0x168   :  { %v791_v39 = vadd.f32 %v790_v3, %v789_v2 }
 0x16a   :  { %v792_v48 = vrot.slane %v791_v39, 2 }
 0x16c   :  { %v793_v47 = vadd.f32 %v792_v48, %v791_v39 }
 0x16e   :  { %v794_v5 = vrot.slane %v793_v47, 1 }
 0x170   :  { %v795_v19 = vadd.f32 %v794_v5, %v793_v47 }
 0x172   :  { %v2526_v22 = vmul.f32 0.001953125, %v795_v19 }
 0x174   :  { %v2530_v51 = vsub.f32 %v2111_v38, %v2526_v22  ;;  %v2534_v35 = vsub.f32 %v2117_v42, %v2526_v22  ;;  %v2538_v52 = vsub.f32 %v2114_v41, %v2526_v22  ;;  %v2542_v58 = vsub.f32 %v2122_v44, %v2526_v22 }
 0x175   :  { %v2550_v38 = vsub.f32 %v2135_v54, %v2526_v22  ;;  %v2556_v41 = vsub.f32 %v2147_v62, %v2526_v22  ;;  %v2564_v27 = vsub.f32 %v2142_v60, %v2526_v22  ;;  %v2571_v62 = vsub.f32 %v2150_v0, %v2526_v22 }
 0x176   :  { %v861_v19 = vmul.f32 %v2530_v51, %v2530_v51  ;;  %v862_v5 = vmul.f32 %v2534_v35, %v2534_v35  ;;  %v863_v42 = vmul.f32 %v2538_v52, %v2538_v52  ;;  %v864_v44 = vmul.f32 %v2542_v58, %v2542_v58 }
 0x177   :  { %v865_v54 = vmul.f32 %v2550_v38, %v2550_v38  ;;  %v866_v3 = vmul.f32 %v2556_v41, %v2556_v41  ;;  %v2578_v60 = vsub.f32 %v2163_v10, %v2526_v22  ;;  %v2585_v0 = vsub.f32 %v2175_v18, %v2526_v22 }
 0x178   :  { %v925_v47 = vsel %vm662_vm1, %v861_v19, 0.0  ;;  %v926_v59 = vsel %vm662_vm1, %v862_v5, 0.0  ;;  %v928_v55 = vsel %vm662_vm1, %v863_v42, 0.0  ;;  %v930_v39 = vsel %vm662_vm1, %v864_v44, 0.0 }
 0x179   :  { %v927_v43 = vadd.f32 %v926_v59, %v925_v47  ;;  %v867_v19 = vmul.f32 %v2564_v27, %v2564_v27  ;;  %v932_v5 = vsel %vm662_vm1, %v865_v54, 0.0  ;;  %v868_v47 = vmul.f32 %v2571_v62, %v2571_v62 }
 0x17a   :  { %v934_v44 = vsel %vm662_vm1, %v866_v3, 0.0  ;;  %v2592_v10 = vsub.f32 %v2170_v16, %v2526_v22  ;;  %v2599_v18 = vsub.f32 %v2178_v20, %v2526_v22  ;;  %v2606_v16 = vsub.f32 %v2191_v30, %v2526_v22 }
 0x17b   :  { %v929_v2 = vadd.f32 %v928_v55, %v927_v43  ;;  %v869_v43 = vmul.f32 %v2578_v60, %v2578_v60  ;;  %v936_v54 = vsel %vm662_vm1, %v867_v19, 0.0  ;;  %v938_v3 = vsel %vm662_vm1, %v868_v47, 0.0 }
 0x17c   :  { %v2613_v20 = vsub.f32 %v2203_v40, %v2526_v22  ;;  %v2620_v30 = vsub.f32 %v2198_v37, %v2526_v22  ;;  %v2627_v40 = vsub.f32 %v2206_v45, %v2526_v22  ;;  %v2634_v37 = vsub.f32 %v2219_v61, %v2526_v22 }
 0x17d   :  { %v931_v48 = vadd.f32 %v930_v39, %v929_v2  ;;  %v870_v2 = vmul.f32 %v2585_v0, %v2585_v0  ;;  %v940_v19 = vsel %vm662_vm1, %v869_v43, 0.0  ;;  %v2641_v45 = vsub.f32 %v2231_v9, %v2526_v22 }
 0x17e   :  { %v2648_v61 = vsub.f32 %v2226_v6, %v2526_v22  ;;  %v2655_v9 = vsub.f32 %v2234_v13, %v2526_v22  ;;  %v2662_v6 = vsub.f32 %v2247_v29, %v2526_v22 }
 0x17f   :  { %v933_v42 = vadd.f32 %v932_v5, %v931_v48  ;;  %v871_v48 = vmul.f32 %v2592_v10, %v2592_v10  ;;  %v942_v47 = vsel %vm662_vm1, %v870_v2, 0.0 }
 0x180   :  { %4084 = vst [vmem:[#allocation18_spill] sm:$0xff] %v2662_v6 }
 0x181   :  { %v935_v59 = vadd.f32 %v934_v44, %v933_v42  ;;  %v872_v42 = vmul.f32 %v2599_v18, %v2599_v18  ;;  %v944_v43 = vsel %vm662_vm1, %v871_v48, 0.0 }
 0x183   :  { %v937_v55 = vadd.f32 %v936_v54, %v935_v59  ;;  %v873_v59 = vmul.f32 %v2606_v16, %v2606_v16  ;;  %v946_v2 = vsel %vm662_vm1, %v872_v42, 0.0 }
 0x185   :  { %v939_v39 = vadd.f32 %v938_v3, %v937_v55  ;;  %v874_v55 = vmul.f32 %v2613_v20, %v2613_v20  ;;  %v948_v48 = vsel %vm662_vm1, %v873_v59, 0.0 }
 0x187   :  { %v941_v5 = vadd.f32 %v940_v19, %v939_v39  ;;  %v875_v39 = vmul.f32 %v2620_v30, %v2620_v30  ;;  %v950_v42 = vsel %vm662_vm1, %v874_v55, 0.0 }
 0x189   :  { %v943_v44 = vadd.f32 %v942_v47, %v941_v5  ;;  %v876_v5 = vmul.f32 %v2627_v40, %v2627_v40  ;;  %v952_v59 = vsel %vm662_vm1, %v875_v39, 0.0 }
 0x18b   :  { %v945_v54 = vadd.f32 %v944_v43, %v943_v44  ;;  %v877_v44 = vmul.f32 %v2634_v37, %v2634_v37  ;;  %v954_v55 = vsel %vm662_vm1, %v876_v5, 0.0 }
 0x18d   :  { %v947_v3 = vadd.f32 %v946_v2, %v945_v54  ;;  %v878_v54 = vmul.f32 %v2641_v45, %v2641_v45  ;;  %v956_v39 = vsel %vm662_vm1, %v877_v44, 0.0 }
 0x18f   :  { %v949_v19 = vadd.f32 %v948_v48, %v947_v3  ;;  %v879_v3 = vmul.f32 %v2648_v61, %v2648_v61  ;;  %v958_v5 = vsel %vm662_vm1, %v878_v54, 0.0 }
 0x191   :  { %v951_v47 = vadd.f32 %v950_v42, %v949_v19  ;;  %v4085_v19 = vld [vmem:[#allocation3_spill] sm:$0xff]  ;;  %v880_v42 = vmul.f32 %v2655_v9, %v2655_v9  ;;  %v960_v44 = vsel %vm662_vm1, %v879_v3, 0.0 }
 0x192   :  { %v2669_v13 = vsub.f32 %v4085_v19, %v2526_v22 }
 0x193   :  { %v953_v43 = vadd.f32 %v952_v59, %v951_v47  ;;  %v4087_v59 = vld [vmem:[#allocation2_spill] sm:$0xff]  ;;  %v962_v54 = vsel %vm662_vm1, %v880_v42, 0.0 }
 0x194   :  { %4086 = vst [vmem:[#allocation3_spill] sm:$0xff] %v2669_v13  ;;  %v2676_v29 = vsub.f32 %v4087_v59, %v2526_v22  ;;  %v882_v19 = vmul.f32 %v2669_v13, %v2669_v13 }
 0x195   :  { %v955_v2 = vadd.f32 %v954_v55, %v953_v43  ;;  %v881_v43 = vmul.f32 %v2662_v6, %v2662_v6 }
 0x196   :  { %4088 = vst [vmem:[#allocation2_spill] sm:$0xff] %v2676_v29  ;;  %v883_v6 = vmul.f32 %v2676_v29, %v2676_v29  ;;  %v966_v42 = vsel %vm662_vm1, %v882_v19, 0.0 }
 0x197   :  { %v957_v48 = vadd.f32 %v956_v39, %v955_v2  ;;  %v4089_v2 = vld [vmem:[#allocation4_spill] sm:$0xff]  ;;  %v964_v3 = vsel %vm662_vm1, %v881_v43, 0.0 }
 0x198   :  { %v2683_v39 = vsub.f32 %v4089_v2, %v2526_v22  ;;  %v968_v43 = vsel %vm662_vm1, %v883_v6, 0.0 }
 0x199   :  { %v959_v47 = vadd.f32 %v958_v5, %v957_v48  ;;  %v4091_v5 = vld [vmem:[#allocation5_spill] sm:$0xff] }
 0x19a   :  { %4090 = vst [vmem:[#allocation4_spill] sm:$0xff] %v2683_v39  ;;  %v2690_v59 = vsub.f32 %v4091_v5, %v2526_v22  ;;  %v884_v13 = vmul.f32 %v2683_v39, %v2683_v39 }
 0x19b   :  { %v961_v55 = vadd.f32 %v960_v44, %v959_v47  ;;  %v4093_v44 = vld [vmem:[#allocation7_spill] sm:$0xff] }
 0x19c   :  { %4092 = vst [vmem:[#allocation5_spill] sm:$0xff] %v2690_v59  ;;  %v2697_v2 = vsub.f32 %v4093_v44, %v2526_v22  ;;  %v885_v29 = vmul.f32 %v2690_v59, %v2690_v59  ;;  %v970_v19 = vsel %vm662_vm1, %v884_v13, 0.0 }
 0x19d   :  { %v963_v48 = vadd.f32 %v962_v54, %v961_v55  ;;  %v4094_v54 = vld [vmem:[#allocation6_spill] sm:$0xff] }
 0x19e   :  { %v2704_v5 = vsub.f32 %v4094_v54, %v2526_v22  ;;  %v886_v39 = vmul.f32 %v2697_v2, %v2697_v2  ;;  %v972_v6 = vsel %vm662_vm1, %v885_v29, 0.0 }
 0x19f   :  { %v965_v47 = vadd.f32 %v964_v3, %v963_v48  ;;  %v4096_v3 = vld [vmem:[#allocation8_spill] sm:$0xff] }
 0x1a0   :  { %4095 = vst [vmem:[#allocation7_spill] sm:$0xff] %v2704_v5  ;;  %v2711_v44 = vsub.f32 %v4096_v3, %v2526_v22  ;;  %v887_v59 = vmul.f32 %v2704_v5, %v2704_v5  ;;  %v974_v13 = vsel %vm662_vm1, %v886_v39, 0.0 }
 0x1a1   :  { %v967_v55 = vadd.f32 %v966_v42, %v965_v47  ;;  %v4098_v42 = vld [vmem:[#allocation9_spill] sm:$0xff] }
 0x1a2   :  { %4097 = vst [vmem:[#allocation6_spill] sm:$0xff] %v2711_v44  ;;  %v2718_v54 = vsub.f32 %v4098_v42, %v2526_v22  ;;  %v888_v3 = vmul.f32 %v2711_v44, %v2711_v44  ;;  %v976_v29 = vsel %vm662_vm1, %v887_v59, 0.0 }
 0x1a3   :  { %v969_v48 = vadd.f32 %v968_v43, %v967_v55  ;;  %v2725_v43 = vsub.f32 %v2315_v7, %v2526_v22 }
 0x1a4   :  { %4099 = vst [vmem:[#allocation8_spill] sm:$0xff] %v2718_v54  ;;  %v889_v5 = vmul.f32 %v2718_v54, %v2718_v54  ;;  %v978_v39 = vsel %vm662_vm1, %v888_v3, 0.0 }
 0x1a5   :  { %v971_v47 = vadd.f32 %v970_v19, %v969_v48  ;;  %v4100_v19 = vld [vmem:[#allocation10_spill] sm:$0xff]  ;;  %v890_v44 = vmul.f32 %v2725_v43, %v2725_v43 }
 0x1a6   :  { %v2732_v42 = vsub.f32 %v4100_v19, %v2526_v22  ;;  %v980_v59 = vsel %vm662_vm1, %v889_v5, 0.0 }
 0x1a7   :  { %v973_v55 = vadd.f32 %v972_v6, %v971_v47  ;;  %v4101_v6 = vld [vmem:[#allocation11_spill] sm:$0xff]  ;;  %v982_v3 = vsel %vm662_vm1, %v890_v44, 0.0 }
 0x1a8   :  { %v2739_v7 = vsub.f32 %v4101_v6, %v2526_v22  ;;  %v891_v54 = vmul.f32 %v2732_v42, %v2732_v42 }
 0x1a9   :  { %v975_v48 = vadd.f32 %v974_v13, %v973_v55  ;;  %v4102_v13 = vld [vmem:[#allocation12_spill] sm:$0xff] }
 0x1aa   :  { %v2746_v19 = vsub.f32 %v4102_v13, %v2526_v22  ;;  %v892_v6 = vmul.f32 %v2739_v7, %v2739_v7  ;;  %v984_v5 = vsel %vm662_vm1, %v891_v54, 0.0 }
 0x1ab   :  { %v977_v47 = vadd.f32 %v976_v29, %v975_v48  ;;  %v2753_v29 = vsub.f32 %v2338_v63, %v2526_v22  ;;  %v2767_v63 = vsub.f32 %v2350_v53, %v2526_v22  ;;  %v2781_v53 = vsub.f32 %v2366_v56, %v2526_v22 }
 0x1ac   :  { %4103 = vst [vmem:[#allocation9_spill] sm:$0xff] %v2746_v19  ;;  %v893_v13 = vmul.f32 %v2746_v19, %v2746_v19  ;;  %v986_v44 = vsel %vm662_vm1, %v892_v6, 0.0  ;;  %v2795_v56 = vsub.f32 %v2374_v11, %v2526_v22  ;;  %v2809_v11 = vsub.f32 %v2390_v12, %v2526_v22 }
 0x1ad   :  { %v979_v55 = vadd.f32 %v978_v39, %v977_v47  ;;  %v2760_v39 = vsub.f32 %v2346_v24, %v2526_v22  ;;  %v2823_v12 = vsub.f32 %v2398_v17, %v2526_v22  ;;  %v2837_v17 = vsub.f32 %v2414_v32, %v2526_v22 }
 0x1ae   :  { %v988_v54 = vsel %vm662_vm1, %v893_v13, 0.0  ;;  %v2851_v32 = vsub.f32 %v2422_v46, %v2526_v22  ;;  %v2865_v46 = vsub.f32 %v2438_v1, %v2526_v22  ;;  %v2879_v1 = vsub.f32 %v2446_v50, %v2526_v22 }
 0x1af   :  { %v981_v48 = vadd.f32 %v980_v59, %v979_v55  ;;  %v894_v59 = vmul.f32 %v2753_v29, %v2753_v29  ;;  %v895_v19 = vmul.f32 %v2760_v39, %v2760_v39  ;;  %v2893_v50 = vsub.f32 %v2462_v33, %v2526_v22 }
 0x1b0   :  { %v2907_v33 = vsub.f32 %v2470_v49, %v2526_v22  ;;  %v2921_v49 = vsub.f32 %v2486_v23, %v2526_v22 }
 0x1b1   :  { %v983_v47 = vadd.f32 %v982_v3, %v981_v48  ;;  %v4104_v3 = vld [vmem:[#allocation13_spill] sm:$0xff]  ;;  %v990_v6 = vsel %vm662_vm1, %v894_v59, 0.0  ;;  %v992_v13 = vsel %vm662_vm1, %v895_v19, 0.0  ;;  %4105 = vst [vmem:[#allocation10_spill] sm:$0xff] %v2893_v50 }
 0x1b2   :  { %v2774_v24 = vsub.f32 %v4104_v3, %v2526_v22  ;;  %4107 = vst [vmem:[#allocation12_spill] sm:$0xff] %v2907_v33  ;;  %4109 = vst [vmem:[#allocation19_spill] sm:$0xff] %v2921_v49 }
 0x1b3   :  { %v985_v55 = vadd.f32 %v984_v5, %v983_v47  ;;  %v896_v5 = vmul.f32 %v2767_v63, %v2767_v63 }
 0x1b4   :  { %v897_v3 = vmul.f32 %v2774_v24, %v2774_v24 }
 0x1b5   :  { %v987_v48 = vadd.f32 %v986_v44, %v985_v55  ;;  %v2788_v44 = vsub.f32 %v2370_v8, %v2526_v22  ;;  %v994_v59 = vsel %vm662_vm1, %v896_v5, 0.0  ;;  %v2802_v8 = vsub.f32 %v2380_v21, %v2526_v22 }
 0x1b6   :  { %v996_v19 = vsel %vm662_vm1, %v897_v3, 0.0  ;;  %v2816_v21 = vsub.f32 %v2394_v28, %v2526_v22  ;;  %v2830_v28 = vsub.f32 %v2404_v34, %v2526_v22  ;;  %v2844_v34 = vsub.f32 %v2418_v57, %v2526_v22 }
 0x1b7   :  { %v989_v47 = vadd.f32 %v988_v54, %v987_v48  ;;  %v898_v54 = vmul.f32 %v2781_v53, %v2781_v53  ;;  %v2858_v57 = vsub.f32 %v2428_v15, %v2526_v22  ;;  %v2872_v15 = vsub.f32 %v2442_v26, %v2526_v22 }
 0x1b8   :  { %v2886_v26 = vsub.f32 %v2452_v36, %v2526_v22  ;;  %v2900_v36 = vsub.f32 %v2466_v14, %v2526_v22  ;;  %v2914_v14 = vsub.f32 %v2476_v4, %v2526_v22 }
 0x1b9   :  { %v991_v55 = vadd.f32 %v990_v6, %v989_v47  ;;  %v899_v6 = vmul.f32 %v2788_v44, %v2788_v44  ;;  %v998_v5 = vsel %vm662_vm1, %v898_v54, 0.0 }
 0x1ba   :  { %4106 = vst [vmem:[#allocation11_spill] sm:$0xff] %v2900_v36  ;;  %4108 = vst [vmem:[#allocation13_spill] sm:$0xff] %v2914_v14 }
 0x1bb   :  { %v993_v48 = vadd.f32 %v992_v13, %v991_v55  ;;  %v900_v13 = vmul.f32 %v2795_v56, %v2795_v56  ;;  %v1000_v3 = vsel %vm662_vm1, %v899_v6, 0.0 }
 0x1bd   :  { %v995_v47 = vadd.f32 %v994_v59, %v993_v48  ;;  %v901_v59 = vmul.f32 %v2802_v8, %v2802_v8  ;;  %v1002_v54 = vsel %vm662_vm1, %v900_v13, 0.0 }
 0x1bf   :  { %v997_v55 = vadd.f32 %v996_v19, %v995_v47  ;;  %v902_v19 = vmul.f32 %v2809_v11, %v2809_v11  ;;  %v1004_v6 = vsel %vm662_vm1, %v901_v59, 0.0 }
 0x1c1   :  { %v999_v48 = vadd.f32 %v998_v5, %v997_v55  ;;  %v903_v5 = vmul.f32 %v2816_v21, %v2816_v21  ;;  %v1006_v13 = vsel %vm662_vm1, %v902_v19, 0.0 }
 0x1c3   :  { %v1001_v47 = vadd.f32 %v1000_v3, %v999_v48  ;;  %v904_v3 = vmul.f32 %v2823_v12, %v2823_v12  ;;  %v1008_v59 = vsel %vm662_vm1, %v903_v5, 0.0 }
 0x1c5   :  { %v1003_v55 = vadd.f32 %v1002_v54, %v1001_v47  ;;  %v905_v54 = vmul.f32 %v2830_v28, %v2830_v28  ;;  %v1010_v19 = vsel %vm662_vm1, %v904_v3, 0.0 }
 0x1c7   :  { %v1005_v48 = vadd.f32 %v1004_v6, %v1003_v55  ;;  %v906_v6 = vmul.f32 %v2837_v17, %v2837_v17  ;;  %v1012_v5 = vsel %vm662_vm1, %v905_v54, 0.0 }
 0x1c9   :  { %v1007_v47 = vadd.f32 %v1006_v13, %v1005_v48  ;;  %v907_v13 = vmul.f32 %v2844_v34, %v2844_v34  ;;  %v1014_v3 = vsel %vm662_vm1, %v906_v6, 0.0 }
 0x1cb   :  { %v1009_v55 = vadd.f32 %v1008_v59, %v1007_v47  ;;  %v908_v59 = vmul.f32 %v2851_v32, %v2851_v32  ;;  %v1016_v54 = vsel %vm662_vm1, %v907_v13, 0.0 }
 0x1cd   :  { %v1011_v48 = vadd.f32 %v1010_v19, %v1009_v55  ;;  %v909_v19 = vmul.f32 %v2858_v57, %v2858_v57  ;;  %v1018_v6 = vsel %vm662_vm1, %v908_v59, 0.0 }
 0x1cf   :  { %v1013_v47 = vadd.f32 %v1012_v5, %v1011_v48  ;;  %v910_v5 = vmul.f32 %v2865_v46, %v2865_v46  ;;  %v1020_v13 = vsel %vm662_vm1, %v909_v19, 0.0 }
 0x1d1   :  { %v1015_v55 = vadd.f32 %v1014_v3, %v1013_v47  ;;  %v911_v3 = vmul.f32 %v2872_v15, %v2872_v15  ;;  %v1022_v59 = vsel %vm662_vm1, %v910_v5, 0.0 }
 0x1d3   :  { %v1017_v48 = vadd.f32 %v1016_v54, %v1015_v55  ;;  %v912_v54 = vmul.f32 %v2879_v1, %v2879_v1  ;;  %v1024_v19 = vsel %vm662_vm1, %v911_v3, 0.0 }
 0x1d5   :  { %v1019_v47 = vadd.f32 %v1018_v6, %v1017_v48  ;;  %v913_v6 = vmul.f32 %v2886_v26, %v2886_v26  ;;  %v1026_v5 = vsel %vm662_vm1, %v912_v54, 0.0 }
 0x1d7   :  { %v1021_v55 = vadd.f32 %v1020_v13, %v1019_v47  ;;  %v914_v13 = vmul.f32 %v2893_v50, %v2893_v50  ;;  %v1028_v3 = vsel %vm662_vm1, %v913_v6, 0.0 }
 0x1d9   :  { %v1023_v48 = vadd.f32 %v1022_v59, %v1021_v55  ;;  %v915_v59 = vmul.f32 %v2900_v36, %v2900_v36  ;;  %v1030_v54 = vsel %vm662_vm1, %v914_v13, 0.0  ;;  %v917_v36 = vmul.f32 %v2914_v14, %v2914_v14 }
 0x1db   :  { %v1025_v47 = vadd.f32 %v1024_v19, %v1023_v48  ;;  %v916_v19 = vmul.f32 %v2907_v33, %v2907_v33  ;;  %v1032_v6 = vsel %vm662_vm1, %v915_v59, 0.0  ;;  %v918_v33 = vmul.f32 %v2921_v49, %v2921_v49 }
 0x1dc   :  { %v1036_v59 = vsel %vm662_vm1, %v917_v36, 0.0 }
 0x1dd   :  { %v1027_v55 = vadd.f32 %v1026_v5, %v1025_v47  ;;  %v4110_v5 = vld [vmem:[#allocation14_spill] sm:$0xff]  ;;  %v1034_v13 = vsel %vm662_vm1, %v916_v19, 0.0  ;;  %v1038_v19 = vsel %vm662_vm1, %v918_v33, 0.0 }
 0x1de   :  { %v2928_v4 = vsub.f32 %v4110_v5, %v2526_v22 }
 0x1df   :  { %v1029_v48 = vadd.f32 %v1028_v3, %v1027_v55  ;;  %v4112_v3 = vld [vmem:[#allocation15_spill] sm:$0xff] }
 0x1e0   :  { %4111 = vst [vmem:[#allocation14_spill] sm:$0xff] %v2928_v4  ;;  %v2935_v23 = vsub.f32 %v4112_v3, %v2526_v22  ;;  %v919_v14 = vmul.f32 %v2928_v4, %v2928_v4 }
 0x1e1   :  { %v1031_v47 = vadd.f32 %v1030_v54, %v1029_v48  ;;  %v4114_v54 = vld [vmem:[#allocation16_spill] sm:$0xff] }
 0x1e2   :  { %4113 = vst [vmem:[#allocation15_spill] sm:$0xff] %v2935_v23  ;;  %v2942_v5 = vsub.f32 %v4114_v54, %v2526_v22  ;;  %v920_v49 = vmul.f32 %v2935_v23, %v2935_v23  ;;  %v1040_v36 = vsel %vm662_vm1, %v919_v14, 0.0 }
 0x1e3   :  { %v1033_v55 = vadd.f32 %v1032_v6, %v1031_v47  ;;  %v4116_v6 = vld [vmem:[#allocation17_spill] sm:$0xff] }
 0x1e4   :  { %4115 = vst [vmem:[#allocation16_spill] sm:$0xff] %v2942_v5  ;;  %v2949_v3 = vsub.f32 %v4116_v6, %v2526_v22  ;;  %v921_v54 = vmul.f32 %v2942_v5, %v2942_v5  ;;  %v1042_v33 = vsel %vm662_vm1, %v920_v49, 0.0 }
 0x1e5   :  { %v1035_v48 = vadd.f32 %v1034_v13, %v1033_v55  ;;  %v2956_v13 = vsub.f32 %v2514_v25, %v2526_v22 }
 0x1e6   :  { %4117 = vst [vmem:[#allocation17_spill] sm:$0xff] %v2949_v3  ;;  %v922_v6 = vmul.f32 %v2949_v3, %v2949_v3 }
 0x1e7   :  { %v1037_v47 = vadd.f32 %v1036_v59, %v1035_v48  ;;  %4118 = vst [vmem:[#allocation20_spill] sm:$0xff] %v2956_v13  ;;  %v2963_v59 = vsub.f32 %v2522_v31, %v2526_v22  ;;  %v923_v25 = vmul.f32 %v2956_v13, %v2956_v13 }
 0x1e9   :  { %v1039_v55 = vadd.f32 %v1038_v19, %v1037_v47  ;;  %4119 = vst [vmem:[#allocation21_spill] sm:$0xff] %v2963_v59  ;;  %v1044_v19 = vsel %vm662_vm1, %v921_v54, 0.0  ;;  %v924_v14 = vmul.f32 %v2963_v59, %v2963_v59  ;;  %v1048_v22 = vsel %vm662_vm1, %v923_v25, 0.0 }
 0x1eb   :  { %v1041_v48 = vadd.f32 %v1040_v36, %v1039_v55  ;;  %v1046_v55 = vsel %vm662_vm1, %v922_v6, 0.0  ;;  %v1050_v3 = vsel %vm662_vm1, %v924_v14, 0.0 }
 0x1ed   :  { %v1043_v47 = vadd.f32 %v1042_v33, %v1041_v48 }
 0x1ef   :  { %v1045_v23 = vadd.f32 %v1044_v19, %v1043_v47  ;;  %v1064_v19 = vlaneseq }
 0x1f1   :  { %v1047_v36 = vadd.f32 %v1046_v55, %v1045_v23  ;;  %v1065_v59 = vshrl.u32 %v1064_v19, 7  ;;  %v1059_v23 = vld [vmem:[%s4013_s3] sm:$0x1] }
 0x1f3   :  { %v1049_v31 = vadd.f32 %v1048_v22, %v1047_v36  ;;  %v1066_v6 = vsub.s32 0, %v1065_v59  ;;  %v4120_v59 = vld [vmem:[#allocation18_spill] sm:$0xff]  ;;  %v4121_v36 = vld [vmem:[#allocation3_spill] sm:$0xff] }
 0x1f4   :  { %v4122_v22 = vld [vmem:[#allocation2_spill] sm:$0xff] }
 0x1f5   :  { %v1051_v5 = vadd.f32 %v1050_v3, %v1049_v31  ;;  %v4123_v31 = vld [vmem:[#allocation4_spill] sm:$0xff] }
 0x1f7   :  { %v1052_v49 = vrot.slane %v1051_v5, 4 }
 0x1f9   :  { %v1053_v48 = vadd.f32 %v1052_v49, %v1051_v5  ;;  %v4124_v49 = vld [vmem:[#allocation5_spill] sm:$0xff] }
 0x1fb   :  { %v1054_v33 = vrot.slane %v1053_v48, 2 }
 0x1fd   :  { %v1055_v4 = vadd.f32 %v1054_v33, %v1053_v48  ;;  %v4125_v33 = vld [vmem:[#allocation7_spill] sm:$0xff] }
 0x1ff   :  { %v1056_v13 = vrot.slane %v1055_v4, 1 }
 0x201   :  { %v1057_v50 = vadd.f32 %v1056_v13, %v1055_v4 }
 0x203   :  { %v1058_v54 = vmul.f32 0.001953125, %v1057_v50 }
 0x205   :  { %v1060_v47 = vadd.f32 1e-05, %v1058_v54 }
 0x207   :  { %1936 = vrsqrt.f32 %v1060_v47  ;;  %v4126_v47 = vld [vmem:[#allocation6_spill] sm:$0xff] }
 0x211   :  { %v1937_v25 = vpop.eup %1936 }
 0x212   :  { %v1062_v55 = vmul.f32 %v1937_v25, %v1059_v23  ;;  %v4127_v23 = vld [vmem:[#allocation8_spill] sm:$0xff] }
 0x214   :  { %v2979_v14 = vrot.slane %v1062_v55, %v1066_v6 }
 0x216   :  { %v2983_v5 = vmul.f32 %v2979_v14, %v2530_v51  ;;  %v2987_v50 = vmul.f32 %v2979_v14, %v2534_v35  ;;  %v2991_v4 = vmul.f32 %v2979_v14, %v2538_v52  ;;  %v2995_v3 = vmul.f32 %v2979_v14, %v2542_v58 }
 0x217   :  { %v2999_v13 = vmul.f32 %v2979_v14, %v2550_v38  ;;  %v3003_v51 = vmul.f32 %v2979_v14, %v2556_v41  ;;  %v3007_v35 = vmul.f32 %v2979_v14, %v2564_v27  ;;  %v3011_v52 = vmul.f32 %v2979_v14, %v2571_v62 }
 0x218   :  { %v3015_v58 = vmul.f32 %v2979_v14, %v2578_v60  ;;  %v3019_v38 = vmul.f32 %v2979_v14, %v2585_v0  ;;  %v3023_v41 = vmul.f32 %v2979_v14, %v2592_v10  ;;  %v3027_v27 = vmul.f32 %v2979_v14, %v2599_v18 }
 0x219   :  { %v3031_v62 = vmul.f32 %v2979_v14, %v2606_v16  ;;  %v3035_v60 = vmul.f32 %v2979_v14, %v2613_v20  ;;  %v3039_v0 = vmul.f32 %v2979_v14, %v2620_v30  ;;  %v3043_v10 = vmul.f32 %v2979_v14, %v2627_v40 }
 0x21a   :  { %v3047_v18 = vmul.f32 %v2979_v14, %v2634_v37  ;;  %v3051_v16 = vmul.f32 %v2979_v14, %v2641_v45  ;;  %v3055_v20 = vmul.f32 %v2979_v14, %v2648_v61  ;;  %v3059_v30 = vmul.f32 %v2979_v14, %v2655_v9 }
 0x21b   :  { %v3063_v40 = vmul.f32 %v2979_v14, %v4120_v59  ;;  %v3067_v37 = vmul.f32 %v2979_v14, %v4121_v36  ;;  %v3071_v45 = vmul.f32 %v2979_v14, %v4122_v22  ;;  %v3075_v61 = vmul.f32 %v2979_v14, %v4123_v31  ;;  %v4128_v59 = vld [vmem:[#allocation9_spill] sm:$0xff] }
 0x21c   :  { %v3079_v9 = vmul.f32 %v2979_v14, %v4124_v49  ;;  %v3083_v48 = vmul.f32 %v2979_v14, %v2697_v2  ;;  %v3087_v54 = vmul.f32 %v2979_v14, %v4125_v33  ;;  %v3091_v19 = vmul.f32 %v2979_v14, %v4126_v47  ;;  %v4131_v49 = vld [vmem:[#allocation10_spill] sm:$0xff]  ;;  %v4133_v33 = vld [vmem:[#allocation11_spill] sm:$0xff]  ;;  %v4135_v47 = vld [vmem:[#allocation12_spill] sm:$0xff] }
 0x21d   :  { %v3095_v6 = vmul.f32 %v2979_v14, %v4127_v23  ;;  %v3099_v25 = vmul.f32 %v2979_v14, %v2725_v43  ;;  %v3103_v2 = vmul.f32 %v2979_v14, %v2732_v42  ;;  %v3107_v55 = vmul.f32 %v2979_v14, %v2739_v7  ;;  %v4137_v23 = vld [vmem:[#allocation13_spill] sm:$0xff] }
 0x21e   :  { %v3111_v36 = vmul.f32 %v2979_v14, %v4128_v59  ;;  %v3115_v22 = vmul.f32 %v2979_v14, %v2753_v29  ;;  %v3119_v43 = vmul.f32 %v2979_v14, %v2760_v39  ;;  %v3123_v42 = vmul.f32 %v2979_v14, %v2767_v63  ;;  %v4139_v59 = vld [vmem:[#allocation19_spill] sm:$0xff] }
 0x21f   :  { %v3127_v7 = vmul.f32 %v2979_v14, %v2774_v24  ;;  %v3131_v31 = vmul.f32 %v2979_v14, %v2781_v53  ;;  %v3135_v29 = vmul.f32 %v2979_v14, %v2788_v44  ;;  %v3139_v39 = vmul.f32 %v2979_v14, %v2795_v56 }
 0x220   :  { %v3143_v63 = vmul.f32 %v2979_v14, %v2802_v8  ;;  %v3147_v24 = vmul.f32 %v2979_v14, %v2809_v11  ;;  %v3151_v53 = vmul.f32 %v2979_v14, %v2816_v21  ;;  %v3155_v44 = vmul.f32 %v2979_v14, %v2823_v12 }
 0x221   :  { %v3159_v56 = vmul.f32 %v2979_v14, %v2830_v28  ;;  %v3163_v8 = vmul.f32 %v2979_v14, %v2837_v17  ;;  %v3167_v11 = vmul.f32 %v2979_v14, %v2844_v34  ;;  %v3171_v21 = vmul.f32 %v2979_v14, %v2851_v32 }
 0x222   :  { %v3175_v12 = vmul.f32 %v2979_v14, %v2858_v57  ;;  %v3179_v28 = vmul.f32 %v2979_v14, %v2865_v46  ;;  %v3183_v17 = vmul.f32 %v2979_v14, %v2872_v15  ;;  %v3187_v34 = vmul.f32 %v2979_v14, %v2879_v1  ;;  %v3208_v1 = vld [vmem:[%s4014_s4] ss:$0 sm:$0xff] }
 0x223   :  { %v3191_v32 = vmul.f32 %v2979_v14, %v2886_v26  ;;  %v3195_v57 = vmul.f32 %v2979_v14, %v4131_v49  ;;  %v3199_v46 = vmul.f32 %v2979_v14, %v4133_v33  ;;  %v3203_v15 = vmul.f32 %v2979_v14, %v4135_v47 }
 0x224   :  { %4129 = vst [vmem:[#allocation18_spill] sm:$0xff] %v3187_v34  ;;  %v3212_v26 = vmul.f32 %v2979_v14, %v4137_v23  ;;  %v3216_v49 = vmul.f32 %v2979_v14, %v4139_v59  ;;  %v4144_v34 = vld [vmem:[#allocation17_spill] sm:$0xff] }
 0x225   :  { %4130 = vst [vmem:[#allocation3_spill] sm:$0xff] %v3191_v32  ;;  %4132 = vst [vmem:[#allocation2_spill] sm:$0xff] %v3195_v57  ;;  %v4141_v57 = vld [vmem:[#allocation14_spill] sm:$0xff]  ;;  %v3232_v23 = vmul.f32 %v2979_v14, %v4144_v34  ;;  %v3252_v34 = vadd.f32 %v3208_v1, %v2991_v4  ;;  %v3272_v4 = vadd.f32 %v3208_v1, %v3011_v52 }
 0x226   :  { %4134 = vst [vmem:[#allocation4_spill] sm:$0xff] %v3199_v46  ;;  %4136 = vst [vmem:[#allocation5_spill] sm:$0xff] %v3203_v15  ;;  %v3220_v33 = vmul.f32 %v2979_v14, %v4141_v57  ;;  %v4142_v46 = vld [vmem:[#allocation15_spill] sm:$0xff]  ;;  %v4143_v15 = vld [vmem:[#allocation16_spill] sm:$0xff]  ;;  %v3292_v52 = vadd.f32 %v3208_v1, %v3031_v62  ;;  %v3312_v62 = vadd.f32 %v3208_v1, %v3051_v16 }
 0x227   :  { %4138 = vst [vmem:[#allocation7_spill] sm:$0xff] %v3212_v26  ;;  %4140 = vst [vmem:[#allocation6_spill] sm:$0xff] %v3216_v49  ;;  %v3224_v47 = vmul.f32 %v2979_v14, %v4142_v46  ;;  %v3228_v32 = vmul.f32 %v2979_v14, %v4143_v15  ;;  %v4145_v26 = vld [vmem:[#allocation20_spill] sm:$0xff]  ;;  %v4146_v49 = vld [vmem:[#allocation21_spill] sm:$0xff]  ;;  %v3244_v46 = vadd.f32 %v3208_v1, %v2983_v5 }
 0x228   :  { %v3236_v59 = vmul.f32 %v2979_v14, %v4145_v26  ;;  %v3240_v57 = vmul.f32 %v2979_v14, %v4146_v49  ;;  %v3248_v15 = vadd.f32 %v3208_v1, %v2987_v50  ;;  %v3256_v26 = vadd.f32 %v3208_v1, %v2995_v3 }
 0x229   :  { %v3260_v14 = vadd.f32 %v3208_v1, %v2999_v13  ;;  %v3264_v5 = vadd.f32 %v3208_v1, %v3003_v51  ;;  %v3268_v50 = vadd.f32 %v3208_v1, %v3007_v35  ;;  %v3276_v3 = vadd.f32 %v3208_v1, %v3015_v58 }
 0x22a   :  { %v3280_v13 = vadd.f32 %v3208_v1, %v3019_v38  ;;  %v3284_v51 = vadd.f32 %v3208_v1, %v3023_v41  ;;  %v3288_v35 = vadd.f32 %v3208_v1, %v3027_v27  ;;  %v3296_v58 = vadd.f32 %v3208_v1, %v3035_v60 }
 0x22b   :  { %v3300_v38 = vadd.f32 %v3208_v1, %v3039_v0  ;;  %v3304_v41 = vadd.f32 %v3208_v1, %v3043_v10  ;;  %v3308_v27 = vadd.f32 %v3208_v1, %v3047_v18  ;;  %v3316_v60 = vadd.f32 %v3208_v1, %v3055_v20  ;;  %v4157_v49 = vld [vmem:[#allocation18_spill] sm:$0xff] }
 0x22c   :  { %v3320_v0 = vadd.f32 %v3208_v1, %v3059_v30  ;;  %v3324_v10 = vadd.f32 %v3208_v1, %v3063_v40  ;;  %v3328_v18 = vadd.f32 %v3208_v1, %v3067_v37  ;;  %v3332_v16 = vadd.f32 %v3208_v1, %v3071_v45 }
 0x22d   :  { %v3336_v20 = vadd.f32 %v3208_v1, %v3075_v61  ;;  %v3340_v30 = vadd.f32 %v3208_v1, %v3079_v9  ;;  %v3344_v40 = vadd.f32 %v3208_v1, %v3083_v48  ;;  %v3348_v37 = vadd.f32 %v3208_v1, %v3087_v54 }
 0x22e   :  { %v3352_v45 = vadd.f32 %v3208_v1, %v3091_v19  ;;  %v3356_v61 = vadd.f32 %v3208_v1, %v3095_v6  ;;  %v3360_v9 = vadd.f32 %v3208_v1, %v3099_v25  ;;  %v3364_v48 = vadd.f32 %v3208_v1, %v3103_v2 }
 0x22f   :  { %v3368_v54 = vadd.f32 %v3208_v1, %v3107_v55  ;;  %v3372_v19 = vadd.f32 %v3208_v1, %v3111_v36  ;;  %v3376_v6 = vadd.f32 %v3208_v1, %v3115_v22  ;;  %v3380_v25 = vadd.f32 %v3208_v1, %v3119_v43 }
 0x230   :  { %v3384_v2 = vadd.f32 %v3208_v1, %v3123_v42  ;;  %v3388_v55 = vadd.f32 %v3208_v1, %v3127_v7  ;;  %v3392_v36 = vadd.f32 %v3208_v1, %v3131_v31  ;;  %v3396_v22 = vadd.f32 %v3208_v1, %v3135_v29 }
 0x231   :  { %v3400_v43 = vadd.f32 %v3208_v1, %v3139_v39  ;;  %v3404_v42 = vadd.f32 %v3208_v1, %v3143_v63  ;;  %v3408_v7 = vadd.f32 %v3208_v1, %v3147_v24  ;;  %v3412_v31 = vadd.f32 %v3208_v1, %v3151_v53 }
 0x232   :  { %4147 = vst [vmem:[#allocation8_spill] sm:$0xff] %v3388_v55  ;;  %4148 = vst [vmem:[#allocation9_spill] sm:$0xff] %v3392_v36  ;;  %v3416_v29 = vadd.f32 %v3208_v1, %v3155_v44  ;;  %v3420_v39 = vadd.f32 %v3208_v1, %v3159_v56  ;;  %v3424_v63 = vadd.f32 %v3208_v1, %v3163_v8 }
 0x233   :  { %4149 = vst [vmem:[#allocation10_spill] sm:$0xff] %v3396_v22  ;;  %4150 = vst [vmem:[#allocation11_spill] sm:$0xff] %v3400_v43  ;;  %v3428_v24 = vadd.f32 %v3208_v1, %v3167_v11  ;;  %v3432_v53 = vadd.f32 %v3208_v1, %v3171_v21  ;;  %v3436_v44 = vadd.f32 %v3208_v1, %v3175_v12 }
 0x234   :  { %4151 = vst [vmem:[#allocation12_spill] sm:$0xff] %v3404_v42  ;;  %v3440_v56 = vadd.f32 %v3208_v1, %v3179_v28  ;;  %v3444_v8 = vadd.f32 %v3208_v1, %v3183_v17  ;;  %v3448_v11 = vadd.f32 %v3208_v1, %v4157_v49 }
 0x235   :  { %4152 = vst [vmem:[#allocation13_spill] sm:$0xff] %v3428_v24  ;;  %4153 = vst [vmem:[#allocation19_spill] sm:$0xff] %v3432_v53  ;;  %v4159_v24 = vld [vmem:[#allocation3_spill] sm:$0xff]  ;;  %v4160_v53 = vld [vmem:[#allocation2_spill] sm:$0xff] }
 0x236   :  { %4154 = vst [vmem:[#allocation14_spill] sm:$0xff] %v3436_v44  ;;  %4155 = vst [vmem:[#allocation15_spill] sm:$0xff] %v3440_v56  ;;  %v3452_v21 = vadd.f32 %v3208_v1, %v4159_v24  ;;  %v3456_v12 = vadd.f32 %v3208_v1, %v4160_v53  ;;  %v4161_v44 = vld [vmem:[#allocation4_spill] sm:$0xff]  ;;  %v4162_v56 = vld [vmem:[#allocation5_spill] sm:$0xff]  ;;  %v3476_v53 = vadd.f32 %v3208_v1, %v3220_v33 }
 0x237   :  { %4156 = vst [vmem:[#allocation16_spill] sm:$0xff] %v3444_v8  ;;  %4158 = vst [vmem:[#allocation17_spill] sm:$0xff] %v3448_v11  ;;  %v3460_v28 = vadd.f32 %v3208_v1, %v4161_v44  ;;  %v3464_v17 = vadd.f32 %v3208_v1, %v4162_v56  ;;  %v4163_v8 = vld [vmem:[#allocation7_spill] sm:$0xff]  ;;  %v4164_v11 = vld [vmem:[#allocation6_spill] sm:$0xff]  ;;  %v3480_v44 = vadd.f32 %v3208_v1, %v3224_v47 }
 0x238   :  { %v3468_v49 = vadd.f32 %v3208_v1, %v4163_v8  ;;  %v3472_v24 = vadd.f32 %v3208_v1, %v4164_v11  ;;  %4165 = vst [vmem:[#allocation20_spill] sm:$0xff] %v3476_v53  ;;  %v3484_v56 = vadd.f32 %v3208_v1, %v3228_v32  ;;  %v3488_v8 = vadd.f32 %v3208_v1, %v3232_v23 }
 0x239   :  { %4166 = vst [vmem:[#allocation21_spill] sm:$0xff] %v3480_v44  ;;  %v3492_v11 = vadd.f32 %v3208_v1, %v3236_v59  ;;  %v3496_v33 = vadd.f32 %v3208_v1, %v3240_v57  ;;  %v4177_v36 = vmov %v3480_v44  ;;  %v4184_v57 = vmax.f32 %v3256_v26, 0.0 }
 0x23a   :  { %4167 = vst [vmem:[#allocation18_spill] sm:$0xff] %v3484_v56  ;;  %4168 = vst [vmem:[#allocation3_spill] sm:$0xff] %v3488_v8  ;;  %v4178_v22 = vmov %v3484_v56  ;;  %v4179_v43 = vmov %v3488_v8  ;;  %v4181_v56 = vmax.f32 %v3244_v46, 0.0  ;;  %v4182_v8 = vmax.f32 %v3248_v15, 0.0 }
 0x23b   :  { %4169 = vst [vmem:[#allocation2_spill] sm:$0xff] %v3492_v11  ;;  %v4180_v42 = vmov %v3492_v11  ;;  %v4183_v11 = vmax.f32 %v3252_v34, 0.0  ;;  %v1729_v47 = vpack.c.bf16 %v4184_v57, %v4184_v57  ;;  %v4185_v44 = vmax.f32 %v3260_v14, 0.0 }
 0x23c   :  { %v4170_v53 = vld [vmem:[#allocation13_spill] sm:$0xff]  ;;  %v1726_v23 = vpack.c.bf16 %v4181_v56, %v4181_v56  ;;  %v1727_v59 = vpack.c.bf16 %v4182_v8, %v4182_v8  ;;  %v4186_v46 = vmax.f32 %v3264_v5, 0.0  ;;  %v4187_v15 = vmax.f32 %v3268_v50, 0.0 }
 0x23d   :  { %v1728_v1 = vpack.c.bf16 %v4183_v11, %v4183_v11  ;;  %v1730_v32 = vpack.c.bf16 %v4185_v44, %v4185_v44  ;;  %v4188_v34 = vmax.f32 %v3272_v4, 0.0  ;;  %v4189_v26 = vmax.f32 %v3276_v3, 0.0  ;;  %1528 = vst.msk [vmem:[%s4015_s5 + $0xc] sm:$0xf] %vm1524_vm2, %v1729_v47 }
 0x23e   :  { %v1731_v56 = vpack.c.bf16 %v4186_v46, %v4186_v46  ;;  %v1732_v8 = vpack.c.bf16 %v4187_v15, %v4187_v15  ;;  %v4190_v14 = vmax.f32 %v3280_v13, 0.0  ;;  %v4191_v5 = vmax.f32 %v3284_v51, 0.0  ;;  %1525 = vst.msk [vmem:[%s4015_s5] sm:$0xf] %vm1524_vm2, %v1726_v23  ;;  %1526 = vst.msk [vmem:[%s4015_s5 + $0x4] sm:$0xf] %vm1524_vm2, %v1727_v59 }
 0x23f   :  { %v4176_v55 = vld [vmem:[#allocation20_spill] sm:$0xff]  ;;  %v1733_v11 = vpack.c.bf16 %v4188_v34, %v4188_v34  ;;  %v1734_v57 = vpack.c.bf16 %v4189_v26, %v4189_v26  ;;  %v4192_v50 = vmax.f32 %v3288_v35, 0.0  ;;  %1527 = vst.msk [vmem:[%s4015_s5 + $0x8] sm:$0xf] %vm1524_vm2, %v1728_v1  ;;  %v4193_v4 = vmax.f32 %v3292_v52, 0.0 }
 0x240   :  { %v1735_v44 = vpack.c.bf16 %v4190_v14, %v4190_v14  ;;  %v1736_v46 = vpack.c.bf16 %v4191_v5, %v4191_v5  ;;  %v4194_v13 = vmax.f32 %v3296_v58, 0.0  ;;  %v4195_v35 = vmax.f32 %v3300_v38, 0.0  ;;  %1529 = vst.msk [vmem:[%s4015_s5 + $0x10] sm:$0xf] %vm1524_vm2, %v1730_v32  ;;  %1530 = vst.msk [vmem:[%s4015_s5 + $0x14] sm:$0xf] %vm1524_vm2, %v1731_v56 }
 0x241   :  { %v1737_v15 = vpack.c.bf16 %v4192_v50, %v4192_v50  ;;  %v1738_v3 = vpack.c.bf16 %v4193_v4, %v4193_v4  ;;  %v4196_v59 = vmax.f32 %v3304_v41, 0.0  ;;  %1531 = vst.msk [vmem:[%s4015_s5 + $0x18] sm:$0xf] %vm1524_vm2, %v1732_v8  ;;  %1532 = vst.msk [vmem:[%s4015_s5 + $0x1c] sm:$0xf] %vm1524_vm2, %v1733_v11  ;;  %v4197_v52 = vmax.f32 %v3308_v27, 0.0 }
 0x242   :  { %v1739_v51 = vpack.c.bf16 %v4194_v13, %v4194_v13  ;;  %v1740_v23 = vpack.c.bf16 %v4195_v35, %v4195_v35  ;;  %v4198_v38 = vmax.f32 %v3312_v62, 0.0  ;;  %v4199_v47 = vmax.f32 %v3316_v60, 0.0  ;;  %1533 = vst.msk [vmem:[%s4015_s5 + $0x20] sm:$0xf] %vm1524_vm2, %v1734_v57  ;;  %1534 = vst.msk [vmem:[%s4015_s5 + $0x24] sm:$0xf] %vm1524_vm2, %v1735_v44 }
 0x243   :  { %v1741_v1 = vpack.c.bf16 %v4196_v59, %v4196_v59  ;;  %v1742_v58 = vpack.c.bf16 %v4197_v52, %v4197_v52  ;;  %v4200_v56 = vmax.f32 %v3320_v0, 0.0  ;;  %1535 = vst.msk [vmem:[%s4015_s5 + $0x28] sm:$0xf] %vm1524_vm2, %v1736_v46  ;;  %1536 = vst.msk [vmem:[%s4015_s5 + $0x2c] sm:$0xf] %vm1524_vm2, %v1737_v15  ;;  %v4201_v27 = vmax.f32 %v3324_v10, 0.0 }
 0x244   :  { %v1743_v41 = vpack.c.bf16 %v4198_v38, %v4198_v38  ;;  %v1744_v32 = vpack.c.bf16 %v4199_v47, %v4199_v47  ;;  %v4202_v60 = vmax.f32 %v3328_v18, 0.0  ;;  %v4203_v34 = vmax.f32 %v3332_v16, 0.0  ;;  %1537 = vst.msk [vmem:[%s4015_s5 + $0x30] sm:$0xf] %vm1524_vm2, %v1738_v3  ;;  %1538 = vst.msk [vmem:[%s4015_s5 + $0x34] sm:$0xf] %vm1524_vm2, %v1739_v51 }
 0x245   :  { %v1745_v8 = vpack.c.bf16 %v4200_v56, %v4200_v56  ;;  %v1746_v62 = vpack.c.bf16 %v4201_v27, %v4201_v27  ;;  %v4204_v26 = vmax.f32 %v3336_v20, 0.0  ;;  %1539 = vst.msk [vmem:[%s4015_s5 + $0x38] sm:$0xf] %vm1524_vm2, %v1740_v23  ;;  %1540 = vst.msk [vmem:[%s4015_s5 + $0x3c] sm:$0xf] %vm1524_vm2, %v1741_v1  ;;  %v4205_v10 = vmax.f32 %v3340_v30, 0.0 }
 0x246   :  { %v1747_v0 = vpack.c.bf16 %v4202_v60, %v4202_v60  ;;  %v1748_v11 = vpack.c.bf16 %v4203_v34, %v4203_v34  ;;  %v4206_v16 = vmax.f32 %v3344_v40, 0.0  ;;  %v4207_v14 = vmax.f32 %v3348_v37, 0.0  ;;  %1541 = vst.msk [vmem:[%s4015_s5 + $0x40] sm:$0xf] %vm1524_vm2, %v1742_v58  ;;  %1542 = vst.msk [vmem:[%s4015_s5 + $0x44] sm:$0xf] %vm1524_vm2, %v1743_v41 }
 0x247   :  { %v1749_v57 = vpack.c.bf16 %v4204_v26, %v4204_v26  ;;  %v1750_v18 = vpack.c.bf16 %v4205_v10, %v4205_v10  ;;  %v4208_v5 = vmax.f32 %v3352_v45, 0.0  ;;  %1543 = vst.msk [vmem:[%s4015_s5 + $0x48] sm:$0xf] %vm1524_vm2, %v1744_v32  ;;  %1544 = vst.msk [vmem:[%s4015_s5 + $0x4c] sm:$0xf] %vm1524_vm2, %v1745_v8  ;;  %v4209_v30 = vmax.f32 %v3356_v61, 0.0 }
 0x248   :  { %v1751_v20 = vpack.c.bf16 %v4206_v16, %v4206_v16  ;;  %v1752_v44 = vpack.c.bf16 %v4207_v14, %v4207_v14  ;;  %v4210_v37 = vmax.f32 %v3360_v9, 0.0  ;;  %v4211_v50 = vmax.f32 %v3364_v48, 0.0  ;;  %1545 = vst.msk [vmem:[%s4015_s5 + $0x50] sm:$0xf] %vm1524_vm2, %v1746_v62  ;;  %1546 = vst.msk [vmem:[%s4015_s5 + $0x54] sm:$0xf] %vm1524_vm2, %v1747_v0 }
 0x249   :  { %v1753_v46 = vpack.c.bf16 %v4208_v5, %v4208_v5  ;;  %v1754_v40 = vpack.c.bf16 %v4209_v30, %v4209_v30  ;;  %v4212_v4 = vmax.f32 %v3368_v54, 0.0  ;;  %1547 = vst.msk [vmem:[%s4015_s5 + $0x58] sm:$0xf] %vm1524_vm2, %v1748_v11  ;;  %1548 = vst.msk [vmem:[%s4015_s5 + $0x5c] sm:$0xf] %vm1524_vm2, %v1749_v57  ;;  %v4213_v61 = vmax.f32 %v3372_v19, 0.0 }
 0x24a   :  { %v1755_v45 = vpack.c.bf16 %v4210_v37, %v4210_v37  ;;  %v1756_v15 = vpack.c.bf16 %v4211_v50, %v4211_v50  ;;  %v4214_v48 = vmax.f32 %v3376_v6, 0.0  ;;  %v4215_v13 = vmax.f32 %v3380_v25, 0.0  ;;  %1549 = vst.msk [vmem:[%s4015_s5 + $0x60] sm:$0xf] %vm1524_vm2, %v1750_v18  ;;  %1550 = vst.msk [vmem:[%s4015_s5 + $0x64] sm:$0xf] %vm1524_vm2, %v1751_v20 }
 0x24b   :  { %v1757_v3 = vpack.c.bf16 %v4212_v4, %v4212_v4  ;;  %v1758_v9 = vpack.c.bf16 %v4213_v61, %v4213_v61  ;;  %v4216_v35 = vmax.f32 %v3384_v2, 0.0  ;;  %1551 = vst.msk [vmem:[%s4015_s5 + $0x68] sm:$0xf] %vm1524_vm2, %v1752_v44  ;;  %1552 = vst.msk [vmem:[%s4015_s5 + $0x6c] sm:$0xf] %vm1524_vm2, %v1753_v46  ;;  %v4217_v19 = vld [vmem:[#allocation8_spill] sm:$0xff] }
 0x24c   :  { %v1759_v54 = vpack.c.bf16 %v4214_v48, %v4214_v48  ;;  %v1760_v51 = vpack.c.bf16 %v4215_v13, %v4215_v13  ;;  %v4218_v6 = vmax.f32 %v4217_v19, 0.0  ;;  %v4219_v2 = vld [vmem:[#allocation9_spill] sm:$0xff]  ;;  %v4221_v52 = vld [vmem:[#allocation10_spill] sm:$0xff]  ;;  %v4223_v41 = vld [vmem:[#allocation11_spill] sm:$0xff]  ;;  %1553 = vst.msk [vmem:[%s4015_s5 + $0x70] sm:$0xf] %vm1524_vm2, %v1754_v40 }
 0x24d   :  { %v1761_v23 = vpack.c.bf16 %v4216_v35, %v4216_v35  ;;  %v4220_v59 = vmax.f32 %v4219_v2, 0.0  ;;  %v4222_v58 = vmax.f32 %v4221_v52, 0.0  ;;  %v4224_v47 = vmax.f32 %v4223_v41, 0.0  ;;  %1554 = vst.msk [vmem:[%s4015_s5 + $0x74] sm:$0xf] %vm1524_vm2, %v1755_v45  ;;  %v4225_v56 = vld [vmem:[#allocation12_spill] sm:$0xff] }
 0x24e   :  { %v1762_v25 = vpack.c.bf16 %v4218_v6, %v4218_v6  ;;  %1555 = vst.msk [vmem:[%s4015_s5 + $0x78] sm:$0xf] %vm1524_vm2, %v1756_v15  ;;  %1556 = vst.msk [vmem:[%s4015_s5 + $0x7c] sm:$0xf] %vm1524_vm2, %v1757_v3  ;;  %v4226_v8 = vmax.f32 %v4225_v56, 0.0  ;;  %v4227_v62 = vmax.f32 %v3408_v7, 0.0 }
 0x24f   :  { %v1763_v1 = vpack.c.bf16 %v4220_v59, %v4220_v59  ;;  %v1764_v38 = vpack.c.bf16 %v4222_v58, %v4222_v58  ;;  %v1765_v32 = vpack.c.bf16 %v4224_v47, %v4224_v47  ;;  %v4228_v0 = vmax.f32 %v3412_v31, 0.0  ;;  %1557 = vst.msk [vmem:[%s4015_s5 + $0x80] sm:$0xf] %vm1524_vm2, %v1758_v9  ;;  %1558 = vst.msk [vmem:[%s4015_s5 + $0x84] sm:$0xf] %vm1524_vm2, %v1759_v54  ;;  %v4233_v16 = vld [vmem:[#allocation19_spill] sm:$0xff] }
 0x250   :  { %v1766_v27 = vpack.c.bf16 %v4226_v8, %v4226_v8  ;;  %v1767_v60 = vpack.c.bf16 %v4227_v62, %v4227_v62  ;;  %v4229_v11 = vmax.f32 %v3416_v29, 0.0  ;;  %1559 = vst.msk [vmem:[%s4015_s5 + $0x88] sm:$0xf] %vm1524_vm2, %v1760_v51  ;;  %1560 = vst.msk [vmem:[%s4015_s5 + $0x8c] sm:$0xf] %vm1524_vm2, %v1761_v23  ;;  %v4230_v7 = vmax.f32 %v3420_v39, 0.0 }
 0x251   :  { %v1768_v34 = vpack.c.bf16 %v4228_v0, %v4228_v0  ;;  %v4231_v29 = vmax.f32 %v3424_v63, 0.0  ;;  %v4232_v10 = vmax.f32 %v4170_v53, 0.0  ;;  %v4234_v20 = vmax.f32 %v4233_v16, 0.0  ;;  %1561 = vst.msk [vmem:[%s4015_s5 + $0x90] sm:$0xf] %vm1524_vm2, %v1762_v25  ;;  %v4235_v39 = vld [vmem:[#allocation14_spill] sm:$0xff] }
 0x252   :  { %v1769_v26 = vpack.c.bf16 %v4229_v11, %v4229_v11  ;;  %v1770_v31 = vpack.c.bf16 %v4230_v7, %v4230_v7  ;;  %1562 = vst.msk [vmem:[%s4015_s5 + $0x94] sm:$0xf] %vm1524_vm2, %v1763_v1  ;;  %1563 = vst.msk [vmem:[%s4015_s5 + $0x98] sm:$0xf] %vm1524_vm2, %v1764_v38  ;;  %v4236_v63 = vmax.f32 %v4235_v39, 0.0  ;;  %v4237_v44 = vld [vmem:[#allocation15_spill] sm:$0xff] }
 0x253   :  { %v1771_v57 = vpack.c.bf16 %v4231_v29, %v4231_v29  ;;  %v1772_v18 = vpack.c.bf16 %v4232_v10, %v4232_v10  ;;  %v1773_v14 = vpack.c.bf16 %v4234_v20, %v4234_v20  ;;  %1564 = vst.msk [vmem:[%s4015_s5 + $0x9c] sm:$0xf] %vm1524_vm2, %v1765_v32  ;;  %v4238_v5 = vmax.f32 %v4237_v44, 0.0  ;;  %v4239_v30 = vld [vmem:[#allocation16_spill] sm:$0xff]  ;;  %v4241_v45 = vld [vmem:[#allocation17_spill] sm:$0xff] }
 0x254   :  { %v1774_v53 = vpack.c.bf16 %v4236_v63, %v4236_v63  ;;  %v4240_v40 = vmax.f32 %v4239_v30, 0.0  ;;  %v4242_v50 = vmax.f32 %v4241_v45, 0.0  ;;  %1565 = vst.msk [vmem:[%s4015_s5 + $0xa0] sm:$0xf] %vm1524_vm2, %v1766_v27  ;;  %1566 = vst.msk [vmem:[%s4015_s5 + $0xa4] sm:$0xf] %vm1524_vm2, %v1767_v60 }
 0x255   :  { %v1775_v46 = vpack.c.bf16 %v4238_v5, %v4238_v5  ;;  %1567 = vst.msk [vmem:[%s4015_s5 + $0xa8] sm:$0xf] %vm1524_vm2, %v1768_v34  ;;  %1568 = vst.msk [vmem:[%s4015_s5 + $0xac] sm:$0xf] %vm1524_vm2, %v1769_v26  ;;  %v4243_v4 = vmax.f32 %v3452_v21, 0.0  ;;  %v4244_v61 = vmax.f32 %v3456_v12, 0.0 }
 0x256   :  { %v1776_v37 = vpack.c.bf16 %v4240_v40, %v4240_v40  ;;  %v1777_v15 = vpack.c.bf16 %v4242_v50, %v4242_v50  ;;  %v4245_v48 = vmax.f32 %v3460_v28, 0.0  ;;  %v4246_v13 = vmax.f32 %v3464_v17, 0.0  ;;  %1569 = vst.msk [vmem:[%s4015_s5 + $0xb0] sm:$0xf] %vm1524_vm2, %v1770_v31  ;;  %1570 = vst.msk [vmem:[%s4015_s5 + $0xb4] sm:$0xf] %vm1524_vm2, %v1771_v57 }
 0x257   :  { %v1778_v3 = vpack.c.bf16 %v4243_v4, %v4243_v4  ;;  %v1779_v9 = vpack.c.bf16 %v4244_v61, %v4244_v61  ;;  %1571 = vst.msk [vmem:[%s4015_s5 + $0xb8] sm:$0xf] %vm1524_vm2, %v1772_v18  ;;  %1572 = vst.msk [vmem:[%s4015_s5 + $0xbc] sm:$0xf] %vm1524_vm2, %v1773_v14  ;;  %v4247_v21 = vmax.f32 %v3468_v49, 0.0  ;;  %v4248_v28 = vmax.f32 %v3472_v24, 0.0 }
 0x258   :  { %v1780_v54 = vpack.c.bf16 %v4245_v48, %v4245_v48  ;;  %v1781_v51 = vpack.c.bf16 %v4246_v13, %v4246_v13  ;;  %v4249_v35 = vmax.f32 %v4176_v55, 0.0  ;;  %v4250_v19 = vmax.f32 %v4177_v36, 0.0  ;;  %1573 = vst.msk [vmem:[%s4015_s5 + $0xc0] sm:$0xf] %vm1524_vm2, %v1774_v53  ;;  %1574 = vst.msk [vmem:[%s4015_s5 + $0xc4] sm:$0xf] %vm1524_vm2, %v1775_v46 }
 0x259   :  { %v1782_v12 = vpack.c.bf16 %v4247_v21, %v4247_v21  ;;  %v1783_v17 = vpack.c.bf16 %v4248_v28, %v4248_v28  ;;  %1575 = vst.msk [vmem:[%s4015_s5 + $0xc8] sm:$0xf] %vm1524_vm2, %v1776_v37  ;;  %1576 = vst.msk [vmem:[%s4015_s5 + $0xcc] sm:$0xf] %vm1524_vm2, %v1777_v15  ;;  %v4251_v55 = vmax.f32 %v4178_v22, 0.0  ;;  %v4252_v49 = vmax.f32 %v4179_v43, 0.0 }
 0x25a   :  { %v1784_v23 = vpack.c.bf16 %v4249_v35, %v4249_v35  ;;  %v1785_v6 = vpack.c.bf16 %v4250_v19, %v4250_v19  ;;  %v4253_v25 = vmax.f32 %v4180_v42, 0.0  ;;  %v4254_v59 = vmax.f32 %v3496_v33, 0.0  ;;  %1577 = vst.msk [vmem:[%s4015_s5 + $0xd0] sm:$0xf] %vm1524_vm2, %v1778_v3  ;;  %1578 = vst.msk [vmem:[%s4015_s5 + $0xd4] sm:$0xf] %vm1524_vm2, %v1779_v9 }
 0x25b   :  { %v1786_v36 = vpack.c.bf16 %v4251_v55, %v4251_v55  ;;  %v1787_v24 = vpack.c.bf16 %v4252_v49, %v4252_v49  ;;  %1579 = vst.msk [vmem:[%s4015_s5 + $0xd8] sm:$0xf] %vm1524_vm2, %v1780_v54  ;;  %1580 = vst.msk [vmem:[%s4015_s5 + $0xdc] sm:$0xf] %vm1524_vm2, %v1781_v51 }
 0x25c   :  { %v1788_v2 = vpack.c.bf16 %v4253_v25, %v4253_v25  ;;  %v1789_v1 = vpack.c.bf16 %v4254_v59, %v4254_v59  ;;  %1581 = vst.msk [vmem:[%s4015_s5 + $0xe0] sm:$0xf] %vm1524_vm2, %v1782_v12  ;;  %1582 = vst.msk [vmem:[%s4015_s5 + $0xe4] sm:$0xf] %vm1524_vm2, %v1783_v17 }
 0x25d   :  { %1583 = vst.msk [vmem:[%s4015_s5 + $0xe8] sm:$0xf] %vm1524_vm2, %v1784_v23  ;;  %1584 = vst.msk [vmem:[%s4015_s5 + $0xec] sm:$0xf] %vm1524_vm2, %v1785_v6 }
 0x25e   :  { %1585 = vst.msk [vmem:[%s4015_s5 + $0xf0] sm:$0xf] %vm1524_vm2, %v1786_v36  ;;  %1586 = vst.msk [vmem:[%s4015_s5 + $0xf4] sm:$0xf] %vm1524_vm2, %v1787_v24 }
 0x25f   :  { %1587 = vst.msk [vmem:[%s4015_s5 + $0xf8] sm:$0xf] %vm1524_vm2, %v1788_v2  ;;  %1588 = vst.msk [vmem:[%s4015_s5 + $0xfc] sm:$0xf] %vm1524_vm2, %v1789_v1 }

// kernel: vae_forward.8
= control target key start
LH: loop header
LB: loop body
LE: loop exit
PB: predicated region body
PF: predicated region fallthrough
CT: control target
= control target key end

     0   :  { %vm253_vm0 = vcmask 130048   ;;  %vm491_vm1 = vcmask 125952   ;;  %s915_s1 = inlined_call_operand.vmem [shape: bf16[128,16], index: 1, kind: input, shape index: {}]   ;;  %s916_s0 = inlined_call_operand.vmem [shape: bf16[128,128], index: 0, kind: input, shape index: {}]   ;;  %s917_s2 = inlined_call_operand.vmem [shape: f32[1,16], index: 2, kind: input, shape index: {}]   ;;  %s918_s3 = inlined_call_operand.vmem [shape: f32[1,16], index: 3, kind: input, shape index: {}]   ;;  %s919_s4 = inlined_call_operand.vmem [shape: f32[1,16], index: 4, kind: input, shape index: {}]   ;;  %s920_s5 = inlined_call_operand.vmem [shape: bf16[128,16], index: 5, kind: output, shape index: {}]  }
   0x1   :  { %v626_v0 = vld [vmem:[%s915_s1] sm:$0xff]   ;;  %v627_v1 = vld [vmem:[%s915_s1 + $0x8] sm:$0xff]   ;;  %v628_v2 = vld [vmem:[%s915_s1 + $0x10] sm:$0xff]  }
   0x2   :  { %578 = vmatprep.subr.bf16.mxu0 %v626_v0  ;;  %610 = vmatprep.subr.bf16.mxu1 %v626_v0  ;;  %v629_v3 = vld [vmem:[%s915_s1 + $0x18] sm:$0xff]   ;;  %v634_v4 = vld [vmem:[%s916_s0] sm:$0xff]   ;;  %v631_v7 = vld [vmem:[%s915_s1 + $0x28] sm:$0xff]  }
   0x3   :  { %579 = vmatpush3.bf16.msra.mxu0 %v626_v0  ;;  %618 = vmatpush3.bf16.msra.mxu1 %v626_v0  ;;  %v630_v5 = vld [vmem:[%s915_s1 + $0x20] sm:$0xff]   ;;  %v632_v8 = vld [vmem:[%s915_s1 + $0x30] sm:$0xff]   ;;  %v633_v9 = vld [vmem:[%s915_s1 + $0x38] sm:$0xff]  }
   0x4   :  { %580 = vmatprep.subr.bf16.mxu0 %v627_v1  ;;  %611 = vmatprep.subr.bf16.mxu1 %v627_v1  ;;  %v638_v6 = vld [vmem:[%s916_s0 + $0x20] sm:$0xff]   ;;  %v635_v10 = vld [vmem:[%s916_s0 + $0x8] sm:$0xff]   ;;  %v636_v12 = vld [vmem:[%s916_s0 + $0x10] sm:$0xff]  }
   0x5   :  { %594 = vmatprep.mubr.bf16.mxu0 %v634_v4  ;;  %602 = vmatprep.mubr.bf16.mxu1 %v638_v6  ;;  %v639_v11 = vld [vmem:[%s916_s0 + $0x28] sm:$0xff]   ;;  %v640_v13 = vld [vmem:[%s916_s0 + $0x30] sm:$0xff]   ;;  %v637_v14 = vld [vmem:[%s916_s0 + $0x18] sm:$0xff]  }
   0x6   :  { %v641_v15 = vld [vmem:[%s916_s0 + $0x38] sm:$0xff]   ;;  %v512_v16 = vld [vmem:[%s917_s2] ss:$0 sm:$0xff] }
   0x7   :  { %581 = vmatpush3.bf16.msra.mxu0 %v627_v1  ;;  %619 = vmatpush3.bf16.msra.mxu1 %v627_v1 }
   0x8   :  { %582 = vmatprep.subr.bf16.mxu0 %v628_v2  ;;  %612 = vmatprep.subr.bf16.mxu1 %v628_v2 }
   0xb   :  { %583 = vmatpush3.bf16.msra.mxu0 %v628_v2  ;;  %620 = vmatpush3.bf16.msra.mxu1 %v628_v2 }
   0xc   :  { %584 = vmatprep.subr.bf16.mxu0 %v629_v3  ;;  %613 = vmatprep.subr.bf16.mxu1 %v629_v3 }
   0xf   :  { %585 = vmatpush3.bf16.msra.mxu0 %v629_v3  ;;  %621 = vmatpush3.bf16.msra.mxu1 %v629_v3 }
  0x10   :  { %586 = vmatprep.subr.bf16.mxu0 %v630_v5  ;;  %614 = vmatprep.subr.bf16.mxu1 %v630_v5 }
  0x13   :  { %587 = vmatpush3.bf16.msra.mxu0 %v630_v5  ;;  %622 = vmatpush3.bf16.msra.mxu1 %v630_v5 }
  0x14   :  { %588 = vmatprep.subr.bf16.mxu0 %v631_v7  ;;  %615 = vmatprep.subr.bf16.mxu1 %v631_v7 }
  0x17   :  { %589 = vmatpush3.bf16.msra.mxu0 %v631_v7  ;;  %623 = vmatpush3.bf16.msra.mxu1 %v631_v7 }
  0x18   :  { %590 = vmatprep.subr.bf16.mxu0 %v632_v8  ;;  %616 = vmatprep.subr.bf16.mxu1 %v632_v8 }
  0x1b   :  { %591 = vmatpush3.bf16.msra.mxu0 %v632_v8  ;;  %624 = vmatpush3.bf16.msra.mxu1 %v632_v8 }
  0x1c   :  { %592 = vmatprep.subr.bf16.mxu0 %v633_v9  ;;  %617 = vmatprep.subr.bf16.mxu1 %v633_v9 }
  0x1f   :  { %593 = vmatpush3.bf16.msra.mxu0 %v633_v9  ;;  %625 = vmatpush3.bf16.msra.mxu1 %v633_v9 }
  0x22   :  { %595 = vmatmul.mubr.bf16.vlgmr.msra.gmra.mrb[0].mxu0 %v635_v10  ;;  %603 = vmatmul.mubr.bf16.vlgmr.msra.gmra.mrb[0].mxu1 %v639_v11 }
  0x23   :  { %598 = vmatprep.mubr.bf16.mxu0 %v636_v12  ;;  %606 = vmatprep.mubr.bf16.mxu1 %v640_v13 }
  0x2a   :  { %599 = vmatmul.mubr.bf16.gmra.mrb[4].mxu0 %v637_v14  ;;  %607 = vmatmul.mubr.bf16.gmra.mrb[4].mxu1 %v641_v15 }
  0xf5   :  { %v596_v17 = vpop.f32.mrb[0].mxu0  ;;  %v604_v18 = vpop.f32.mrb[0].mxu1 }
  0xf6   :  { %v190_v19 = vpop.f32.mrb[1].mxu0  ;;  %v222_v20 = vpop.f32.mrb[1].mxu1  ;;  %v727_v26 = vadd.f32 %v596_v17, %v512_v16  ;;  %v231_v59 = vadd.f32 %v604_v18, %v512_v16 }
  0xf7   :  { %v725_v21 = vadd.f32 %v512_v16, %v190_v19  ;;  %v597_v22 = vpop.f32.mrb[2].mxu0  ;;  %v605_v23 = vpop.f32.mrb[2].mxu1  ;;  %v223_v51 = vadd.f32 %v512_v16, %v222_v20 }
  0xf8   :  { %v193_v24 = vpop.f32.mrb[3].mxu0  ;;  %v225_v25 = vpop.f32.mrb[3].mxu1  ;;  %v202_v29 = vadd.f32 %v597_v22, %v512_v16  ;;  %v257_v32 = vsel %vm253_vm0, %v727_v26, 0.0  ;;  %v234_v61 = vadd.f32 %v605_v23, %v512_v16  ;;  %v273_v1 = vsel %vm253_vm0, %v231_v59, 0.0 }
  0xf9   :  { %v194_v27 = vadd.f32 %v512_v16, %v193_v24  ;;  %v254_v28 = vsel %vm253_vm0, %v725_v21, 0.0  ;;  %v269_v56 = vsel %vm253_vm0, %v223_v51, 0.0  ;;  %v226_v57 = vadd.f32 %v512_v16, %v225_v25 }
  0xfa   :  { %v259_v38 = vsel %vm253_vm0, %v202_v29, 0.0  ;;  %v275_v3 = vsel %vm253_vm0, %v234_v61, 0.0 }
  0xfb   :  { %v255_v30 = vsel %vm253_vm0, %v194_v27, 0.0  ;;  %v271_v62 = vsel %vm253_vm0, %v226_v57, 0.0 }
  0xfc   :  { %v256_v31 = vadd.f32 %v255_v30, %v254_v28 }
  0xfd   :  { %v600_v33 = vpop.f32.mrb[4].mxu0  ;;  %v608_v34 = vpop.f32.mrb[4].mxu1 }
  0xfe   :  { %v258_v35 = vadd.f32 %v257_v32, %v256_v31  ;;  %v206_v36 = vpop.f32.mrb[5].mxu0  ;;  %v238_v37 = vpop.f32.mrb[5].mxu1  ;;  %v215_v45 = vadd.f32 %v600_v33, %v512_v16  ;;  %v247_v7 = vadd.f32 %v608_v34, %v512_v16 }
  0xff   :  { %v207_v39 = vadd.f32 %v512_v16, %v206_v36  ;;  %v601_v40 = vpop.f32.mrb[6].mxu0  ;;  %v609_v41 = vpop.f32.mrb[6].mxu1  ;;  %v239_v63 = vadd.f32 %v512_v16, %v238_v37 }
 0x100   :  { %v260_v42 = vadd.f32 %v259_v38, %v258_v35  ;;  %v209_v43 = vpop.f32.mrb[7].mxu0  ;;  %v241_v44 = vpop.f32.mrb[7].mxu1  ;;  %v218_v49 = vadd.f32 %v601_v40, %v512_v16  ;;  %v265_v53 = vsel %vm253_vm0, %v215_v45, 0.0  ;;  %v250_v9 = vadd.f32 %v609_v41, %v512_v16 }
 0x101   :  { %v261_v46 = vsel %vm253_vm0, %v207_v39, 0.0  ;;  %v210_v47 = vadd.f32 %v512_v16, %v209_v43  ;;  %v277_v4 = vsel %vm253_vm0, %v239_v63, 0.0  ;;  %v242_v5 = vadd.f32 %v512_v16, %v241_v44 }
 0x102   :  { %v262_v48 = vadd.f32 %v261_v46, %v260_v42  ;;  %v267_v55 = vsel %vm253_vm0, %v218_v49, 0.0  ;;  %v281_v12 = vsel %vm253_vm0, %v247_v7, 0.0  ;;  %v283_v14 = vsel %vm253_vm0, %v250_v9, 0.0 }
 0x103   :  { %v263_v50 = vsel %vm253_vm0, %v210_v47, 0.0  ;;  %v279_v10 = vsel %vm253_vm0, %v242_v5, 0.0 }
 0x104   :  { %v264_v52 = vadd.f32 %v263_v50, %v262_v48 }
 0x106   :  { %v266_v54 = vadd.f32 %v265_v53, %v264_v52 }
 0x108   :  { %v268_v58 = vadd.f32 %v267_v55, %v266_v54 }
 0x10a   :  { %v270_v60 = vadd.f32 %v269_v56, %v268_v58 }
 0x10c   :  { %v272_v0 = vadd.f32 %v271_v62, %v270_v60 }
 0x10e   :  { %v274_v2 = vadd.f32 %v273_v1, %v272_v0 }
 0x110   :  { %v276_v6 = vadd.f32 %v275_v3, %v274_v2 }
 0x112   :  { %v278_v8 = vadd.f32 %v277_v4, %v276_v6 }
 0x114   :  { %v280_v11 = vadd.f32 %v279_v10, %v278_v8 }
 0x116   :  { %v282_v13 = vadd.f32 %v281_v12, %v280_v11 }
 0x118   :  { %v284_v15 = vadd.f32 %v283_v14, %v282_v13 }
 0x11a   :  { %v285_v17 = vrot.slane %v284_v15, 4 }
 0x11c   :  { %v286_v18 = vadd.f32 %v285_v17, %v284_v15 }
 0x11e   :  { %v287_v19 = vrot.slane %v286_v18, 2 }
 0x120   :  { %v288_v20 = vadd.f32 %v287_v19, %v286_v18 }
 0x122   :  { %v289_v22 = vrot.slane %v288_v20, 1 }
 0x124   :  { %v290_v23 = vadd.f32 %v289_v22, %v288_v20 }
 0x126   :  { %v291_v24 = vmul.f32 0.0078125, %v290_v23 }
 0x128   :  { %v748_v25 = vsub.f32 %v725_v21, %v291_v24  ;;  %v750_v16 = vsub.f32 %v194_v27, %v291_v24  ;;  %v753_v28 = vsub.f32 %v727_v26, %v291_v24  ;;  %v755_v30 = vsub.f32 %v202_v29, %v291_v24 }
 0x129   :  { %v757_v31 = vsub.f32 %v207_v39, %v291_v24  ;;  %v759_v32 = vsub.f32 %v210_v47, %v291_v24  ;;  %v761_v33 = vsub.f32 %v215_v45, %v291_v24  ;;  %v763_v34 = vsub.f32 %v218_v49, %v291_v24 }
 0x12a   :  { %v765_v35 = vsub.f32 %v223_v51, %v291_v24  ;;  %v767_v36 = vsub.f32 %v226_v57, %v291_v24  ;;  %v769_v21 = vsub.f32 %v231_v59, %v291_v24  ;;  %v771_v27 = vsub.f32 %v234_v61, %v291_v24 }
 0x12b   :  { %v773_v26 = vsub.f32 %v239_v63, %v291_v24  ;;  %v775_v29 = vsub.f32 %v242_v5, %v291_v24  ;;  %v777_v37 = vsub.f32 %v247_v7, %v291_v24  ;;  %v779_v38 = vsub.f32 %v250_v9, %v291_v24 }
 0x12c   :  { %v308_v39 = vmul.f32 %v748_v25, %v748_v25  ;;  %v309_v40 = vmul.f32 %v750_v16, %v750_v16  ;;  %v310_v41 = vmul.f32 %v753_v28, %v753_v28  ;;  %v317_v42 = vmul.f32 %v767_v36, %v767_v36 }
 0x12d   :  { %v318_v43 = vmul.f32 %v769_v21, %v769_v21  ;;  %v311_v44 = vmul.f32 %v755_v30, %v755_v30  ;;  %v319_v45 = vmul.f32 %v771_v27, %v771_v27  ;;  %v320_v46 = vmul.f32 %v773_v26, %v773_v26 }
 0x12e   :  { %v321_v47 = vmul.f32 %v775_v29, %v775_v29  ;;  %v322_v48 = vmul.f32 %v777_v37, %v777_v37  ;;  %v323_v49 = vmul.f32 %v779_v38, %v779_v38  ;;  %v324_v50 = vsel %vm253_vm0, %v308_v39, 0.0 }
 0x12f   :  { %v325_v51 = vsel %vm253_vm0, %v309_v40, 0.0  ;;  %v312_v53 = vmul.f32 %v757_v31, %v757_v31  ;;  %v327_v54 = vsel %vm253_vm0, %v310_v41, 0.0  ;;  %v341_v55 = vsel %vm253_vm0, %v317_v42, 0.0 }
 0x130   :  { %v326_v52 = vadd.f32 %v325_v51, %v324_v50  ;;  %v343_v56 = vsel %vm253_vm0, %v318_v43, 0.0  ;;  %v345_v58 = vsel %vm253_vm0, %v319_v45, 0.0  ;;  %v347_v59 = vsel %vm253_vm0, %v320_v46, 0.0 }
 0x131   :  { %v349_v60 = vsel %vm253_vm0, %v321_v47, 0.0  ;;  %v313_v61 = vmul.f32 %v759_v32, %v759_v32  ;;  %v329_v62 = vsel %vm253_vm0, %v311_v44, 0.0  ;;  %v351_v63 = vsel %vm253_vm0, %v322_v48, 0.0  ;;  %v362_v48 = vld [vmem:[%s918_s3] sm:$0x1] }
 0x132   :  { %v328_v57 = vadd.f32 %v327_v54, %v326_v52  ;;  %v353_v0 = vsel %vm253_vm0, %v323_v49, 0.0  ;;  %v314_v2 = vmul.f32 %v761_v33, %v761_v33  ;;  %v331_v3 = vsel %vm253_vm0, %v312_v53, 0.0 }
 0x133   :  { %v315_v5 = vmul.f32 %v763_v34, %v763_v34  ;;  %v333_v6 = vsel %vm253_vm0, %v313_v61, 0.0  ;;  %v316_v8 = vmul.f32 %v765_v35, %v765_v35  ;;  %v367_v46 = vlaneseq  ;;  %v529_v61 = vld [vmem:[%s919_s4] ss:$0 sm:$0xff] }
 0x134   :  { %v330_v1 = vadd.f32 %v329_v62, %v328_v57  ;;  %v335_v9 = vsel %vm253_vm0, %v314_v2, 0.0 }
 0x135   :  { %v337_v11 = vsel %vm253_vm0, %v315_v5, 0.0  ;;  %v339_v13 = vsel %vm253_vm0, %v316_v8, 0.0  ;;  %v368_v47 = vshrl.u32 %v367_v46, 7 }
 0x136   :  { %v332_v4 = vadd.f32 %v331_v3, %v330_v1 }
 0x137   :  { %v369_v49 = vsub.s32 0, %v368_v47 }
 0x138   :  { %v334_v7 = vadd.f32 %v333_v6, %v332_v4 }
 0x13a   :  { %v336_v10 = vadd.f32 %v335_v9, %v334_v7 }
 0x13c   :  { %v338_v12 = vadd.f32 %v337_v11, %v336_v10 }
 0x13e   :  { %v340_v14 = vadd.f32 %v339_v13, %v338_v12 }
 0x140   :  { %v342_v15 = vadd.f32 %v341_v55, %v340_v14 }
 0x142   :  { %v344_v17 = vadd.f32 %v343_v56, %v342_v15 }
 0x144   :  { %v346_v18 = vadd.f32 %v345_v58, %v344_v17 }
 0x146   :  { %v348_v19 = vadd.f32 %v347_v59, %v346_v18 }
 0x148   :  { %v350_v20 = vadd.f32 %v349_v60, %v348_v19 }
 0x14a   :  { %v352_v22 = vadd.f32 %v351_v63, %v350_v20 }
 0x14c   :  { %v354_v23 = vadd.f32 %v353_v0, %v352_v22 }
 0x14e   :  { %v355_v24 = vrot.slane %v354_v23, 4 }
 0x150   :  { %v356_v39 = vadd.f32 %v355_v24, %v354_v23 }
 0x152   :  { %v357_v40 = vrot.slane %v356_v39, 2 }
 0x154   :  { %v358_v41 = vadd.f32 %v357_v40, %v356_v39 }
 0x156   :  { %v359_v42 = vrot.slane %v358_v41, 1 }
 0x158   :  { %v360_v43 = vadd.f32 %v359_v42, %v358_v41 }
 0x15a   :  { %v361_v44 = vmul.f32 0.0078125, %v360_v43 }
 0x15c   :  { %v363_v45 = vadd.f32 1e-05, %v361_v44 }
 0x15e   :  { %642 = vrsqrt.f32 %v363_v45 }
 0x168   :  { %v643_v50 = vpop.eup %642 }
 0x169   :  { %v365_v51 = vmul.f32 %v643_v50, %v362_v48 }
 0x16b   :  { %v370_v52 = vrot.slane %v365_v51, %v369_v49 }
 0x16d   :  { %v372_v53 = vmul.f32 %v370_v52, %v748_v25  ;;  %v373_v54 = vmul.f32 %v370_v52, %v750_v16  ;;  %v374_v55 = vmul.f32 %v370_v52, %v753_v28  ;;  %v375_v56 = vmul.f32 %v370_v52, %v755_v30 }
 0x16e   :  { %v376_v57 = vmul.f32 %v370_v52, %v757_v31  ;;  %v377_v58 = vmul.f32 %v370_v52, %v759_v32  ;;  %v378_v59 = vmul.f32 %v370_v52, %v761_v33  ;;  %v379_v60 = vmul.f32 %v370_v52, %v763_v34 }
 0x16f   :  { %v380_v25 = vmul.f32 %v370_v52, %v765_v35  ;;  %v381_v16 = vmul.f32 %v370_v52, %v767_v36  ;;  %v382_v28 = vmul.f32 %v370_v52, %v769_v21  ;;  %v383_v30 = vmul.f32 %v370_v52, %v771_v27 }
 0x170   :  { %v384_v31 = vmul.f32 %v370_v52, %v773_v26  ;;  %v385_v32 = vmul.f32 %v370_v52, %v775_v29  ;;  %v386_v33 = vmul.f32 %v370_v52, %v777_v37  ;;  %v387_v34 = vmul.f32 %v370_v52, %v779_v38 }
 0x171   :  { %v395_v62 = vadd.f32 %v529_v61, %v372_v53  ;;  %v396_v63 = vadd.f32 %v529_v61, %v373_v54  ;;  %v397_v0 = vadd.f32 %v529_v61, %v374_v55  ;;  %v398_v1 = vadd.f32 %v529_v61, %v375_v56 }
 0x172   :  { %v399_v35 = vadd.f32 %v529_v61, %v376_v57  ;;  %v400_v2 = vadd.f32 %v529_v61, %v377_v58  ;;  %v401_v36 = vadd.f32 %v529_v61, %v378_v59  ;;  %v402_v3 = vadd.f32 %v529_v61, %v379_v60 }
 0x173   :  { %v403_v21 = vadd.f32 %v529_v61, %v380_v25  ;;  %v404_v4 = vadd.f32 %v529_v61, %v381_v16  ;;  %v405_v27 = vadd.f32 %v529_v61, %v382_v28  ;;  %v406_v5 = vadd.f32 %v529_v61, %v383_v30 }
 0x174   :  { %v407_v26 = vadd.f32 %v529_v61, %v384_v31  ;;  %v408_v6 = vadd.f32 %v529_v61, %v385_v32  ;;  %v409_v29 = vadd.f32 %v529_v61, %v386_v33  ;;  %v410_v7 = vadd.f32 %v529_v61, %v387_v34 }
 0x175   :  { %v411_v37 = vmax.f32 %v395_v62, 0.0  ;;  %v412_v8 = vmax.f32 %v396_v63, 0.0  ;;  %v413_v38 = vmax.f32 %v397_v0, 0.0  ;;  %v414_v9 = vmax.f32 %v398_v1, 0.0 }
 0x176   :  { %v415_v10 = vmax.f32 %v399_v35, 0.0  ;;  %v416_v11 = vmax.f32 %v400_v2, 0.0  ;;  %v417_v12 = vmax.f32 %v401_v36, 0.0  ;;  %v418_v13 = vmax.f32 %v402_v3, 0.0 }
 0x177   :  { %v419_v14 = vmax.f32 %v403_v21, 0.0  ;;  %v420_v15 = vmax.f32 %v404_v4, 0.0  ;;  %v421_v17 = vmax.f32 %v405_v27, 0.0  ;;  %v422_v18 = vmax.f32 %v406_v5, 0.0 }
 0x178   :  { %v423_v19 = vmax.f32 %v407_v26, 0.0  ;;  %v424_v20 = vmax.f32 %v408_v6, 0.0  ;;  %v425_v22 = vmax.f32 %v409_v29, 0.0  ;;  %v426_v23 = vmax.f32 %v410_v7, 0.0 }
 0x179   :  { %v546_v24 = vpack.c.bf16 %v411_v37, %v411_v37  ;;  %v547_v39 = vpack.c.bf16 %v412_v8, %v412_v8  ;;  %v548_v40 = vpack.c.bf16 %v413_v38, %v413_v38  ;;  %v549_v41 = vpack.c.bf16 %v414_v9, %v414_v9 }
 0x17a   :  { %v550_v42 = vpack.c.bf16 %v415_v10, %v415_v10  ;;  %v551_v43 = vpack.c.bf16 %v416_v11, %v416_v11  ;;  %v552_v44 = vpack.c.bf16 %v417_v12, %v417_v12  ;;  %v553_v45 = vpack.c.bf16 %v418_v13, %v418_v13 }
 0x17b   :  { %v554_v46 = vpack.c.bf16 %v419_v14, %v419_v14  ;;  %v555_v47 = vpack.c.bf16 %v420_v15, %v420_v15  ;;  %v556_v48 = vpack.c.bf16 %v421_v17, %v421_v17  ;;  %v557_v49 = vpack.c.bf16 %v422_v18, %v422_v18  ;;  %492 = vst.msk [vmem:[%s920_s5] sm:$0xf] %vm491_vm1, %v546_v24 }
 0x17c   :  { %493 = vst.msk [vmem:[%s920_s5 + $0x4] sm:$0xf] %vm491_vm1, %v547_v39  ;;  %494 = vst.msk [vmem:[%s920_s5 + $0x8] sm:$0xf] %vm491_vm1, %v548_v40  ;;  %v558_v50 = vpack.c.bf16 %v423_v19, %v423_v19  ;;  %v559_v51 = vpack.c.bf16 %v424_v20, %v424_v20  ;;  %v560_v52 = vpack.c.bf16 %v425_v22, %v425_v22 }
 0x17d   :  { %495 = vst.msk [vmem:[%s920_s5 + $0xc] sm:$0xf] %vm491_vm1, %v549_v41  ;;  %v561_v53 = vpack.c.bf16 %v426_v23, %v426_v23  ;;  %496 = vst.msk [vmem:[%s920_s5 + $0x10] sm:$0xf] %vm491_vm1, %v550_v42 }
 0x17e   :  { %497 = vst.msk [vmem:[%s920_s5 + $0x14] sm:$0xf] %vm491_vm1, %v551_v43  ;;  %498 = vst.msk [vmem:[%s920_s5 + $0x18] sm:$0xf] %vm491_vm1, %v552_v44 }
 0x17f   :  { %499 = vst.msk [vmem:[%s920_s5 + $0x1c] sm:$0xf] %vm491_vm1, %v553_v45  ;;  %500 = vst.msk [vmem:[%s920_s5 + $0x20] sm:$0xf] %vm491_vm1, %v554_v46 }
 0x180   :  { %501 = vst.msk [vmem:[%s920_s5 + $0x24] sm:$0xf] %vm491_vm1, %v555_v47  ;;  %502 = vst.msk [vmem:[%s920_s5 + $0x28] sm:$0xf] %vm491_vm1, %v556_v48 }
 0x181   :  { %503 = vst.msk [vmem:[%s920_s5 + $0x2c] sm:$0xf] %vm491_vm1, %v557_v49  ;;  %504 = vst.msk [vmem:[%s920_s5 + $0x30] sm:$0xf] %vm491_vm1, %v558_v50 }
 0x182   :  { %505 = vst.msk [vmem:[%s920_s5 + $0x34] sm:$0xf] %vm491_vm1, %v559_v51  ;;  %506 = vst.msk [vmem:[%s920_s5 + $0x38] sm:$0xf] %vm491_vm1, %v560_v52 }
 0x183   :  { %507 = vst.msk [vmem:[%s920_s5 + $0x3c] sm:$0xf] %vm491_vm1, %v561_v53 }

// kernel: vae_forward.9
= control target key start
LH: loop header
LB: loop body
LE: loop exit
PB: predicated region body
PF: predicated region fallthrough
CT: control target
= control target key end

     0   :  { %vm229_vm0 = vcmask 261120   ;;  %vm311_vm1 = vcmask 257024   ;;  %s537_s1 = inlined_call_operand.vmem [shape: bf16[256,32], index: 1, kind: input, shape index: {}]   ;;  %s538_s0 = inlined_call_operand.vmem [shape: bf16[32,256], index: 0, kind: input, shape index: {}]   ;;  %s539_s2 = inlined_call_operand.vmem [shape: f32[1,32], index: 2, kind: input, shape index: {}]   ;;  %s540_s3 = inlined_call_operand.vmem [shape: f32[1,32], index: 3, kind: input, shape index: {}]   ;;  %s541_s4 = inlined_call_operand.vmem [shape: f32[1,32], index: 4, kind: input, shape index: {}]   ;;  %s542_s5 = inlined_call_operand.vmem [shape: bf16[32,32], index: 5, kind: output, shape index: {}]  }
   0x1   :  { %v394_v0 = vld [vmem:[%s537_s1 + $0x40] sm:$0xff]   ;;  %v396_v2 = vld [vmem:[%s537_s1 + $0x48] sm:$0xff]   ;;  %v398_v4 = vld [vmem:[%s537_s1 + $0x50] sm:$0xff]  }
   0x2   :  { %v395_v1 = vld [vmem:[%s537_s1] sm:$0xff]   ;;  %350 = vmatprep.subr.bf16.mxu0 %v394_v0  ;;  %378 = vmatprep.subr.bf16.mxu1 %v394_v0  ;;  %v397_v3 = vld [vmem:[%s537_s1 + $0x8] sm:$0xff]   ;;  %v399_v5 = vld [vmem:[%s537_s1 + $0x10] sm:$0xff]  }
   0x3   :  { %351 = vmatpush3.bf16.msra.mxu0 %v395_v1  ;;  %386 = vmatpush3.bf16.msra.mxu1 %v395_v1  ;;  %v400_v6 = vld [vmem:[%s537_s1 + $0x58] sm:$0xff]   ;;  %v402_v8 = vld [vmem:[%s537_s1 + $0x60] sm:$0xff]   ;;  %v404_v10 = vld [vmem:[%s537_s1 + $0x68] sm:$0xff]  }
   0x4   :  { %352 = vmatprep.subr.bf16.mxu0 %v396_v2  ;;  %379 = vmatprep.subr.bf16.mxu1 %v396_v2  ;;  %v401_v7 = vld [vmem:[%s537_s1 + $0x18] sm:$0xff]   ;;  %v403_v9 = vld [vmem:[%s537_s1 + $0x20] sm:$0xff]   ;;  %v405_v13 = vld [vmem:[%s537_s1 + $0x28] sm:$0xff]  }
   0x5   :  { %v412_v11 = vld [vmem:[%s538_s0 + $0x4] ss:$8 sps:$4 sm:$0xff]   ;;  %v415_v12 = vld [vmem:[%s538_s0 + $0x14] ss:$8 sps:$4 sm:$0xff]   ;;  %v410_v18 = vld [vmem:[%s538_s0] ss:$8 sps:$4 sm:$0xff]  }
   0x6   :  { %v406_v14 = vld [vmem:[%s537_s1 + $0x70] sm:$0xff]   ;;  %212 = vmatprep.mubr.bf16.mxu0 %v412_v11  ;;  %220 = vmatprep.mubr.bf16.mxu1 %v415_v12  ;;  %v408_v16 = vld [vmem:[%s537_s1 + $0x78] sm:$0xff]   ;;  %v320_v22 = vld [vmem:[%s539_s2] ss:$0 sm:$0xff] }
   0x7   :  { %353 = vmatpush3.bf16.msra.mxu0 %v397_v3  ;;  %387 = vmatpush3.bf16.msra.mxu1 %v397_v3  ;;  %v407_v15 = vld [vmem:[%s537_s1 + $0x30] sm:$0xff]   ;;  %v409_v17 = vld [vmem:[%s537_s1 + $0x38] sm:$0xff]   ;;  %v266_v12 = vld [vmem:[%s540_s3] sm:$0x1] }
   0x8   :  { %354 = vmatprep.subr.bf16.mxu0 %v398_v4  ;;  %380 = vmatprep.subr.bf16.mxu1 %v398_v4  ;;  %v413_v19 = vld [vmem:[%s538_s0 + $0x10] ss:$8 sps:$4 sm:$0xff]  }
   0xb   :  { %355 = vmatpush3.bf16.msra.mxu0 %v399_v5  ;;  %388 = vmatpush3.bf16.msra.mxu1 %v399_v5 }
   0xc   :  { %356 = vmatprep.subr.bf16.mxu0 %v400_v6  ;;  %381 = vmatprep.subr.bf16.mxu1 %v400_v6 }
   0xf   :  { %357 = vmatpush3.bf16.msra.mxu0 %v401_v7  ;;  %389 = vmatpush3.bf16.msra.mxu1 %v401_v7 }
  0x10   :  { %358 = vmatprep.subr.bf16.mxu0 %v402_v8  ;;  %382 = vmatprep.subr.bf16.mxu1 %v402_v8 }
  0x13   :  { %359 = vmatpush3.bf16.msra.mxu0 %v403_v9  ;;  %390 = vmatpush3.bf16.msra.mxu1 %v403_v9 }
  0x14   :  { %360 = vmatprep.subr.bf16.mxu0 %v404_v10  ;;  %383 = vmatprep.subr.bf16.mxu1 %v404_v10  ;;  %v271_v10 = vlaneseq }
  0x16   :  { %v272_v11 = vshrl.u32 %v271_v10, 7 }
  0x17   :  { %361 = vmatpush3.bf16.msra.mxu0 %v405_v13  ;;  %391 = vmatpush3.bf16.msra.mxu1 %v405_v13 }
  0x18   :  { %362 = vmatprep.subr.bf16.mxu0 %v406_v14  ;;  %384 = vmatprep.subr.bf16.mxu1 %v406_v14  ;;  %v273_v13 = vsub.s32 0, %v272_v11 }
  0x1b   :  { %363 = vmatpush3.bf16.msra.mxu0 %v407_v15  ;;  %392 = vmatpush3.bf16.msra.mxu1 %v407_v15 }
  0x1c   :  { %364 = vmatprep.subr.bf16.mxu0 %v408_v16  ;;  %385 = vmatprep.subr.bf16.mxu1 %v408_v16 }
  0x1f   :  { %365 = vmatpush3.bf16.msra.mxu0 %v409_v17  ;;  %393 = vmatpush3.bf16.msra.mxu1 %v409_v17  ;;  %v341_v17 = vld [vmem:[%s541_s4] ss:$0 sm:$0xff] }
  0x22   :  { %213 = vmatmul.mubr.bf16.vlgmr.msra.gmra.mrb[0].mxu0 %v410_v18  ;;  %221 = vmatmul.mubr.bf16.vlgmr.msra.gmra.mrb[0].mxu1 %v413_v19 }
  0xf5   :  { %v366_v20 = vpop.f32.mrb[0].mxu0  ;;  %v372_v21 = vpop.f32.mrb[0].mxu1 }
  0xf6   :  { %v367_v23 = vpop.f32.mrb[1].mxu0  ;;  %v373_v24 = vpop.f32.mrb[1].mxu1 }
  0xf7   :  { %v368_v25 = vadd.f32 %v367_v23, %v366_v20  ;;  %v369_v26 = vpop.f32.mrb[2].mxu0  ;;  %v374_v27 = vadd.f32 %v373_v24, %v372_v21  ;;  %v375_v28 = vpop.f32.mrb[2].mxu1 }
  0xf8   :  { %v370_v29 = vpop.f32.mrb[3].mxu0  ;;  %v376_v30 = vpop.f32.mrb[3].mxu1 }
  0xf9   :  { %v215_v31 = vadd.f32 %v368_v25, %v320_v22  ;;  %v223_v32 = vadd.f32 %v374_v27, %v320_v22  ;;  %v371_v33 = vadd.f32 %v370_v29, %v369_v26  ;;  %v377_v34 = vadd.f32 %v376_v30, %v375_v28 }
  0xfb   :  { %v218_v35 = vadd.f32 %v371_v33, %v320_v22  ;;  %v230_v36 = vsel %vm229_vm0, %v215_v31, 0.0  ;;  %v233_v37 = vsel %vm229_vm0, %v223_v32, 0.0  ;;  %v226_v39 = vadd.f32 %v377_v34, %v320_v22 }
  0xfd   :  { %v231_v38 = vsel %vm229_vm0, %v218_v35, 0.0  ;;  %v235_v42 = vsel %vm229_vm0, %v226_v39, 0.0 }
  0xfe   :  { %v232_v40 = vadd.f32 %v231_v38, %v230_v36 }
 0x100   :  { %v234_v41 = vadd.f32 %v233_v37, %v232_v40 }
 0x102   :  { %v236_v43 = vadd.f32 %v235_v42, %v234_v41 }
 0x104   :  { %v237_v44 = vrot.slane %v236_v43, 4 }
 0x106   :  { %v238_v45 = vadd.f32 %v237_v44, %v236_v43 }
 0x108   :  { %v239_v46 = vrot.slane %v238_v45, 2 }
 0x10a   :  { %v240_v47 = vadd.f32 %v239_v46, %v238_v45 }
 0x10c   :  { %v241_v48 = vrot.slane %v240_v47, 1 }
 0x10e   :  { %v242_v49 = vadd.f32 %v241_v48, %v240_v47 }
 0x110   :  { %v243_v50 = vmul.f32 0.03125, %v242_v49 }
 0x112   :  { %v244_v51 = vsub.f32 %v215_v31, %v243_v50  ;;  %v245_v52 = vsub.f32 %v218_v35, %v243_v50  ;;  %v246_v53 = vsub.f32 %v223_v32, %v243_v50  ;;  %v247_v54 = vsub.f32 %v226_v39, %v243_v50 }
 0x114   :  { %v248_v55 = vmul.f32 %v244_v51, %v244_v51  ;;  %v249_v56 = vmul.f32 %v245_v52, %v245_v52  ;;  %v250_v57 = vmul.f32 %v246_v53, %v246_v53  ;;  %v251_v58 = vmul.f32 %v247_v54, %v247_v54 }
 0x116   :  { %v252_v59 = vsel %vm229_vm0, %v248_v55, 0.0  ;;  %v253_v60 = vsel %vm229_vm0, %v249_v56, 0.0  ;;  %v255_v62 = vsel %vm229_vm0, %v250_v57, 0.0  ;;  %v257_v0 = vsel %vm229_vm0, %v251_v58, 0.0 }
 0x117   :  { %v254_v61 = vadd.f32 %v253_v60, %v252_v59 }
 0x119   :  { %v256_v63 = vadd.f32 %v255_v62, %v254_v61 }
 0x11b   :  { %v258_v1 = vadd.f32 %v257_v0, %v256_v63 }
 0x11d   :  { %v259_v2 = vrot.slane %v258_v1, 4 }
 0x11f   :  { %v260_v3 = vadd.f32 %v259_v2, %v258_v1 }
 0x121   :  { %v261_v4 = vrot.slane %v260_v3, 2 }
 0x123   :  { %v262_v5 = vadd.f32 %v261_v4, %v260_v3 }
 0x125   :  { %v263_v6 = vrot.slane %v262_v5, 1 }
 0x127   :  { %v264_v7 = vadd.f32 %v263_v6, %v262_v5 }
 0x129   :  { %v265_v8 = vmul.f32 0.03125, %v264_v7 }
 0x12b   :  { %v267_v9 = vadd.f32 1e-05, %v265_v8 }
 0x12d   :  { %416 = vrsqrt.f32 %v267_v9 }
 0x137   :  { %v417_v14 = vpop.eup %416 }
 0x138   :  { %v269_v15 = vmul.f32 %v417_v14, %v266_v12 }
 0x13a   :  { %v274_v16 = vrot.slane %v269_v15, %v273_v13 }
 0x13c   :  { %v276_v18 = vmul.f32 %v274_v16, %v244_v51  ;;  %v277_v19 = vmul.f32 %v274_v16, %v245_v52  ;;  %v278_v20 = vmul.f32 %v274_v16, %v246_v53  ;;  %v279_v21 = vmul.f32 %v274_v16, %v247_v54 }
 0x13e   :  { %v287_v22 = vadd.f32 %v341_v17, %v276_v18  ;;  %v288_v23 = vadd.f32 %v341_v17, %v277_v19  ;;  %v289_v24 = vadd.f32 %v341_v17, %v278_v20  ;;  %v290_v25 = vadd.f32 %v341_v17, %v279_v21 }
 0x140   :  { %v291_v26 = vmax.f32 %v287_v22, 0.0  ;;  %v292_v27 = vmax.f32 %v288_v23, 0.0  ;;  %v293_v28 = vmax.f32 %v289_v24, 0.0  ;;  %v294_v29 = vmax.f32 %v290_v25, 0.0 }
 0x142   :  { %v346_v30 = vpack.c.bf16 %v291_v26, %v291_v26  ;;  %v347_v31 = vpack.c.bf16 %v292_v27, %v292_v27  ;;  %v348_v32 = vpack.c.bf16 %v293_v28, %v293_v28  ;;  %v349_v33 = vpack.c.bf16 %v294_v29, %v294_v29 }
 0x144   :  { %312 = vst.msk [vmem:[%s542_s5] sm:$0xf] %vm311_vm1, %v346_v30  ;;  %313 = vst.msk [vmem:[%s542_s5 + $0x4] sm:$0xf] %vm311_vm1, %v347_v31 }
 0x145   :  { %314 = vst.msk [vmem:[%s542_s5 + $0x8] sm:$0xf] %vm311_vm1, %v348_v32  ;;  %315 = vst.msk [vmem:[%s542_s5 + $0xc] sm:$0xf] %vm311_vm1, %v349_v33 }

// kernel: vae_forward.10
= control target key start
LH: loop header
LB: loop body
LE: loop exit
PB: predicated region body
PF: predicated region fallthrough
CT: control target
= control target key end

     0   :  { %14 = vsyncpa [#allocation3], 0  ;;  %v113_v30 = vlaneseq  ;;  %v803_v34 = vmov 1966171168   ;;  %s804_s29 = smov 16   ;;  %s1016_s0 = inlined_call_operand.vmem [shape: bf16[2,512], index: 0, kind: input, shape index: {}]   ;;  %s1017_s1 = inlined_call_operand.vmem [shape: bf16[512,32], index: 1, kind: input, shape index: {}]   ;;  %s1018_s2 = inlined_call_operand.vmem [shape: f32[1,32], index: 2, kind: input, shape index: {}]   ;;  %s1019_s3 = inlined_call_operand.vmem [shape: f32[2,16], index: 3, kind: input, shape index: {}]   ;;  %s1020_s4 = inlined_call_operand.vmem [shape: bf16[16,512], index: 4, kind: input, shape index: {}]   ;;  %s1021_s5 = inlined_call_operand.vmem [shape: f32[1,512], index: 5, kind: input, shape index: {}]   ;;  %s1022_s6 = inlined_call_operand.hbm [shape: f32[2,16], index: 6, kind: output, shape index: {0}]   ;;  %s1023_s7 = inlined_call_operand.hbm [shape: f32[2,16], index: 7, kind: output, shape index: {1}]   ;;  %s1024_s8 = inlined_call_operand.vmem [shape: bf16[2,512], index: 8, kind: output, shape index: {2}]  }
   0x1   :  { %v715_v0 = vld [vmem:[%s1017_s1 + $0x40] sm:$0xff]   ;;  %v719_v4 = vld [vmem:[%s1017_s1 + $0x48] sm:$0xff]   ;;  %v723_v8 = vld [vmem:[%s1017_s1 + $0x50] sm:$0xff]   ;;  %v111_v35 = vunpack.c.l.s4 %v803_v34 }
   0x2   :  { %v716_v1 = vld [vmem:[%s1017_s1 + $0xc0] sm:$0xff]   ;;  %665 = vmatprep.subr.bf16.mxu0 %v715_v0  ;;  %v720_v5 = vld [vmem:[%s1017_s1 + $0xc8] sm:$0xff]   ;;  %v724_v9 = vld [vmem:[%s1017_s1 + $0xd0] sm:$0xff]   ;;  %v953_v36 = vshrl.u32 %v113_v30, 7 }
   0x3   :  { %v717_v2 = vld [vmem:[%s1017_s1] sm:$0xff]   ;;  %687 = vmatprep.subr.bf16.mxu1 %v716_v1  ;;  %v721_v6 = vld [vmem:[%s1017_s1 + $0x8] sm:$0xff]   ;;  %v725_v10 = vld [vmem:[%s1017_s1 + $0x10] sm:$0xff]  }
   0x4   :  { %v718_v3 = vld [vmem:[%s1017_s1 + $0x80] sm:$0xff]   ;;  %666 = vmatpush3.bf16.msra.mxu0 %v717_v2  ;;  %v722_v7 = vld [vmem:[%s1017_s1 + $0x88] sm:$0xff]   ;;  %v726_v11 = vld [vmem:[%s1017_s1 + $0x90] sm:$0xff]  }
   0x5   :  { %688 = vmatpush3.bf16.msra.mxu1 %v718_v3  ;;  %667 = vmatprep.subr.bf16.mxu0 %v719_v4  ;;  %v727_v12 = vld [vmem:[%s1017_s1 + $0x58] sm:$0xff]   ;;  %v731_v16 = vld [vmem:[%s1017_s1 + $0x60] sm:$0xff]   ;;  %v735_v20 = vld [vmem:[%s1017_s1 + $0x68] sm:$0xff]  }
   0x6   :  { %689 = vmatprep.subr.bf16.mxu1 %v720_v5  ;;  %v728_v13 = vld [vmem:[%s1017_s1 + $0xd8] sm:$0xff]   ;;  %v732_v17 = vld [vmem:[%s1017_s1 + $0xe0] sm:$0xff]   ;;  %v736_v21 = vld [vmem:[%s1017_s1 + $0xe8] sm:$0xff]  }
   0x7   :  { %v729_v14 = vld [vmem:[%s1017_s1 + $0x18] sm:$0xff]   ;;  %v733_v18 = vld [vmem:[%s1017_s1 + $0x20] sm:$0xff]   ;;  %v737_v22 = vld [vmem:[%s1017_s1 + $0x28] sm:$0xff]  }
   0x8   :  { %668 = vmatpush3.bf16.msra.mxu0 %v721_v6  ;;  %v730_v15 = vld [vmem:[%s1017_s1 + $0x98] sm:$0xff]   ;;  %v734_v19 = vld [vmem:[%s1017_s1 + $0xa0] sm:$0xff]   ;;  %v738_v23 = vld [vmem:[%s1017_s1 + $0xa8] sm:$0xff]  }
   0x9   :  { %690 = vmatpush3.bf16.msra.mxu1 %v722_v7  ;;  %669 = vmatprep.subr.bf16.mxu0 %v723_v8  ;;  %v739_v24 = vld [vmem:[%s1017_s1 + $0x70] sm:$0xff]   ;;  %v743_v28 = vld [vmem:[%s1017_s1 + $0x78] sm:$0xff]   ;;  %v623_v33 = vld.sshfl [vmem:[%s1016_s0] sm:$0x33 pattern:$0x75316420] }
   0xa   :  { %691 = vmatprep.subr.bf16.mxu1 %v724_v9  ;;  %v740_v25 = vld [vmem:[%s1017_s1 + $0xf0] sm:$0xff]   ;;  %v744_v29 = vld [vmem:[%s1017_s1 + $0xf8] sm:$0xff]   ;;  %v405_v37 = vld [vmem:[%s1019_s3] sm:$0x3] }
   0xb   :  { %v741_v26 = vld [vmem:[%s1017_s1 + $0x30] sm:$0xff]   ;;  %v745_v31 = vld [vmem:[%s1017_s1 + $0x38] sm:$0xff]   ;;  %407 = vrot.lane.b32.xlu0 %v405_v37, %s804_s29 }
   0xc   :  { %670 = vmatpush3.bf16.msra.mxu0 %v725_v10  ;;  %v742_v27 = vld [vmem:[%s1017_s1 + $0xb0] sm:$0xff]   ;;  %v746_v32 = vld [vmem:[%s1017_s1 + $0xb8] sm:$0xff]  }
   0xd   :  { %692 = vmatpush3.bf16.msra.mxu1 %v726_v11  ;;  %671 = vmatprep.subr.bf16.mxu0 %v727_v12 }
   0xe   :  { %693 = vmatprep.subr.bf16.mxu1 %v728_v13 }
  0x10   :  { %672 = vmatpush3.bf16.msra.mxu0 %v729_v14 }
  0x11   :  { %694 = vmatpush3.bf16.msra.mxu1 %v730_v15  ;;  %673 = vmatprep.subr.bf16.mxu0 %v731_v16 }
  0x12   :  { %695 = vmatprep.subr.bf16.mxu1 %v732_v17 }
  0x14   :  { %674 = vmatpush3.bf16.msra.mxu0 %v733_v18 }
  0x15   :  { %696 = vmatpush3.bf16.msra.mxu1 %v734_v19  ;;  %675 = vmatprep.subr.bf16.mxu0 %v735_v20 }
  0x16   :  { %697 = vmatprep.subr.bf16.mxu1 %v736_v21 }
  0x18   :  { %676 = vmatpush3.bf16.msra.mxu0 %v737_v22 }
  0x19   :  { %698 = vmatpush3.bf16.msra.mxu1 %v738_v23  ;;  %677 = vmatprep.subr.bf16.mxu0 %v739_v24 }
  0x1a   :  { %699 = vmatprep.subr.bf16.mxu1 %v740_v25 }
  0x1c   :  { %678 = vmatpush3.bf16.msra.mxu0 %v741_v26 }
  0x1d   :  { %700 = vmatpush3.bf16.msra.mxu1 %v742_v27  ;;  %679 = vmatprep.subr.bf16.mxu0 %v743_v28 }
  0x1e   :  { %701 = vmatprep.subr.bf16.mxu1 %v744_v29 }
  0x20   :  { %680 = vmatpush3.bf16.msra.mxu0 %v745_v31 }
  0x21   :  { %702 = vmatpush3.bf16.msra.mxu1 %v746_v32 }
  0x22   :  { %15 = vsyncpa [#allocation5], 0  ;;  %v109_v38 = vcombine.high %v623_v33, %v623_v33  ;;  %v112_v39 = vunpack.c.0.s8 %v111_v35  ;;  %v747_v45 = vld [vmem:[%s1020_s4] ss:$16 sps:$4 sm:$0xff]   ;;  %v749_v46 = vld [vmem:[%s1020_s4 + $0x4] ss:$16 sps:$4 sm:$0xff]  }
  0x23   :  { %v750_v47 = vld [vmem:[%s1020_s4 + $0x8] ss:$16 sps:$4 sm:$0xff]   ;;  %v752_v48 = vld [vmem:[%s1020_s4 + $0xc] ss:$16 sps:$4 sm:$0xff]   ;;  %467 = vmatprep.subr.bf16.mxu0 %v749_v46  ;;  %v622_v50 = vld [vmem:[%s1018_s2] ss:$0 sm:$0xff] }
  0x24   :  { %v959_v40 = vsub.s32 %v112_v39, %v953_v36  ;;  %508 = vmatprep.subr.bf16.mxu1 %v752_v48  ;;  %vm549_vm0 = vcmask 123904   ;;  %s805_s4 = smov 112   ;;  %v806_v0 = vmov 0   ;;  %vm463_vm1 = vcmask 130048   ;;  %s807_s2 = smov [#allocation2]  }
  0x25   :  { %s596_s15 = sshll.u32 %s807_s2, 4  ;;  %s808_s16 = smov [#allocation4]   ;;  %s597_s15 = int_to_ptr.vmem [resolvable:$true] %s596_s15 }
  0x26   :  { %v123_v41 = vrot.slane %v109_v38, %v959_v40  ;;  %v116_v42 = vrot.slane %v623_v33, %v959_v40  ;;  %s606_s17 = sshll.u32 %s808_s16, 4  ;;  %s755_s18 = scalar_lea.vmem %s597_s15, 32  ;;  %s607_s17 = int_to_ptr.vmem [resolvable:$true] %s606_s17 }
  0x27   :  { %p756_p0 = scmp.ne.s32.totalorder %s597_s15, %s755_s18  ;;  %p760_p1 = scmp.lt.s32.totalorder %s597_s15, %s597_s15 }
  0x28   :  { %354 = vmatprep.mubr.bf16.mxu0 %v123_v41  ;;  %v125_v43 = vcombine.high %v123_v41, %v123_v41  ;;  %v124_v44 = vcombine.high %v116_v42, %v116_v42  ;;  %p761_p2 = scmp.lt.s32.totalorder %s755_s18, %s755_s18 }
  0x29   :  { %355 = vmatmul.mubr.bf16.vlgmr.msra.gmra.mrb[0].mxu0 %v116_v42 }
  0x2a   :  { %394 = vmatprep.mubr.bf16.mxu1 %v125_v43  ;;  %468 = vmatpush1.bf16.msra.mxu0 %v747_v45  ;;  %p762_p3 = por %p761_p2, %p760_p1 }
  0x2b   :  { %395 = vmatmul.mubr.bf16.vlgmr.msra.gmra.mrb[0].mxu1 %v124_v44  ;;  %499 = vmatprep.mubr.bf16.mxu0 %v806_v0 }
  0x2c   :  { %509 = vmatpush1.bf16.msra.mxu1 %v750_v47  ;;  %540 = vmatprep.mubr.bf16.mxu1 %v806_v0  ;;  %p763_p4 = pnand %p762_p3, %p756_p0 }
  0x7d   :  { %v408_v1 = vpop.permute.xlu0 %407 }
  0xfc   :  { %v681_v49 = vpop.f32.mrb[0].mxu0 }
  0xfd   :  { %v682_v51 = vpop.f32.mrb[1].mxu0 }
  0xfe   :  { %v703_v52 = vpop.f32.mrb[0].mxu1  ;;  %v683_v53 = vadd.f32 %v682_v51, %v681_v49  ;;  %v684_v54 = vpop.f32.mrb[2].mxu0 }
  0xff   :  { %v704_v55 = vpop.f32.mrb[1].mxu1  ;;  %v685_v56 = vpop.f32.mrb[3].mxu0 }
 0x100   :  { %v357_v57 = vadd.f32 %v683_v53, %v622_v50  ;;  %v705_v58 = vadd.f32 %v704_v55, %v703_v52  ;;  %v706_v59 = vpop.f32.mrb[2].mxu1 }
 0x101   :  { %v707_v60 = vpop.f32.mrb[3].mxu1 }
 0x102   :  { %v397_v61 = vadd.f32 %v705_v58, %v357_v57 }
 0x104   :  { %v402_v62 = vmul.f32 0.5, %v397_v61  ;;  %552 = vrot.lane.b32.xlu1 %v397_v61, %s805_s4  ;;  %550 = vst.msk [vmem:[#allocation2] sm:$0x3] %vm549_vm0, %v397_v61 }
 0x106   :  { %v403_v63 = vmul.f32 1.442695, %v402_v62 }
 0x108   :  { %753 = vpow2.f32 %v403_v63 }
 0x112   :  { %v754_v2 = vpop.eup %753 }
 0x113   :  { %v410_v3 = vmul.f32 %v754_v2, %v408_v1 }
 0x115   :  { %412 = vrot.lane.b32.xlu0 %v410_v3, %s805_s4 }
 0x176   :  { %v553_v4 = vpop.permute.xlu1 %552 }
 0x177   :  { %555 = vst.msk [vmem:[#allocation4] sm:$0x3] %vm549_vm0, %v553_v4 }
 0x187   :  { %v413_v5 = vpop.permute.xlu0 %412 }
 0x188   :  { %v415_v6 = vadd.f32 %v413_v5, %v397_v61 }
 0x18a   :  { %v416_v7 = vpack.c.bf16 %v415_v6, %v415_v6 }
 0x18c   :  { %660 = vmatmul.mubr.msk.bf16.vlgmr.msra.gmra.mrb[4].mxu0 %vm463_vm1, %v416_v7  ;;  %661 = vmatmul.mubr.msk.bf16.vlgmr.msra.gmra.mrb[4].mxu1 %vm463_vm1, %v416_v7 }
 0x18d   :  { %766 = shalt.err (!%p763_p4)
}
 0x18e   :  { %s767_s21 = scalar_lea.hbm %s1022_s6, 32 }
 0x18f   :  { %p768_p5 = scmp.ne.s32.totalorder %s1022_s6, %s767_s21  ;;  %p771_p6 = scmp.lt.u32.totalorder %s767_s21, %s1022_s6 }
 0x191   :  { %p773_p7 = pnand %p771_p6, %p768_p5 }
 0x193   :  { %776 = shalt.err (!%p773_p7)
}
 0x194   :  { %599 = dma.vmem_to_hbm [thread:$0]  %s597_s15, 32, %s1022_s6, [#allocation3]  }
 0x195   :  { %s777_s28 = scalar_lea.vmem %s607_s17, 32  ;;  %p782_p9 = scmp.lt.s32.totalorder %s607_s17, %s607_s17 }
 0x196   :  { %p778_p8 = scmp.ne.s32.totalorder %s607_s17, %s777_s28  ;;  %p783_p10 = scmp.lt.s32.totalorder %s777_s28, %s777_s28 }
 0x198   :  { %p784_p11 = por %p783_p10, %p782_p9 }
 0x19a   :  { %p785_p12 = pnand %p784_p11, %p778_p8 }
 0x19c   :  { %788 = shalt.err (!%p785_p12)
}
 0x19d   :  { %s789_s1 = scalar_lea.hbm %s1023_s7, 32 }
 0x19e   :  { %p790_p13 = scmp.ne.s32.totalorder %s1023_s7, %s789_s1  ;;  %p793_p0 = scmp.lt.u32.totalorder %s789_s1, %s1023_s7 }
 0x1a0   :  { %p795_p1 = pnand %p793_p0, %p790_p13 }
 0x1a2   :  { %798 = shalt.err (!%p795_p1)
}
 0x1a3   :  { %609 = dma.vmem_to_hbm [thread:$0]  %s607_s17, 32, %s1023_s7, [#allocation5]   ;;  %v425_v8 = vsub.s32 0, %v953_v36  ;;  %v433_v9 = vsub.s32 2, %v953_v36  ;;  %v421_v10 = vld [vmem:[%s1021_s5] sm:$0xf] }
 0x1a4   :  { %v429_v11 = vsub.s32 1, %v953_v36  ;;  %v437_v12 = vsub.s32 3, %v953_v36 }
 0x1a5   :  { %v426_v13 = vrot.slane %v421_v10, %v425_v8  ;;  %v434_v14 = vrot.slane %v421_v10, %v433_v9 }
 0x1a6   :  { %v430_v15 = vrot.slane %v421_v10, %v429_v11  ;;  %v438_v16 = vrot.slane %v421_v10, %v437_v12 }
 0x25f   :  { %v501_v17 = vpop.f32.mrb[4].mxu0  ;;  %v542_v18 = vpop.f32.mrb[4].mxu1 }
 0x260   :  { %v502_v19 = vadd.f32 %v501_v17, %v426_v13  ;;  %v543_v20 = vadd.f32 %v542_v18, %v434_v14  ;;  %v503_v21 = vpop.f32.mrb[5].mxu0  ;;  %v544_v22 = vpop.f32.mrb[5].mxu1 }
 0x261   :  { %v504_v23 = vadd.f32 %v503_v21, %v430_v15  ;;  %v545_v24 = vadd.f32 %v544_v22, %v438_v16  ;;  %v505_v25 = vpop.f32.mrb[6].mxu0  ;;  %v546_v26 = vpop.f32.mrb[6].mxu1 }
 0x262   :  { %v506_v27 = vpop.f32.mrb[7].mxu0  ;;  %v547_v28 = vpop.f32.mrb[7].mxu1 }
 0x263   :  { %v662_v29 = vpack.c.bf16 %v504_v23, %v502_v19  ;;  %v663_v30 = vpack.c.bf16 %v545_v24, %v543_v20 }
 0x265   :  { %v572_v31 = vrot.slane %v662_v29, %v959_v40  ;;  %v579_v32 = vrot.slane %v663_v30, %v959_v40 }
 0x267   :  { %v580_v33 = vcombine.low %v572_v31, %v579_v32 }
 0x269   :  { %664 = vst.sshfl [vmem:[%s1024_s8] sm:$0x55 pattern:$0x73625140] %v580_v33 }
 0x26a   :  { %799 = dma.done.wait [#allocation3], 32  }
 0x26b   :  { %800 = vsyncadd [#allocation3], 4294967264 }
 0x26c   :  { %801 = dma.done.wait [#allocation5], 32  }
 0x26d   :  { %802 = vsyncadd [#allocation5], 4294967264 }
 0x26e   :  { %620 = vsyncpa [#allocation3], 1 }
 0x26f   :  { %621 = vsyncpa [#allocation5], 1 }

// kernel: vae_forward.11
= control target key start
LH: loop header
LB: loop body
LE: loop exit
PB: predicated region body
PF: predicated region fallthrough
CT: control target
= control target key end

     0   :  { %vm210_vm0 = vcmask 261120   ;;  %vm315_vm1 = vcmask 523264   ;;  %s592_s17 = smov 96   ;;  %s593_s18 = smov 32   ;;  %vm353_vm2 = vcmask 130048   ;;  %vm356_vm3 = vcmask 392192   ;;  %s760_s1 = inlined_call_operand.vmem [shape: bf16[288,64], index: 1, kind: input, shape index: {}]   ;;  %s761_s0 = inlined_call_operand.vmem [shape: bf16[32,288], index: 0, kind: input, shape index: {}]   ;;  %s762_s2 = inlined_call_operand.vmem [shape: f32[1,64], index: 2, kind: input, shape index: {}]   ;;  %s763_s4 = inlined_call_operand.vmem [shape: f32[1,16], index: 4, kind: input, shape index: {}]   ;;  %s764_s3 = inlined_call_operand.vmem [shape: f32[1,16], index: 3, kind: input, shape index: {}]   ;;  %s765_s5 = inlined_call_operand.vmem [shape: bf16[32,64], index: 5, kind: output, shape index: {}]  }
   0x1   :  { %v562_v0 = vld [vmem:[%s760_s1 + $0x40] sm:$0xff]   ;;  %v564_v2 = vld [vmem:[%s760_s1 + $0x48] sm:$0xff]   ;;  %v566_v4 = vld [vmem:[%s760_s1 + $0x50] sm:$0xff]   ;;  %s594_s19 = smov 16   ;;  %s595_s20 = smov 48   ;;  %vm472_vm4 = vcmask 519168  }
   0x2   :  { %v563_v1 = vld [vmem:[%s760_s1] sm:$0xff]   ;;  %516 = vmatprep.subr.bf16.mxu0 %v562_v0  ;;  %v565_v3 = vld [vmem:[%s760_s1 + $0x8] sm:$0xff]   ;;  %v567_v5 = vld [vmem:[%s760_s1 + $0x10] sm:$0xff]  }
   0x3   :  { %517 = vmatpush3.bf16.msra.mxu0 %v563_v1  ;;  %v568_v6 = vld [vmem:[%s760_s1 + $0x58] sm:$0xff]   ;;  %v570_v8 = vld [vmem:[%s760_s1 + $0x60] sm:$0xff]   ;;  %v572_v11 = vld [vmem:[%s760_s1 + $0x68] sm:$0xff]  }
   0x4   :  { %518 = vmatprep.subr.bf16.mxu0 %v564_v2  ;;  %v569_v7 = vld [vmem:[%s760_s1 + $0x18] sm:$0xff]   ;;  %v571_v9 = vld [vmem:[%s760_s1 + $0x20] sm:$0xff]   ;;  %v573_v12 = vld [vmem:[%s760_s1 + $0x28] sm:$0xff]  }
   0x5   :  { %v577_v10 = vld [vmem:[%s760_s1 + $0x80] sm:$0xff]   ;;  %v574_v13 = vld [vmem:[%s760_s1 + $0x70] sm:$0xff]   ;;  %v582_v15 = vld [vmem:[%s760_s1 + $0x88] sm:$0xff]  }
   0x6   :  { %548 = vmatprep.subr.bf16.mxu1 %v577_v10  ;;  %v581_v14 = vld [vmem:[%s761_s0 + $0x4] ss:$12 sps:$4 sm:$0xff]   ;;  %v583_v16 = vld [vmem:[%s761_s0 + $0x8] ss:$12 sps:$4 sm:$0xff]   ;;  %v584_v17 = vld [vmem:[%s761_s0 + $0x20] ss:$12 sps:$4 sm:$0xff]  }
   0x7   :  { %519 = vmatpush3.bf16.msra.mxu0 %v565_v3  ;;  %549 = vmatpush3.bf16.msra.mxu1 %v577_v10  ;;  %v575_v18 = vld [vmem:[%s760_s1 + $0x30] sm:$0xff]   ;;  %v576_v19 = vld [vmem:[%s760_s1 + $0x78] sm:$0xff]   ;;  %v579_v21 = vld [vmem:[%s761_s0] ss:$12 sps:$4 sm:$0xff]  }
   0x8   :  { %520 = vmatprep.subr.bf16.mxu0 %v566_v4  ;;  %249 = vmatprep.mubr.bf16.mxu0 %v581_v14  ;;  %v578_v20 = vld [vmem:[%s760_s1 + $0x38] sm:$0xff]   ;;  %v481_v30 = vld [vmem:[%s762_s2] ss:$0 sm:$0xff]  ;;  %s591_s2 = smov 112  }
   0x9   :  { %550 = vmatprep.subr.bf16.mxu1 %v582_v15  ;;  %552 = vmatprep.mubr.msk.bf16.mxu1 %vm210_vm0, %v583_v16  ;;  %v585_v22 = vld [vmem:[%s761_s0 + $0x1c] ss:$12 sps:$4 sm:$0xff]   ;;  %v587_v23 = vld [vmem:[%s761_s0 + $0x18] ss:$12 sps:$4 sm:$0xff]   ;;  %s590_s0 = smov 80  }
   0xb   :  { %521 = vmatpush3.bf16.msra.mxu0 %v567_v5  ;;  %551 = vmatpush3.bf16.msra.mxu1 %v582_v15  ;;  %v358_v5 = vlaneseq }
   0xc   :  { %522 = vmatprep.subr.bf16.mxu0 %v568_v6 }
   0xd   :  { %v359_v6 = vshrl.u32 %v358_v5, 7 }
   0xe   :  { %553 = vmatmul.mubr.msk.bf16.vlgmr.msra.gmra.mrb[0].mxu1 %vm210_vm0, %v584_v17 }
   0xf   :  { %523 = vmatpush3.bf16.msra.mxu0 %v569_v7  ;;  %v714_v10 = vsub.s32 0, %v359_v6 }
  0x10   :  { %524 = vmatprep.subr.bf16.mxu0 %v570_v8 }
  0x13   :  { %525 = vmatpush3.bf16.msra.mxu0 %v571_v9 }
  0x14   :  { %526 = vmatprep.subr.bf16.mxu0 %v572_v11 }
  0x17   :  { %527 = vmatpush3.bf16.msra.mxu0 %v573_v12 }
  0x18   :  { %528 = vmatprep.subr.bf16.mxu0 %v574_v13 }
  0x1b   :  { %529 = vmatpush3.bf16.msra.mxu0 %v575_v18 }
  0x1c   :  { %530 = vmatprep.subr.bf16.mxu0 %v576_v19 }
  0x1f   :  { %531 = vmatpush3.bf16.msra.mxu0 %v578_v20 }
  0x22   :  { %250 = vmatmul.mubr.bf16.vlgmr.msra.gmra.mrb[0].mxu0 %v579_v21 }
  0x23   :  { %257 = vmatprep.mubr.bf16.mxu0 %v585_v22 }
  0x2a   :  { %258 = vmatmul.mubr.bf16.gmra.mrb[4].mxu0 %v587_v23 }
  0xe1   :  { %v554_v24 = vpop.f32.mrb[0].mxu1 }
  0xe2   :  { %v300_v25 = vpop.f32.mrb[1].mxu1 }
  0xe3   :  { %v555_v26 = vpop.f32.mrb[2].mxu1 }
  0xe4   :  { %v303_v27 = vpop.f32.mrb[3].mxu1 }
  0xf5   :  { %v532_v28 = vpop.f32.mrb[0].mxu0 }
  0xf6   :  { %v533_v29 = vpop.f32.mrb[1].mxu0 }
  0xf7   :  { %v534_v31 = vadd.f32 %v533_v29, %v532_v28  ;;  %v535_v32 = vpop.f32.mrb[2].mxu0 }
  0xf8   :  { %v536_v33 = vpop.f32.mrb[3].mxu0 }
  0xf9   :  { %v537_v34 = vadd.f32 %v536_v33, %v535_v32  ;;  %v252_v35 = vadd.f32 %v534_v31, %v481_v30 }
  0xfb   :  { %v301_v36 = vadd.f32 %v300_v25, %v252_v35  ;;  %v255_v37 = vadd.f32 %v537_v34, %v481_v30 }
  0xfd   :  { %v304_v38 = vadd.f32 %v303_v27, %v255_v37  ;;  %v538_v39 = vpop.f32.mrb[4].mxu0  ;;  %v316_v47 = vsel %vm315_vm1, %v301_v36, 0.0 }
  0xfe   :  { %v539_v40 = vpop.f32.mrb[5].mxu0 }
  0xff   :  { %v540_v41 = vadd.f32 %v539_v40, %v538_v39  ;;  %v541_v42 = vpop.f32.mrb[6].mxu0  ;;  %v317_v44 = vsel %vm315_vm1, %v304_v38, 0.0 }
 0x100   :  { %v542_v43 = vpop.f32.mrb[7].mxu0  ;;  %v318_v50 = vadd.f32 %v317_v44, %v316_v47 }
 0x101   :  { %v260_v45 = vadd.f32 %v540_v41, %v481_v30  ;;  %v543_v46 = vadd.f32 %v542_v43, %v541_v42 }
 0x103   :  { %v309_v48 = vadd.f32 %v554_v24, %v260_v45  ;;  %v263_v49 = vadd.f32 %v543_v46, %v481_v30  ;;  %v397_v46 = vld [vmem:[%s764_s3] sm:$0x1] }
 0x105   :  { %v319_v51 = vsel %vm315_vm1, %v309_v48, 0.0  ;;  %v312_v52 = vadd.f32 %v555_v26, %v263_v49 }
 0x106   :  { %v320_v53 = vadd.f32 %v319_v51, %v318_v50 }
 0x107   :  { %v321_v54 = vsel %vm315_vm1, %v312_v52, 0.0 }
 0x108   :  { %v322_v55 = vadd.f32 %v321_v54, %v320_v53 }
 0x10a   :  { %v323_v56 = vrot.slane %v322_v55, 4 }
 0x10c   :  { %v324_v57 = vadd.f32 %v323_v56, %v322_v55 }
 0x10e   :  { %v325_v58 = vrot.slane %v324_v57, 2 }
 0x110   :  { %v326_v59 = vadd.f32 %v325_v58, %v324_v57 }
 0x112   :  { %v327_v60 = vrot.slane %v326_v59, 1 }
 0x114   :  { %v328_v61 = vadd.f32 %v327_v60, %v326_v59 }
 0x116   :  { %338 = vrot.lane.b32.xlu1 %v328_v61, %s590_s0  ;;  %330 = vrot.lane.b32.xlu0 %v328_v61, %s591_s2 }
 0x11a   :  { %334 = vrot.lane.b32.xlu0 %v328_v61, %s592_s17 }
 0x188   :  { %v331_v62 = vpop.permute.xlu0 %330  ;;  %v339_v2 = vpop.permute.xlu1 %338 }
 0x189   :  { %v333_v63 = vadd.f32 %v331_v62, %v328_v61 }
 0x18c   :  { %v335_v0 = vpop.permute.xlu0 %334 }
 0x18d   :  { %v337_v1 = vadd.f32 %v335_v0, %v333_v63 }
 0x18f   :  { %v341_v3 = vadd.f32 %v339_v2, %v337_v1 }
 0x191   :  { %v342_v4 = vmul.f32 0.0078125, %v341_v3 }
 0x193   :  { %347 = vrot.lane.b32.xlu0 %v342_v4, %s593_s18  ;;  %344 = vrot.lane.b32.xlu1 %v342_v4, %s594_s19 }
 0x197   :  { %350 = vrot.lane.b32.xlu1 %v342_v4, %s595_s20 }
 0x205   :  { %v345_v7 = vpop.permute.xlu1 %344  ;;  %v348_v8 = vpop.permute.xlu0 %347 }
 0x206   :  { %v354_v9 = vsel %vm353_vm2, %v342_v4, %v345_v7 }
 0x207   :  { %v355_v11 = vsel %vm210_vm0, %v354_v9, %v348_v8 }
 0x209   :  { %v351_v12 = vpop.permute.xlu1 %350 }
 0x20a   :  { %v357_v13 = vsel %vm356_vm3, %v355_v11, %v351_v12 }
 0x20b   :  { %v361_v14 = vrot.slane %v357_v13, %v714_v10 }
 0x20d   :  { %v362_v15 = vsub.f32 %v301_v36, %v361_v14  ;;  %v363_v16 = vsub.f32 %v304_v38, %v361_v14  ;;  %v364_v17 = vsub.f32 %v309_v48, %v361_v14  ;;  %v365_v18 = vsub.f32 %v312_v52, %v361_v14  ;;  %v426_v36 = vld [vmem:[%s763_s4] sm:$0x1] }
 0x20e   :  { %v431_v37 = vrot.slane %v426_v36, %v714_v10 }
 0x20f   :  { %v366_v19 = vmul.f32 %v362_v15, %v362_v15  ;;  %v367_v20 = vmul.f32 %v363_v16, %v363_v16  ;;  %v368_v21 = vmul.f32 %v364_v17, %v364_v17  ;;  %v369_v22 = vmul.f32 %v365_v18, %v365_v18 }
 0x211   :  { %v370_v23 = vsel %vm315_vm1, %v366_v19, 0.0  ;;  %v371_v24 = vsel %vm315_vm1, %v367_v20, 0.0  ;;  %v373_v26 = vsel %vm315_vm1, %v368_v21, 0.0  ;;  %v375_v28 = vsel %vm315_vm1, %v369_v22, 0.0 }
 0x212   :  { %v372_v25 = vadd.f32 %v371_v24, %v370_v23 }
 0x214   :  { %v374_v27 = vadd.f32 %v373_v26, %v372_v25 }
 0x216   :  { %v376_v29 = vadd.f32 %v375_v28, %v374_v27 }
 0x218   :  { %v377_v30 = vrot.slane %v376_v29, 4 }
 0x21a   :  { %v378_v31 = vadd.f32 %v377_v30, %v376_v29 }
 0x21c   :  { %v379_v32 = vrot.slane %v378_v31, 2 }
 0x21e   :  { %v380_v33 = vadd.f32 %v379_v32, %v378_v31 }
 0x220   :  { %v381_v34 = vrot.slane %v380_v33, 1 }
 0x222   :  { %v382_v35 = vadd.f32 %v381_v34, %v380_v33 }
 0x224   :  { %388 = vrot.lane.b32.xlu1 %v382_v35, %s592_s17  ;;  %384 = vrot.lane.b32.xlu0 %v382_v35, %s591_s2 }
 0x228   :  { %392 = vrot.lane.b32.xlu0 %v382_v35, %s590_s0 }
 0x22c   :  { %432 = vrot.lane.b32.xlu0 %v431_v37, %s594_s19 }
 0x296   :  { %v385_v38 = vpop.permute.xlu0 %384  ;;  %v389_v40 = vpop.permute.xlu1 %388 }
 0x297   :  { %v387_v39 = vadd.f32 %v385_v38, %v382_v35 }
 0x299   :  { %v391_v41 = vadd.f32 %v389_v40, %v387_v39 }
 0x29a   :  { %v393_v42 = vpop.permute.xlu0 %392 }
 0x29b   :  { %v395_v43 = vadd.f32 %v393_v42, %v391_v41 }
 0x29d   :  { %v396_v44 = vmul.f32 0.0078125, %v395_v43 }
 0x29e   :  { %v433_v50 = vpop.permute.xlu0 %432 }
 0x29f   :  { %v398_v45 = vadd.f32 1e-05, %v396_v44  ;;  %v441_v59 = vsel %vm353_vm2, %v426_v36, %v433_v50 }
 0x2a1   :  { %588 = vrsqrt.f32 %v398_v45 }
 0x2ab   :  { %v589_v47 = vpop.eup %588 }
 0x2ac   :  { %v400_v48 = vmul.f32 %v589_v47, %v397_v46 }
 0x2ae   :  { %v405_v49 = vrot.slane %v400_v48, %v714_v10 }
 0x2b0   :  { %409 = vrot.lane.b32.xlu0 %v405_v49, %s593_s18  ;;  %406 = vrot.lane.b32.xlu1 %v405_v49, %s594_s19 }
 0x2b4   :  { %412 = vrot.lane.b32.xlu1 %v405_v49, %s595_s20  ;;  %438 = vrot.lane.b32.xlu0 %v431_v37, %s595_s20 }
 0x2b8   :  { %435 = vrot.lane.b32.xlu1 %v431_v37, %s593_s18 }
 0x322   :  { %v407_v51 = vpop.permute.xlu1 %406  ;;  %v410_v53 = vpop.permute.xlu0 %409 }
 0x323   :  { %v415_v52 = vsel %vm353_vm2, %v400_v48, %v407_v51 }
 0x324   :  { %v416_v54 = vsel %vm210_vm0, %v415_v52, %v410_v53 }
 0x326   :  { %v413_v55 = vpop.permute.xlu1 %412  ;;  %v439_v58 = vpop.permute.xlu0 %438 }
 0x327   :  { %v417_v56 = vsel %vm356_vm3, %v416_v54, %v413_v55 }
 0x328   :  { %v421_v57 = vrot.slane %v417_v56, %v714_v10 }
 0x32a   :  { %v436_v60 = vpop.permute.xlu1 %435  ;;  %v422_v62 = vmul.f32 %v421_v57, %v362_v15  ;;  %v423_v0 = vmul.f32 %v421_v57, %v363_v16  ;;  %v424_v1 = vmul.f32 %v421_v57, %v364_v17  ;;  %v425_v2 = vmul.f32 %v421_v57, %v365_v18 }
 0x32b   :  { %v442_v61 = vsel %vm210_vm0, %v441_v59, %v436_v60 }
 0x32c   :  { %v443_v63 = vsel %vm356_vm3, %v442_v61, %v439_v58 }
 0x32d   :  { %v447_v3 = vrot.slane %v443_v63, %v714_v10 }
 0x32f   :  { %v448_v4 = vadd.f32 %v447_v3, %v422_v62  ;;  %v449_v5 = vadd.f32 %v447_v3, %v423_v0  ;;  %v450_v6 = vadd.f32 %v447_v3, %v424_v1  ;;  %v451_v7 = vadd.f32 %v447_v3, %v425_v2 }
 0x331   :  { %v452_v8 = vmax.f32 %v448_v4, 0.0  ;;  %v453_v9 = vmax.f32 %v449_v5, 0.0  ;;  %v454_v11 = vmax.f32 %v450_v6, 0.0  ;;  %v455_v12 = vmax.f32 %v451_v7, 0.0 }
 0x333   :  { %v512_v13 = vpack.c.bf16 %v452_v8, %v452_v8  ;;  %v513_v14 = vpack.c.bf16 %v453_v9, %v453_v9  ;;  %v514_v19 = vpack.c.bf16 %v454_v11, %v454_v11  ;;  %v515_v15 = vpack.c.bf16 %v455_v12, %v455_v12 }
 0x335   :  { %473 = vst.msk [vmem:[%s765_s5] sm:$0xf] %vm472_vm4, %v512_v13  ;;  %474 = vst.msk [vmem:[%s765_s5 + $0x4] sm:$0xf] %vm472_vm4, %v513_v14 }
 0x336   :  { %475 = vst.msk [vmem:[%s765_s5 + $0x8] sm:$0xf] %vm472_vm4, %v514_v19  ;;  %476 = vst.msk [vmem:[%s765_s5 + $0xc] sm:$0xf] %vm472_vm4, %v515_v15 }

// kernel: vae_forward.12
= control target key start
LH: loop header
LB: loop body
LE: loop exit
PB: predicated region body
PF: predicated region fallthrough
CT: control target
= control target key end

     0   :  { %v770_v0 = vmov 0   ;;  %vm188_vm0 = vcmask 130048   ;;  %vm310_vm1 = vcmask 261120   ;;  %s773_s19 = smov 112   ;;  %s774_s20 = smov 16   ;;  %vm372_vm2 = vcmask 64512   ;;  %s1188_s1 = inlined_call_operand.vmem [shape: bf16[144,32], index: 1, kind: input, shape index: {}]   ;;  %s1189_s0 = inlined_call_operand.vmem [shape: bf16[128,144], index: 0, kind: input, shape index: {}]   ;;  %s1190_s2 = inlined_call_operand.vmem [shape: f32[1,32], index: 2, kind: input, shape index: {}]   ;;  %s1191_s4 = inlined_call_operand.vmem [shape: f32[1,8], index: 4, kind: input, shape index: {}]   ;;  %s1192_s3 = inlined_call_operand.vmem [shape: f32[1,8], index: 3, kind: input, shape index: {}]   ;;  %s1193_s5 = inlined_call_operand.vmem [shape: bf16[128,32], index: 5, kind: output, shape index: {}]  }
   0x1   :  { %213 = vmatprep.subr.bf16.mxu0 %v770_v0  ;;  %v735_v1 = vld [vmem:[%s1188_s1] sm:$0xff]   ;;  %710 = vmatprep.subr.bf16.mxu1 %v770_v0  ;;  %v736_v2 = vld [vmem:[%s1188_s1 + $0x8] sm:$0xff]   ;;  %v737_v3 = vld [vmem:[%s1188_s1 + $0x10] sm:$0xff]   ;;  %s775_s21 = smov 8   ;;  %s776_s22 = smov 24   ;;  %vm375_vm3 = vcmask 195584  }
   0x2   :  { %214 = vmatpush1.bf16.msra.mxu0 %v735_v1  ;;  %719 = vmatpush1.bf16.msra.mxu1 %v735_v1  ;;  %v738_v4 = vld [vmem:[%s1188_s1 + $0x18] sm:$0xff]   ;;  %v746_v5 = vld [vmem:[%s1189_s0 + $0x4] ss:$8 sps:$4 sm:$0xff]   ;;  %v741_v9 = vld [vmem:[%s1188_s1 + $0x30] sm:$0xff]   ;;  %vm623_vm4 = vcmask 257024  }
   0x3   :  { %215 = vmatprep.subr.bf16.mxu0 %v770_v0  ;;  %711 = vmatprep.subr.bf16.mxu1 %v770_v0  ;;  %v752_v6 = vld [vmem:[%s1189_s0 + $0x44] ss:$8 sps:$4 sm:$0xff]   ;;  %v742_v10 = vld [vmem:[%s1188_s1 + $0x38] sm:$0xff]   ;;  %v744_v12 = vld [vmem:[%s1189_s0] ss:$8 sps:$4 sm:$0xff]  }
   0x4   :  { %670 = vmatprep.mubr.msk.bf16.mxu0 %vm188_vm0, %v746_v5  ;;  %v739_v7 = vld [vmem:[%s1188_s1 + $0x20] sm:$0xff]   ;;  %674 = vmatprep.mubr.msk.bf16.mxu1 %vm188_vm0, %v752_v6  ;;  %v740_v8 = vld [vmem:[%s1188_s1 + $0x28] sm:$0xff]   ;;  %v747_v14 = vld [vmem:[%s1189_s0 + $0x14] ss:$8 sps:$4 sm:$0xff]  }
   0x5   :  { %v743_v11 = vld [vmem:[%s1188_s1 + $0x40] sm:$0xff]   ;;  %v756_v15 = vld [vmem:[%s1189_s0 + $0x54] ss:$8 sps:$4 sm:$0xff]   ;;  %v749_v16 = vld [vmem:[%s1189_s0 + $0x10] ss:$8 sps:$4 sm:$0xff]  }
   0x6   :  { %216 = vmatpush1.bf16.msra.mxu0 %v736_v2  ;;  %720 = vmatpush1.bf16.msra.mxu1 %v736_v2  ;;  %v750_v13 = vld [vmem:[%s1189_s0 + $0x40] ss:$8 sps:$4 sm:$0xff]   ;;  %v758_v17 = vld [vmem:[%s1189_s0 + $0x50] ss:$8 sps:$4 sm:$0xff]   ;;  %v753_v18 = vld [vmem:[%s1189_s0 + $0x24] ss:$8 sps:$4 sm:$0xff]  }
   0x7   :  { %217 = vmatprep.subr.bf16.mxu0 %v770_v0  ;;  %712 = vmatprep.subr.bf16.mxu1 %v770_v0  ;;  %v762_v19 = vld [vmem:[%s1189_s0 + $0x64] ss:$8 sps:$4 sm:$0xff]   ;;  %v755_v20 = vld [vmem:[%s1189_s0 + $0x20] ss:$8 sps:$4 sm:$0xff]   ;;  %v759_v22 = vld [vmem:[%s1189_s0 + $0x34] ss:$8 sps:$4 sm:$0xff]  }
   0x8   :  { %v764_v21 = vld [vmem:[%s1189_s0 + $0x60] ss:$8 sps:$4 sm:$0xff]   ;;  %v765_v23 = vld [vmem:[%s1189_s0 + $0x74] ss:$8 sps:$4 sm:$0xff]   ;;  %v761_v24 = vld [vmem:[%s1189_s0 + $0x30] ss:$8 sps:$4 sm:$0xff]  }
   0x9   :  { %v767_v25 = vld [vmem:[%s1189_s0 + $0x70] ss:$8 sps:$4 sm:$0xff]   ;;  %v893_v34 = vld [vmem:[%s1190_s2] ss:$0 sm:$0xff]  ;;  %s771_s0 = smov 104   ;;  %s772_s2 = smov 120  }
   0xa   :  { %218 = vmatpush1.bf16.msra.mxu0 %v737_v3  ;;  %721 = vmatpush1.bf16.msra.mxu1 %v737_v3 }
   0xb   :  { %219 = vmatprep.subr.bf16.mxu0 %v770_v0  ;;  %713 = vmatprep.subr.bf16.mxu1 %v770_v0 }
   0xe   :  { %220 = vmatpush1.bf16.msra.mxu0 %v738_v4  ;;  %722 = vmatpush1.bf16.msra.mxu1 %v738_v4 }
   0xf   :  { %221 = vmatprep.subr.bf16.mxu0 %v770_v0  ;;  %714 = vmatprep.subr.bf16.mxu1 %v770_v0 }
  0x12   :  { %222 = vmatpush1.bf16.msra.mxu0 %v739_v7  ;;  %723 = vmatpush1.bf16.msra.mxu1 %v739_v7 }
  0x13   :  { %223 = vmatprep.subr.bf16.mxu0 %v770_v0  ;;  %715 = vmatprep.subr.bf16.mxu1 %v770_v0 }
  0x16   :  { %224 = vmatpush1.bf16.msra.mxu0 %v740_v8  ;;  %724 = vmatpush1.bf16.msra.mxu1 %v740_v8 }
  0x17   :  { %225 = vmatprep.subr.bf16.mxu0 %v770_v0  ;;  %716 = vmatprep.subr.bf16.mxu1 %v770_v0 }
  0x1a   :  { %226 = vmatpush1.bf16.msra.mxu0 %v741_v9  ;;  %725 = vmatpush1.bf16.msra.mxu1 %v741_v9 }
  0x1b   :  { %227 = vmatprep.subr.bf16.mxu0 %v770_v0  ;;  %717 = vmatprep.subr.bf16.mxu1 %v770_v0 }
  0x1e   :  { %228 = vmatpush1.bf16.msra.mxu0 %v742_v10  ;;  %726 = vmatpush1.bf16.msra.mxu1 %v742_v10 }
  0x1f   :  { %229 = vmatprep.subr.bf16.mxu0 %v770_v0  ;;  %718 = vmatprep.subr.bf16.mxu1 %v770_v0 }
  0x22   :  { %230 = vmatpush1.bf16.msra.mxu0 %v743_v11  ;;  %727 = vmatpush1.bf16.msra.mxu1 %v743_v11 }
  0x25   :  { %246 = vmatmul.mubr.bf16.vlgmr.msra.gmra.mrb[0].mxu0 %v744_v12  ;;  %278 = vmatmul.mubr.bf16.vlgmr.msra.gmra.mrb[0].mxu1 %v750_v13 }
  0x26   :  { %671 = vmatprep.mubr.msk.bf16.mxu0 %vm188_vm0, %v747_v14  ;;  %675 = vmatprep.mubr.msk.bf16.mxu1 %vm188_vm0, %v756_v15 }
  0x2d   :  { %254 = vmatmul.mubr.bf16.gmra.mrb[4].mxu0 %v749_v16  ;;  %286 = vmatmul.mubr.bf16.gmra.mrb[4].mxu1 %v758_v17 }
  0x2e   :  { %672 = vmatprep.mubr.msk.bf16.mxu0 %vm188_vm0, %v753_v18  ;;  %676 = vmatprep.mubr.msk.bf16.mxu1 %vm188_vm0, %v762_v19 }
  0x35   :  { %262 = vmatmul.mubr.bf16.gmra.mrb[8].mxu0 %v755_v20  ;;  %294 = vmatmul.mubr.bf16.gmra.mrb[8].mxu1 %v764_v21 }
  0x36   :  { %673 = vmatprep.mubr.msk.bf16.mxu0 %vm188_vm0, %v759_v22  ;;  %677 = vmatprep.mubr.msk.bf16.mxu1 %vm188_vm0, %v765_v23 }
  0x3d   :  { %270 = vmatmul.mubr.bf16.gmra.mrb[12].mxu0 %v761_v24  ;;  %302 = vmatmul.mubr.bf16.gmra.mrb[12].mxu1 %v767_v25 }
  0xf8   :  { %v247_v26 = vpop.f32.mrb[0].mxu0  ;;  %v279_v27 = vpop.f32.mrb[0].mxu1 }
  0xf9   :  { %v249_v28 = vpop.f32.mrb[1].mxu0  ;;  %v281_v29 = vpop.f32.mrb[1].mxu1  ;;  %v899_v38 = vadd.f32 %v893_v34, %v247_v26  ;;  %v929_v11 = vadd.f32 %v893_v34, %v279_v27 }
  0xfa   :  { %v250_v30 = vpop.f32.mrb[2].mxu0  ;;  %v282_v31 = vpop.f32.mrb[2].mxu1 }
  0xfb   :  { %v252_v32 = vpop.f32.mrb[3].mxu0  ;;  %v284_v33 = vpop.f32.mrb[3].mxu1  ;;  %v896_v35 = vadd.f32 %v893_v34, %v250_v30  ;;  %v311_v47 = vsel %vm310_vm1, %v899_v38, 0.0  ;;  %v937_v17 = vadd.f32 %v893_v34, %v282_v31  ;;  %v326_v20 = vsel %vm310_vm1, %v929_v11, 0.0 }
  0xfd   :  { %v312_v44 = vsel %vm310_vm1, %v896_v35, 0.0  ;;  %v328_v23 = vsel %vm310_vm1, %v937_v17, 0.0 }
  0xfe   :  { %v313_v50 = vadd.f32 %v312_v44, %v311_v47 }
 0x100   :  { %v255_v36 = vpop.f32.mrb[4].mxu0  ;;  %v287_v37 = vpop.f32.mrb[4].mxu1 }
 0x101   :  { %v902_v39 = vadd.f32 %v893_v34, %v255_v36  ;;  %v257_v40 = vpop.f32.mrb[5].mxu0  ;;  %v289_v41 = vpop.f32.mrb[5].mxu1  ;;  %v944_v21 = vadd.f32 %v893_v34, %v287_v37 }
 0x102   :  { %v258_v42 = vpop.f32.mrb[6].mxu0  ;;  %v290_v43 = vpop.f32.mrb[6].mxu1 }
 0x103   :  { %v260_v45 = vpop.f32.mrb[7].mxu0  ;;  %v292_v46 = vpop.f32.mrb[7].mxu1  ;;  %v314_v48 = vsel %vm310_vm1, %v902_v39, 0.0  ;;  %v911_v49 = vadd.f32 %v893_v34, %v258_v42  ;;  %v949_v24 = vadd.f32 %v893_v34, %v290_v43  ;;  %v330_v26 = vsel %vm310_vm1, %v944_v21, 0.0 }
 0x104   :  { %v315_v51 = vadd.f32 %v314_v48, %v313_v50 }
 0x105   :  { %v316_v54 = vsel %vm310_vm1, %v911_v49, 0.0  ;;  %v332_v29 = vsel %vm310_vm1, %v949_v24, 0.0 }
 0x106   :  { %v317_v0 = vadd.f32 %v316_v54, %v315_v51 }
 0x108   :  { %v263_v52 = vpop.f32.mrb[8].mxu0  ;;  %v295_v53 = vpop.f32.mrb[8].mxu1 }
 0x109   :  { %v916_v55 = vadd.f32 %v893_v34, %v263_v52  ;;  %v265_v56 = vpop.f32.mrb[9].mxu0  ;;  %v297_v57 = vpop.f32.mrb[9].mxu1  ;;  %v954_v27 = vadd.f32 %v893_v34, %v295_v53 }
 0x10a   :  { %v266_v58 = vpop.f32.mrb[10].mxu0  ;;  %v298_v59 = vpop.f32.mrb[10].mxu1 }
 0x10b   :  { %v318_v60 = vsel %vm310_vm1, %v916_v55, 0.0  ;;  %v921_v61 = vadd.f32 %v893_v34, %v266_v58  ;;  %v268_v62 = vpop.f32.mrb[11].mxu0  ;;  %v300_v63 = vpop.f32.mrb[11].mxu1  ;;  %v959_v30 = vadd.f32 %v893_v34, %v298_v59  ;;  %v334_v33 = vsel %vm310_vm1, %v954_v27, 0.0 }
 0x10c   :  { %v319_v1 = vadd.f32 %v318_v60, %v317_v0  ;;  %v377_v60 = vlaneseq }
 0x10d   :  { %v320_v2 = vsel %vm310_vm1, %v921_v61, 0.0  ;;  %v336_v37 = vsel %vm310_vm1, %v959_v30, 0.0 }
 0x10e   :  { %v321_v8 = vadd.f32 %v320_v2, %v319_v1  ;;  %v378_v62 = vshrl.u32 %v377_v60, 7 }
 0x110   :  { %v271_v3 = vpop.f32.mrb[12].mxu0  ;;  %v303_v4 = vpop.f32.mrb[12].mxu1  ;;  %v982_v2 = vsub.s32 0, %v378_v62 }
 0x111   :  { %v926_v5 = vadd.f32 %v893_v34, %v271_v3  ;;  %v273_v6 = vpop.f32.mrb[13].mxu0  ;;  %v305_v7 = vpop.f32.mrb[13].mxu1  ;;  %v962_v31 = vadd.f32 %v893_v34, %v303_v4 }
 0x112   :  { %v274_v9 = vpop.f32.mrb[14].mxu0  ;;  %v306_v10 = vpop.f32.mrb[14].mxu1 }
 0x113   :  { %v322_v12 = vsel %vm310_vm1, %v926_v5, 0.0  ;;  %v934_v13 = vadd.f32 %v893_v34, %v274_v9  ;;  %v276_v14 = vpop.f32.mrb[15].mxu0  ;;  %v308_v15 = vpop.f32.mrb[15].mxu1  ;;  %v338_v40 = vsel %vm310_vm1, %v962_v31, 0.0  ;;  %v971_v41 = vadd.f32 %v893_v34, %v306_v10 }
 0x114   :  { %v323_v16 = vadd.f32 %v322_v12, %v321_v8 }
 0x115   :  { %v324_v18 = vsel %vm310_vm1, %v934_v13, 0.0  ;;  %v340_v44 = vsel %vm310_vm1, %v971_v41, 0.0 }
 0x116   :  { %v325_v19 = vadd.f32 %v324_v18, %v323_v16 }
 0x118   :  { %v327_v22 = vadd.f32 %v326_v20, %v325_v19 }
 0x11a   :  { %v329_v25 = vadd.f32 %v328_v23, %v327_v22 }
 0x11c   :  { %v331_v28 = vadd.f32 %v330_v26, %v329_v25 }
 0x11e   :  { %v333_v32 = vadd.f32 %v332_v29, %v331_v28 }
 0x120   :  { %v335_v36 = vadd.f32 %v334_v33, %v333_v32 }
 0x122   :  { %v337_v42 = vadd.f32 %v336_v37, %v335_v36 }
 0x124   :  { %v339_v43 = vadd.f32 %v338_v40, %v337_v42 }
 0x126   :  { %v341_v45 = vadd.f32 %v340_v44, %v339_v43 }
 0x128   :  { %v342_v46 = vrot.slane %v341_v45, 4 }
 0x12a   :  { %v343_v47 = vadd.f32 %v342_v46, %v341_v45 }
 0x12c   :  { %v344_v48 = vrot.slane %v343_v47, 2 }
 0x12e   :  { %v345_v50 = vadd.f32 %v344_v48, %v343_v47 }
 0x130   :  { %v346_v51 = vrot.slane %v345_v50, 1 }
 0x132   :  { %v347_v52 = vadd.f32 %v346_v51, %v345_v50 }
 0x134   :  { %357 = vrot.lane.b32.xlu1 %v347_v52, %s771_s0  ;;  %349 = vrot.lane.b32.xlu0 %v347_v52, %s772_s2 }
 0x138   :  { %353 = vrot.lane.b32.xlu0 %v347_v52, %s773_s19 }
 0x1a6   :  { %v350_v34 = vpop.permute.xlu0 %349  ;;  %v358_v57 = vpop.permute.xlu1 %357 }
 0x1a7   :  { %v352_v53 = vadd.f32 %v350_v34, %v347_v52 }
 0x1aa   :  { %v354_v54 = vpop.permute.xlu0 %353 }
 0x1ab   :  { %v356_v56 = vadd.f32 %v354_v54, %v352_v53 }
 0x1ad   :  { %v360_v58 = vadd.f32 %v358_v57, %v356_v56 }
 0x1af   :  { %v361_v59 = vmul.f32 0.001953125, %v360_v58 }
 0x1b1   :  { %366 = vrot.lane.b32.xlu0 %v361_v59, %s774_s20  ;;  %363 = vrot.lane.b32.xlu1 %v361_v59, %s775_s21 }
 0x1b5   :  { %369 = vrot.lane.b32.xlu1 %v361_v59, %s776_s22 }
 0x223   :  { %v364_v63 = vpop.permute.xlu1 %363  ;;  %v367_v0 = vpop.permute.xlu0 %366 }
 0x224   :  { %v373_v1 = vsel %vm372_vm2, %v361_v59, %v364_v63 }
 0x225   :  { %v374_v3 = vsel %vm188_vm0, %v373_v1, %v367_v0 }
 0x227   :  { %v370_v4 = vpop.permute.xlu1 %369 }
 0x228   :  { %v376_v6 = vsel %vm375_vm3, %v374_v3, %v370_v4 }
 0x229   :  { %v380_v7 = vrot.slane %v376_v6, %v982_v2 }
 0x22b   :  { %v988_v8 = vsub.f32 %v899_v38, %v380_v7  ;;  %v991_v9 = vsub.f32 %v896_v35, %v380_v7  ;;  %v994_v10 = vsub.f32 %v902_v39, %v380_v7  ;;  %v997_v12 = vsub.f32 %v911_v49, %v380_v7 }
 0x22c   :  { %v1004_v16 = vsub.f32 %v916_v55, %v380_v7  ;;  %v1009_v35 = vsub.f32 %v921_v61, %v380_v7  ;;  %v1016_v20 = vsub.f32 %v926_v5, %v380_v7  ;;  %v1022_v61 = vsub.f32 %v934_v13, %v380_v7 }
 0x22d   :  { %v397_v14 = vmul.f32 %v988_v8, %v988_v8  ;;  %v398_v15 = vmul.f32 %v991_v9, %v991_v9  ;;  %v399_v38 = vmul.f32 %v994_v10, %v994_v10  ;;  %v400_v39 = vmul.f32 %v997_v12, %v997_v12 }
 0x22e   :  { %v401_v55 = vmul.f32 %v1004_v16, %v1004_v16  ;;  %v402_v25 = vmul.f32 %v1009_v35, %v1009_v35  ;;  %v1028_v29 = vsub.f32 %v929_v11, %v380_v7  ;;  %v403_v5 = vmul.f32 %v1016_v20, %v1016_v20 }
 0x22f   :  { %v413_v49 = vsel %vm310_vm1, %v397_v14, 0.0  ;;  %v414_v18 = vsel %vm310_vm1, %v398_v15, 0.0  ;;  %v416_v22 = vsel %vm310_vm1, %v399_v38, 0.0  ;;  %v418_v26 = vsel %vm310_vm1, %v400_v39, 0.0 }
 0x230   :  { %v415_v19 = vadd.f32 %v414_v18, %v413_v49  ;;  %v420_v32 = vsel %vm310_vm1, %v401_v55, 0.0  ;;  %v1034_v36 = vsub.f32 %v937_v17, %v380_v7  ;;  %v404_v13 = vmul.f32 %v1022_v61, %v1022_v61 }
 0x231   :  { %v422_v37 = vsel %vm310_vm1, %v402_v25, 0.0  ;;  %v1040_v42 = vsub.f32 %v944_v21, %v380_v7  ;;  %v405_v11 = vmul.f32 %v1028_v29, %v1028_v29  ;;  %v424_v43 = vsel %vm310_vm1, %v403_v5, 0.0 }
 0x232   :  { %v417_v23 = vadd.f32 %v416_v22, %v415_v19  ;;  %v1046_v45 = vsub.f32 %v949_v24, %v380_v7  ;;  %v406_v17 = vmul.f32 %v1034_v36, %v1034_v36  ;;  %v426_v46 = vsel %vm310_vm1, %v404_v13, 0.0  ;;  %v505_v19 = vld [vmem:[%s1191_s4] sm:$0x1] }
 0x233   :  { %v1052_v48 = vsub.f32 %v954_v27, %v380_v7  ;;  %v407_v21 = vmul.f32 %v1040_v42, %v1040_v42  ;;  %v428_v50 = vsel %vm310_vm1, %v405_v11, 0.0  ;;  %v1058_v52 = vsub.f32 %v959_v30, %v380_v7  ;;  %v464_v13 = vld [vmem:[%s1192_s3] sm:$0x1] }
 0x234   :  { %v419_v28 = vadd.f32 %v418_v26, %v417_v23  ;;  %v408_v24 = vmul.f32 %v1046_v45, %v1046_v45  ;;  %v430_v34 = vsel %vm310_vm1, %v406_v17, 0.0  ;;  %v1064_v54 = vsub.f32 %v962_v31, %v380_v7 }
 0x235   :  { %v409_v27 = vmul.f32 %v1052_v48, %v1052_v48  ;;  %v432_v56 = vsel %vm310_vm1, %v407_v21, 0.0  ;;  %v1070_v58 = vsub.f32 %v971_v41, %v380_v7  ;;  %v410_v30 = vmul.f32 %v1058_v52, %v1058_v52 }
 0x236   :  { %v421_v33 = vadd.f32 %v420_v32, %v419_v28  ;;  %v434_v59 = vsel %vm310_vm1, %v408_v24, 0.0  ;;  %v411_v62 = vmul.f32 %v1064_v54, %v1064_v54  ;;  %v510_v55 = vrot.slane %v505_v19, %v982_v2 }
 0x237   :  { %v436_v31 = vsel %vm310_vm1, %v409_v27, 0.0  ;;  %v412_v0 = vmul.f32 %v1070_v58, %v1070_v58  ;;  %v438_v1 = vsel %vm310_vm1, %v410_v30, 0.0 }
 0x238   :  { %v423_v40 = vadd.f32 %v422_v37, %v421_v33  ;;  %v440_v41 = vsel %vm310_vm1, %v411_v62, 0.0 }
 0x239   :  { %v442_v6 = vsel %vm310_vm1, %v412_v0, 0.0 }
 0x23a   :  { %v425_v44 = vadd.f32 %v424_v43, %v423_v40 }
 0x23c   :  { %v427_v47 = vadd.f32 %v426_v46, %v425_v44 }
 0x23e   :  { %v429_v51 = vadd.f32 %v428_v50, %v427_v47 }
 0x240   :  { %v431_v53 = vadd.f32 %v430_v34, %v429_v51 }
 0x242   :  { %v433_v57 = vadd.f32 %v432_v56, %v431_v53 }
 0x244   :  { %v435_v60 = vadd.f32 %v434_v59, %v433_v57 }
 0x246   :  { %v437_v63 = vadd.f32 %v436_v31, %v435_v60 }
 0x248   :  { %v439_v3 = vadd.f32 %v438_v1, %v437_v63 }
 0x24a   :  { %v441_v4 = vadd.f32 %v440_v41, %v439_v3 }
 0x24c   :  { %v443_v7 = vadd.f32 %v442_v6, %v441_v4 }
 0x24e   :  { %v444_v14 = vrot.slane %v443_v7, 4 }
 0x250   :  { %v445_v15 = vadd.f32 %v444_v14, %v443_v7 }
 0x252   :  { %v446_v38 = vrot.slane %v445_v15, 2 }
 0x254   :  { %v447_v39 = vadd.f32 %v446_v38, %v445_v15 }
 0x256   :  { %v448_v49 = vrot.slane %v447_v39, 1 }
 0x258   :  { %v449_v18 = vadd.f32 %v448_v49, %v447_v39 }
 0x25a   :  { %455 = vrot.lane.b32.xlu1 %v449_v18, %s773_s19  ;;  %451 = vrot.lane.b32.xlu0 %v449_v18, %s772_s2 }
 0x25e   :  { %459 = vrot.lane.b32.xlu0 %v449_v18, %s771_s0 }
 0x262   :  { %511 = vrot.lane.b32.xlu0 %v510_v55, %s775_s21 }
 0x2cc   :  { %v452_v22 = vpop.permute.xlu0 %451  ;;  %v456_v25 = vpop.permute.xlu1 %455 }
 0x2cd   :  { %v454_v23 = vadd.f32 %v452_v22, %v449_v18 }
 0x2cf   :  { %v458_v26 = vadd.f32 %v456_v25, %v454_v23 }
 0x2d0   :  { %v460_v28 = vpop.permute.xlu0 %459 }
 0x2d1   :  { %v462_v5 = vadd.f32 %v460_v28, %v458_v26 }
 0x2d3   :  { %v463_v32 = vmul.f32 0.001953125, %v462_v5 }
 0x2d4   :  { %v512_v43 = vpop.permute.xlu0 %511 }
 0x2d5   :  { %v465_v33 = vadd.f32 1e-05, %v463_v32  ;;  %v520_v53 = vsel %vm372_vm2, %v505_v19, %v512_v43 }
 0x2d7   :  { %768 = vrsqrt.f32 %v465_v33 }
 0x2e1   :  { %v769_v37 = vpop.eup %768 }
 0x2e2   :  { %v467_v40 = vmul.f32 %v769_v37, %v464_v13 }
 0x2e4   :  { %v472_v11 = vrot.slane %v467_v40, %v982_v2 }
 0x2e6   :  { %476 = vrot.lane.b32.xlu0 %v472_v11, %s774_s20  ;;  %473 = vrot.lane.b32.xlu1 %v472_v11, %s775_s21 }
 0x2ea   :  { %479 = vrot.lane.b32.xlu1 %v472_v11, %s776_s22  ;;  %517 = vrot.lane.b32.xlu0 %v510_v55, %s776_s22 }
 0x2ee   :  { %514 = vrot.lane.b32.xlu1 %v510_v55, %s774_s20 }
 0x358   :  { %v474_v44 = vpop.permute.xlu1 %473  ;;  %v477_v46 = vpop.permute.xlu0 %476 }
 0x359   :  { %v482_v17 = vsel %vm372_vm2, %v467_v40, %v474_v44 }
 0x35a   :  { %v483_v47 = vsel %vm188_vm0, %v482_v17, %v477_v46 }
 0x35c   :  { %v480_v21 = vpop.permute.xlu1 %479  ;;  %v518_v34 = vpop.permute.xlu0 %517 }
 0x35d   :  { %v484_v50 = vsel %vm375_vm3, %v483_v47, %v480_v21 }
 0x35e   :  { %v488_v51 = vrot.slane %v484_v50, %v982_v2 }
 0x360   :  { %v515_v24 = vpop.permute.xlu1 %514  ;;  %v489_v27 = vmul.f32 %v488_v51, %v988_v8  ;;  %v490_v56 = vmul.f32 %v488_v51, %v991_v9  ;;  %v491_v57 = vmul.f32 %v488_v51, %v994_v10  ;;  %v492_v30 = vmul.f32 %v488_v51, %v997_v12 }
 0x361   :  { %v493_v59 = vmul.f32 %v488_v51, %v1004_v16  ;;  %v494_v60 = vmul.f32 %v488_v51, %v1009_v35  ;;  %v521_v62 = vsel %vm188_vm0, %v520_v53, %v515_v24  ;;  %v495_v31 = vmul.f32 %v488_v51, %v1016_v20 }
 0x362   :  { %v496_v63 = vmul.f32 %v488_v51, %v1022_v61  ;;  %v497_v0 = vmul.f32 %v488_v51, %v1028_v29  ;;  %v522_v8 = vsel %vm375_vm3, %v521_v62, %v518_v34  ;;  %v498_v9 = vmul.f32 %v488_v51, %v1034_v36 }
 0x363   :  { %v499_v10 = vmul.f32 %v488_v51, %v1040_v42  ;;  %v500_v12 = vmul.f32 %v488_v51, %v1046_v45  ;;  %v526_v16 = vrot.slane %v522_v8, %v982_v2  ;;  %v501_v35 = vmul.f32 %v488_v51, %v1052_v48 }
 0x364   :  { %v502_v1 = vmul.f32 %v488_v51, %v1058_v52  ;;  %v503_v20 = vmul.f32 %v488_v51, %v1064_v54  ;;  %v504_v61 = vmul.f32 %v488_v51, %v1070_v58 }
 0x365   :  { %v527_v29 = vadd.f32 %v526_v16, %v489_v27  ;;  %v528_v3 = vadd.f32 %v526_v16, %v490_v56  ;;  %v529_v41 = vadd.f32 %v526_v16, %v491_v57  ;;  %v530_v4 = vadd.f32 %v526_v16, %v492_v30 }
 0x366   :  { %v531_v36 = vadd.f32 %v526_v16, %v493_v59  ;;  %v532_v6 = vadd.f32 %v526_v16, %v494_v60  ;;  %v533_v42 = vadd.f32 %v526_v16, %v495_v31  ;;  %v534_v7 = vadd.f32 %v526_v16, %v496_v63 }
 0x367   :  { %v535_v45 = vadd.f32 %v526_v16, %v497_v0  ;;  %v536_v14 = vadd.f32 %v526_v16, %v498_v9  ;;  %v537_v2 = vadd.f32 %v526_v16, %v499_v10  ;;  %v538_v15 = vadd.f32 %v526_v16, %v500_v12 }
 0x368   :  { %v539_v48 = vadd.f32 %v526_v16, %v501_v35  ;;  %v540_v38 = vadd.f32 %v526_v16, %v502_v1  ;;  %v541_v52 = vadd.f32 %v526_v16, %v503_v20  ;;  %v542_v39 = vadd.f32 %v526_v16, %v504_v61 }
 0x369   :  { %v543_v54 = vmax.f32 %v527_v29, 0.0  ;;  %v544_v49 = vmax.f32 %v528_v3, 0.0  ;;  %v545_v58 = vmax.f32 %v529_v41, 0.0  ;;  %v546_v18 = vmax.f32 %v530_v4, 0.0 }
 0x36a   :  { %v547_v19 = vmax.f32 %v531_v36, 0.0  ;;  %v548_v55 = vmax.f32 %v532_v6, 0.0  ;;  %v549_v22 = vmax.f32 %v533_v42, 0.0  ;;  %v550_v23 = vmax.f32 %v534_v7, 0.0 }
 0x36b   :  { %v551_v25 = vmax.f32 %v535_v45, 0.0  ;;  %v552_v26 = vmax.f32 %v536_v14, 0.0  ;;  %v553_v28 = vmax.f32 %v537_v2, 0.0  ;;  %v554_v5 = vmax.f32 %v538_v15, 0.0 }
 0x36c   :  { %v555_v32 = vmax.f32 %v539_v48, 0.0  ;;  %v556_v33 = vmax.f32 %v540_v38, 0.0  ;;  %v557_v13 = vmax.f32 %v541_v52, 0.0  ;;  %v558_v37 = vmax.f32 %v542_v39, 0.0 }
 0x36d   :  { %v694_v40 = vpack.c.bf16 %v543_v54, %v543_v54  ;;  %v695_v11 = vpack.c.bf16 %v544_v49, %v544_v49  ;;  %v696_v43 = vpack.c.bf16 %v545_v58, %v545_v58  ;;  %v697_v44 = vpack.c.bf16 %v546_v18, %v546_v18 }
 0x36e   :  { %v698_v17 = vpack.c.bf16 %v547_v19, %v547_v19  ;;  %v699_v46 = vpack.c.bf16 %v548_v55, %v548_v55  ;;  %v700_v47 = vpack.c.bf16 %v549_v22, %v549_v22  ;;  %v701_v21 = vpack.c.bf16 %v550_v23, %v550_v23 }
 0x36f   :  { %v702_v50 = vpack.c.bf16 %v551_v25, %v551_v25  ;;  %v703_v51 = vpack.c.bf16 %v552_v26, %v552_v26  ;;  %v704_v24 = vpack.c.bf16 %v553_v28, %v553_v28  ;;  %v705_v34 = vpack.c.bf16 %v554_v5, %v554_v5  ;;  %624 = vst.msk [vmem:[%s1193_s5] sm:$0xf] %vm623_vm4, %v694_v40 }
 0x370   :  { %625 = vst.msk [vmem:[%s1193_s5 + $0x4] sm:$0xf] %vm623_vm4, %v695_v11  ;;  %626 = vst.msk [vmem:[%s1193_s5 + $0x8] sm:$0xf] %vm623_vm4, %v696_v43  ;;  %v706_v53 = vpack.c.bf16 %v555_v32, %v555_v32  ;;  %v707_v27 = vpack.c.bf16 %v556_v33, %v556_v33  ;;  %v708_v56 = vpack.c.bf16 %v557_v13, %v557_v13 }
 0x371   :  { %627 = vst.msk [vmem:[%s1193_s5 + $0xc] sm:$0xf] %vm623_vm4, %v697_v44  ;;  %v709_v57 = vpack.c.bf16 %v558_v37, %v558_v37  ;;  %628 = vst.msk [vmem:[%s1193_s5 + $0x10] sm:$0xf] %vm623_vm4, %v698_v17 }
 0x372   :  { %629 = vst.msk [vmem:[%s1193_s5 + $0x14] sm:$0xf] %vm623_vm4, %v699_v46  ;;  %630 = vst.msk [vmem:[%s1193_s5 + $0x18] sm:$0xf] %vm623_vm4, %v700_v47 }
 0x373   :  { %631 = vst.msk [vmem:[%s1193_s5 + $0x1c] sm:$0xf] %vm623_vm4, %v701_v21  ;;  %632 = vst.msk [vmem:[%s1193_s5 + $0x20] sm:$0xf] %vm623_vm4, %v702_v50 }
 0x374   :  { %633 = vst.msk [vmem:[%s1193_s5 + $0x24] sm:$0xf] %vm623_vm4, %v703_v51  ;;  %634 = vst.msk [vmem:[%s1193_s5 + $0x28] sm:$0xf] %vm623_vm4, %v704_v24 }
 0x375   :  { %635 = vst.msk [vmem:[%s1193_s5 + $0x2c] sm:$0xf] %vm623_vm4, %v705_v34  ;;  %636 = vst.msk [vmem:[%s1193_s5 + $0x30] sm:$0xf] %vm623_vm4, %v706_v53 }
 0x376   :  { %637 = vst.msk [vmem:[%s1193_s5 + $0x34] sm:$0xf] %vm623_vm4, %v707_v27  ;;  %638 = vst.msk [vmem:[%s1193_s5 + $0x38] sm:$0xf] %vm623_vm4, %v708_v56 }
 0x377   :  { %639 = vst.msk [vmem:[%s1193_s5 + $0x3c] sm:$0xf] %vm623_vm4, %v709_v57 }

// kernel: vae_forward.13
= control target key start
LH: loop header
LB: loop body
LE: loop exit
PB: predicated region body
PF: predicated region fallthrough
CT: control target
= control target key end

     0   :  { %vm282_vm0 = vcmask 588800   ;;  %vm379_vm1 = vcmask 1043456   ;;  %vm736_vm2 = vcmask 97280   ;;  %s1651_s1 = inlined_call_operand.vmem [shape: bf16[72,12], index: 1, kind: input, shape index: {}]   ;;  %s1652_s0 = inlined_call_operand.vmem [shape: bf16[512,72], index: 0, kind: input, shape index: {}]   ;;  %s1653_s2 = inlined_call_operand.vmem [shape: f32[1,12], index: 2, kind: input, shape index: {}]   ;;  %s1654_s3 = inlined_call_operand.vmem [shape: f32[512,12], index: 3, kind: output, shape index: {}]  }
   0x1   :  { %v998_v0 = vld [vmem:[%s1651_s1] sm:$0xff]   ;;  %v999_v1 = vld [vmem:[%s1651_s1 + $0x8] sm:$0xff]   ;;  %v1000_v2 = vld [vmem:[%s1651_s1 + $0x10] sm:$0xff]  }
   0x2   :  { %912 = vmatprep.subr.bf16.mxu0 %v998_v0  ;;  %986 = vmatprep.subr.bf16.mxu1 %v998_v0  ;;  %v1003_v3 = vld [vmem:[%s1652_s0] sm:$0xff]   ;;  %v1001_v5 = vld [vmem:[%s1651_s1 + $0x18] sm:$0xff]   ;;  %v1005_v8 = vld [vmem:[%s1652_s0 + $0x8] sm:$0xff]  }
   0x3   :  { %913 = vmatpush3.bf16.msra.mxu0 %v998_v0  ;;  %991 = vmatpush3.bf16.msra.mxu1 %v998_v0  ;;  %v1004_v4 = vld [vmem:[%s1652_s0 + $0x80] sm:$0xff]   ;;  %v1006_v9 = vld [vmem:[%s1652_s0 + $0x88] sm:$0xff]   ;;  %v1007_v10 = vld [vmem:[%s1652_s0 + $0x10] sm:$0xff]  }
   0x4   :  { %914 = vmatprep.subr.bf16.mxu0 %v999_v1  ;;  %987 = vmatprep.subr.bf16.mxu1 %v999_v1  ;;  %v1002_v6 = vld [vmem:[%s1651_s1 + $0x20] ss:$0 sps:$4 sm:$0xff]   ;;  %v1008_v11 = vld [vmem:[%s1652_s0 + $0x90] sm:$0xff]   ;;  %v1009_v12 = vld [vmem:[%s1652_s0 + $0x18] sm:$0xff]  }
   0x5   :  { %922 = vmatprep.mubr.msk.bf16.mxu0 %vm282_vm0, %v1003_v3  ;;  %954 = vmatprep.mubr.msk.bf16.mxu1 %vm282_vm0, %v1004_v4  ;;  %v381_v7 = vsel %vm379_vm1, %v1002_v6, 0  ;;  %v1010_v13 = vld [vmem:[%s1652_s0 + $0x98] sm:$0xff]   ;;  %v1011_v14 = vld [vmem:[%s1652_s0 + $0x20] sm:$0xff]   ;;  %v1013_v16 = vld [vmem:[%s1652_s0 + $0x28] sm:$0xff]  }
   0x6   :  { %v1012_v15 = vld [vmem:[%s1652_s0 + $0xa0] sm:$0xff]   ;;  %v1014_v17 = vld [vmem:[%s1652_s0 + $0xa8] sm:$0xff]   ;;  %v1015_v18 = vld [vmem:[%s1652_s0 + $0x30] sm:$0xff]  }
   0x7   :  { %915 = vmatpush3.bf16.msra.mxu0 %v999_v1  ;;  %992 = vmatpush3.bf16.msra.mxu1 %v999_v1  ;;  %v1016_v19 = vld [vmem:[%s1652_s0 + $0xb0] sm:$0xff]   ;;  %v1017_v20 = vld [vmem:[%s1652_s0 + $0x38] sm:$0xff]   ;;  %v1019_v22 = vld [vmem:[%s1652_s0 + $0x40] sm:$0xff]  }
   0x8   :  { %916 = vmatprep.subr.bf16.mxu0 %v1000_v2  ;;  %988 = vmatprep.subr.bf16.mxu1 %v1000_v2  ;;  %v1018_v21 = vld [vmem:[%s1652_s0 + $0xb8] sm:$0xff]   ;;  %v1020_v23 = vld [vmem:[%s1652_s0 + $0xc0] sm:$0xff]   ;;  %v1021_v24 = vld [vmem:[%s1652_s0 + $0x48] sm:$0xff]  }
   0x9   :  { %v1022_v25 = vld [vmem:[%s1652_s0 + $0xc8] sm:$0xff]   ;;  %v1023_v26 = vld [vmem:[%s1652_s0 + $0x50] sm:$0xff]   ;;  %v1025_v28 = vld [vmem:[%s1652_s0 + $0x58] sm:$0xff]  }
   0xa   :  { %v1024_v27 = vld [vmem:[%s1652_s0 + $0xd0] sm:$0xff]   ;;  %v1026_v29 = vld [vmem:[%s1652_s0 + $0xd8] sm:$0xff]   ;;  %v1027_v30 = vld [vmem:[%s1652_s0 + $0x60] sm:$0xff]  }
   0xb   :  { %917 = vmatpush3.bf16.msra.mxu0 %v1000_v2  ;;  %993 = vmatpush3.bf16.msra.mxu1 %v1000_v2  ;;  %v1028_v31 = vld [vmem:[%s1652_s0 + $0xe0] sm:$0xff]   ;;  %v1029_v32 = vld [vmem:[%s1652_s0 + $0x68] sm:$0xff]   ;;  %v1031_v34 = vld [vmem:[%s1652_s0 + $0x70] sm:$0xff]  }
   0xc   :  { %918 = vmatprep.subr.bf16.mxu0 %v1001_v5  ;;  %989 = vmatprep.subr.bf16.mxu1 %v1001_v5  ;;  %v1030_v33 = vld [vmem:[%s1652_s0 + $0xe8] sm:$0xff]   ;;  %v1032_v35 = vld [vmem:[%s1652_s0 + $0xf0] sm:$0xff]   ;;  %v1033_v36 = vld [vmem:[%s1652_s0 + $0x78] sm:$0xff]  }
   0xd   :  { %v1034_v37 = vld [vmem:[%s1652_s0 + $0xf8] sm:$0xff]   ;;  %v1329_v38 = vld [vmem:[%s1653_s2] ss:$0 sm:$0xff] }
   0xf   :  { %919 = vmatpush3.bf16.msra.mxu0 %v1001_v5  ;;  %994 = vmatpush3.bf16.msra.mxu1 %v1001_v5 }
  0x10   :  { %996 = vmatprep.subr.msk.bf16.mxu0 %vm379_vm1, %v1002_v6  ;;  %997 = vmatprep.subr.msk.bf16.mxu1 %vm379_vm1, %v1002_v6 }
  0x13   :  { %921 = vmatpush3.bf16.msra.mxu0 %v381_v7  ;;  %995 = vmatpush3.bf16.msra.mxu1 %v381_v7 }
  0x16   :  { %923 = vmatmul.mubr.msk.bf16.vlgmr.msra.gmra.mrb[0].mxu0 %vm282_vm0, %v1005_v8  ;;  %955 = vmatmul.mubr.msk.bf16.vlgmr.msra.gmra.mrb[0].mxu1 %vm282_vm0, %v1006_v9 }
  0x17   :  { %926 = vmatprep.mubr.msk.bf16.mxu0 %vm282_vm0, %v1007_v10  ;;  %958 = vmatprep.mubr.msk.bf16.mxu1 %vm282_vm0, %v1008_v11 }
  0x1e   :  { %927 = vmatmul.mubr.msk.bf16.gmra.mrb[4].mxu0 %vm282_vm0, %v1009_v12  ;;  %959 = vmatmul.mubr.msk.bf16.gmra.mrb[4].mxu1 %vm282_vm0, %v1010_v13 }
  0x1f   :  { %930 = vmatprep.mubr.msk.bf16.mxu0 %vm282_vm0, %v1011_v14  ;;  %962 = vmatprep.mubr.msk.bf16.mxu1 %vm282_vm0, %v1012_v15 }
  0x26   :  { %931 = vmatmul.mubr.msk.bf16.gmra.mrb[8].mxu0 %vm282_vm0, %v1013_v16  ;;  %963 = vmatmul.mubr.msk.bf16.gmra.mrb[8].mxu1 %vm282_vm0, %v1014_v17 }
  0x27   :  { %934 = vmatprep.mubr.msk.bf16.mxu0 %vm282_vm0, %v1015_v18  ;;  %966 = vmatprep.mubr.msk.bf16.mxu1 %vm282_vm0, %v1016_v19 }
  0x2e   :  { %935 = vmatmul.mubr.msk.bf16.gmra.mrb[12].mxu0 %vm282_vm0, %v1017_v20  ;;  %967 = vmatmul.mubr.msk.bf16.gmra.mrb[12].mxu1 %vm282_vm0, %v1018_v21 }
  0x2f   :  { %938 = vmatprep.mubr.msk.bf16.mxu0 %vm282_vm0, %v1019_v22  ;;  %970 = vmatprep.mubr.msk.bf16.mxu1 %vm282_vm0, %v1020_v23 }
  0x36   :  { %939 = vmatmul.mubr.msk.bf16.gmra.mrb[16].mxu0 %vm282_vm0, %v1021_v24  ;;  %971 = vmatmul.mubr.msk.bf16.gmra.mrb[16].mxu1 %vm282_vm0, %v1022_v25 }
  0x37   :  { %942 = vmatprep.mubr.msk.bf16.mxu0 %vm282_vm0, %v1023_v26  ;;  %974 = vmatprep.mubr.msk.bf16.mxu1 %vm282_vm0, %v1024_v27 }
  0x3e   :  { %943 = vmatmul.mubr.msk.bf16.gmra.mrb[20].mxu0 %vm282_vm0, %v1025_v28  ;;  %975 = vmatmul.mubr.msk.bf16.gmra.mrb[20].mxu1 %vm282_vm0, %v1026_v29 }
  0x3f   :  { %946 = vmatprep.mubr.msk.bf16.mxu0 %vm282_vm0, %v1027_v30  ;;  %978 = vmatprep.mubr.msk.bf16.mxu1 %vm282_vm0, %v1028_v31 }
  0x46   :  { %947 = vmatmul.mubr.msk.bf16.gmra.mrb[24].mxu0 %vm282_vm0, %v1029_v32  ;;  %979 = vmatmul.mubr.msk.bf16.gmra.mrb[24].mxu1 %vm282_vm0, %v1030_v33 }
  0x47   :  { %950 = vmatprep.mubr.msk.bf16.mxu0 %vm282_vm0, %v1031_v34  ;;  %982 = vmatprep.mubr.msk.bf16.mxu1 %vm282_vm0, %v1032_v35 }
  0x4e   :  { %951 = vmatmul.mubr.msk.bf16.gmra.mrb[28].mxu0 %vm282_vm0, %v1033_v36  ;;  %983 = vmatmul.mubr.msk.bf16.gmra.mrb[28].mxu1 %vm282_vm0, %v1034_v37 }
  0xe9   :  { %v924_v39 = vpop.f32.mrb[0].mxu0  ;;  %v956_v40 = vpop.f32.mrb[0].mxu1 }
  0xea   :  { %v426_v41 = vadd.f32 %v924_v39, %v1329_v38  ;;  %v554_v42 = vadd.f32 %v956_v40, %v1329_v38  ;;  %v417_v43 = vpop.f32.mrb[1].mxu0  ;;  %v545_v44 = vpop.f32.mrb[1].mxu1 }
  0xeb   :  { %v418_v45 = vadd.f32 %v1329_v38, %v417_v43  ;;  %v546_v46 = vadd.f32 %v1329_v38, %v545_v44  ;;  %v925_v47 = vpop.f32.mrb[2].mxu0  ;;  %v957_v48 = vpop.f32.mrb[2].mxu1 }
  0xec   :  { %1035 = vtanh.f32 %v426_v41  ;;  %v429_v49 = vadd.f32 %v925_v47, %v1329_v38  ;;  %v420_v50 = vpop.f32.mrb[3].mxu0  ;;  %v548_v51 = vpop.f32.mrb[3].mxu1  ;;  %v557_v52 = vadd.f32 %v957_v48, %v1329_v38 }
  0xed   :  { %1037 = vtanh.f32 %v554_v42  ;;  %v421_v53 = vadd.f32 %v1329_v38, %v420_v50  ;;  %v549_v54 = vadd.f32 %v1329_v38, %v548_v51 }
  0xee   :  { %1039 = vtanh.f32 %v418_v45 }
  0xef   :  { %1041 = vtanh.f32 %v546_v46 }
  0xf0   :  { %1043 = vtanh.f32 %v429_v49 }
  0xf1   :  { %1045 = vtanh.f32 %v557_v52  ;;  %v928_v55 = vpop.f32.mrb[4].mxu0  ;;  %v960_v56 = vpop.f32.mrb[4].mxu1 }
  0xf2   :  { %1047 = vtanh.f32 %v421_v53  ;;  %v442_v57 = vadd.f32 %v928_v55, %v1329_v38  ;;  %v570_v58 = vadd.f32 %v960_v56, %v1329_v38  ;;  %v433_v59 = vpop.f32.mrb[5].mxu0  ;;  %v561_v60 = vpop.f32.mrb[5].mxu1 }
  0xf3   :  { %1049 = vtanh.f32 %v549_v54  ;;  %v434_v61 = vadd.f32 %v1329_v38, %v433_v59  ;;  %v562_v62 = vadd.f32 %v1329_v38, %v561_v60  ;;  %v929_v63 = vpop.f32.mrb[6].mxu0  ;;  %v961_v0 = vpop.f32.mrb[6].mxu1 }
  0xf4   :  { %1051 = vtanh.f32 %v442_v57  ;;  %v445_v1 = vadd.f32 %v929_v63, %v1329_v38  ;;  %v436_v2 = vpop.f32.mrb[7].mxu0  ;;  %v564_v3 = vpop.f32.mrb[7].mxu1  ;;  %v573_v4 = vadd.f32 %v961_v0, %v1329_v38 }
  0xf5   :  { %1053 = vtanh.f32 %v570_v58  ;;  %v437_v6 = vadd.f32 %v1329_v38, %v436_v2  ;;  %v565_v8 = vadd.f32 %v1329_v38, %v564_v3 }
  0xf6   :  { %v1036_v5 = vpop.eup %1035  ;;  %1055 = vtanh.f32 %v434_v61 }
  0xf7   :  { %v1038_v7 = vpop.eup %1037  ;;  %739 = vst.msk [vmem:[%s1654_s3 + $0x10] sm:$0xff] %vm736_vm2, %v1036_v5  ;;  %1057 = vtanh.f32 %v562_v62 }
  0xf8   :  { %v1040_v9 = vpop.eup %1039  ;;  %771 = vst.msk [vmem:[%s1654_s3 + $0x110] sm:$0xff] %vm736_vm2, %v1038_v7  ;;  %1059 = vtanh.f32 %v445_v1 }
  0xf9   :  { %v1042_v10 = vpop.eup %1041  ;;  %737 = vst.msk [vmem:[%s1654_s3] sm:$0xff] %vm736_vm2, %v1040_v9  ;;  %1061 = vtanh.f32 %v573_v4  ;;  %v932_v11 = vpop.f32.mrb[8].mxu0 }
  0xfa   :  { %v964_v12 = vpop.f32.mrb[8].mxu1  ;;  %v1044_v13 = vpop.eup %1043  ;;  %769 = vst.msk [vmem:[%s1654_s3 + $0x100] sm:$0xff] %vm736_vm2, %v1042_v10  ;;  %1063 = vtanh.f32 %v437_v6  ;;  %v458_v14 = vadd.f32 %v932_v11, %v1329_v38 }
  0xfb   :  { %v586_v15 = vadd.f32 %v964_v12, %v1329_v38  ;;  %v449_v16 = vpop.f32.mrb[9].mxu0  ;;  %v577_v17 = vpop.f32.mrb[9].mxu1  ;;  %740 = vst.msk [vmem:[%s1654_s3 + $0x18] sm:$0xff] %vm736_vm2, %v1044_v13  ;;  %1065 = vtanh.f32 %v565_v8 }
  0xfc   :  { %v1046_v18 = vpop.eup %1045  ;;  %v450_v19 = vadd.f32 %v1329_v38, %v449_v16  ;;  %v578_v20 = vadd.f32 %v1329_v38, %v577_v17  ;;  %v933_v21 = vpop.f32.mrb[10].mxu0  ;;  %1067 = vtanh.f32 %v458_v14 }
  0xfd   :  { %v965_v22 = vpop.f32.mrb[10].mxu1  ;;  %v1048_v23 = vpop.eup %1047  ;;  %772 = vst.msk [vmem:[%s1654_s3 + $0x118] sm:$0xff] %vm736_vm2, %v1046_v18  ;;  %v461_v24 = vadd.f32 %v933_v21, %v1329_v38  ;;  %1069 = vtanh.f32 %v586_v15 }
  0xfe   :  { %v452_v25 = vpop.f32.mrb[11].mxu0  ;;  %v580_v26 = vpop.f32.mrb[11].mxu1  ;;  %738 = vst.msk [vmem:[%s1654_s3 + $0x8] sm:$0xff] %vm736_vm2, %v1048_v23  ;;  %v589_v28 = vadd.f32 %v965_v22, %v1329_v38  ;;  %1071 = vtanh.f32 %v450_v19 }
  0xff   :  { %v1050_v27 = vpop.eup %1049  ;;  %v453_v30 = vadd.f32 %v1329_v38, %v452_v25  ;;  %1073 = vtanh.f32 %v578_v20  ;;  %v581_v32 = vadd.f32 %v1329_v38, %v580_v26 }
 0x100   :  { %v1052_v29 = vpop.eup %1051  ;;  %770 = vst.msk [vmem:[%s1654_s3 + $0x108] sm:$0xff] %vm736_vm2, %v1050_v27  ;;  %1075 = vtanh.f32 %v461_v24 }
 0x101   :  { %v1054_v31 = vpop.eup %1053  ;;  %743 = vst.msk [vmem:[%s1654_s3 + $0x30] sm:$0xff] %vm736_vm2, %v1052_v29  ;;  %1077 = vtanh.f32 %v589_v28  ;;  %v936_v35 = vpop.f32.mrb[12].mxu0 }
 0x102   :  { %v1056_v33 = vpop.eup %1055  ;;  %775 = vst.msk [vmem:[%s1654_s3 + $0x130] sm:$0xff] %vm736_vm2, %v1054_v31  ;;  %v968_v36 = vpop.f32.mrb[12].mxu1  ;;  %1079 = vtanh.f32 %v453_v30  ;;  %v474_v39 = vadd.f32 %v936_v35, %v1329_v38 }
 0x103   :  { %v1058_v34 = vpop.eup %1057  ;;  %741 = vst.msk [vmem:[%s1654_s3 + $0x20] sm:$0xff] %vm736_vm2, %v1056_v33  ;;  %v602_v40 = vadd.f32 %v968_v36, %v1329_v38  ;;  %v465_v41 = vpop.f32.mrb[13].mxu0  ;;  %1081 = vtanh.f32 %v581_v32 }
 0x104   :  { %v1060_v37 = vpop.eup %1059  ;;  %773 = vst.msk [vmem:[%s1654_s3 + $0x120] sm:$0xff] %vm736_vm2, %v1058_v34  ;;  %v593_v42 = vpop.f32.mrb[13].mxu1  ;;  %v466_v44 = vadd.f32 %v1329_v38, %v465_v41  ;;  %1083 = vtanh.f32 %v474_v39 }
 0x105   :  { %v1062_v43 = vpop.eup %1061  ;;  %744 = vst.msk [vmem:[%s1654_s3 + $0x38] sm:$0xff] %vm736_vm2, %v1060_v37  ;;  %v594_v45 = vadd.f32 %v1329_v38, %v593_v42  ;;  %v937_v46 = vpop.f32.mrb[14].mxu0  ;;  %1085 = vtanh.f32 %v602_v40 }
 0x106   :  { %v969_v47 = vpop.f32.mrb[14].mxu1  ;;  %v1064_v48 = vpop.eup %1063  ;;  %776 = vst.msk [vmem:[%s1654_s3 + $0x138] sm:$0xff] %vm736_vm2, %v1062_v43  ;;  %v477_v49 = vadd.f32 %v937_v46, %v1329_v38  ;;  %1087 = vtanh.f32 %v466_v44 }
 0x107   :  { %v468_v50 = vpop.f32.mrb[15].mxu0  ;;  %v596_v51 = vpop.f32.mrb[15].mxu1  ;;  %742 = vst.msk [vmem:[%s1654_s3 + $0x28] sm:$0xff] %vm736_vm2, %v1064_v48  ;;  %v605_v53 = vadd.f32 %v969_v47, %v1329_v38  ;;  %1089 = vtanh.f32 %v594_v45 }
 0x108   :  { %v1066_v52 = vpop.eup %1065  ;;  %v469_v55 = vadd.f32 %v1329_v38, %v468_v50  ;;  %v597_v57 = vadd.f32 %v1329_v38, %v596_v51  ;;  %1091 = vtanh.f32 %v477_v49 }
 0x109   :  { %v1068_v54 = vpop.eup %1067  ;;  %774 = vst.msk [vmem:[%s1654_s3 + $0x128] sm:$0xff] %vm736_vm2, %v1066_v52  ;;  %1093 = vtanh.f32 %v605_v53  ;;  %v940_v60 = vpop.f32.mrb[16].mxu0 }
 0x10a   :  { %v1070_v56 = vpop.eup %1069  ;;  %747 = vst.msk [vmem:[%s1654_s3 + $0x50] sm:$0xff] %vm736_vm2, %v1068_v54  ;;  %v972_v61 = vpop.f32.mrb[16].mxu1  ;;  %1095 = vtanh.f32 %v469_v55  ;;  %v490_v63 = vadd.f32 %v940_v60, %v1329_v38 }
 0x10b   :  { %v1072_v58 = vpop.eup %1071  ;;  %779 = vst.msk [vmem:[%s1654_s3 + $0x150] sm:$0xff] %vm736_vm2, %v1070_v56  ;;  %v618_v0 = vadd.f32 %v972_v61, %v1329_v38  ;;  %v481_v1 = vpop.f32.mrb[17].mxu0  ;;  %1097 = vtanh.f32 %v597_v57 }
 0x10c   :  { %v1074_v59 = vpop.eup %1073  ;;  %745 = vst.msk [vmem:[%s1654_s3 + $0x40] sm:$0xff] %vm736_vm2, %v1072_v58  ;;  %v609_v2 = vpop.f32.mrb[17].mxu1  ;;  %v482_v4 = vadd.f32 %v1329_v38, %v481_v1  ;;  %1099 = vtanh.f32 %v490_v63 }
 0x10d   :  { %v1076_v62 = vpop.eup %1075  ;;  %777 = vst.msk [vmem:[%s1654_s3 + $0x140] sm:$0xff] %vm736_vm2, %v1074_v59  ;;  %v610_v5 = vadd.f32 %v1329_v38, %v609_v2  ;;  %v941_v6 = vpop.f32.mrb[18].mxu0  ;;  %1101 = vtanh.f32 %v618_v0 }
 0x10e   :  { %v1078_v3 = vpop.eup %1077  ;;  %748 = vst.msk [vmem:[%s1654_s3 + $0x58] sm:$0xff] %vm736_vm2, %v1076_v62  ;;  %v973_v7 = vpop.f32.mrb[18].mxu1  ;;  %v493_v9 = vadd.f32 %v941_v6, %v1329_v38  ;;  %1103 = vtanh.f32 %v482_v4 }
 0x10f   :  { %v1080_v8 = vpop.eup %1079  ;;  %780 = vst.msk [vmem:[%s1654_s3 + $0x158] sm:$0xff] %vm736_vm2, %v1078_v3  ;;  %v484_v10 = vpop.f32.mrb[19].mxu0  ;;  %v621_v13 = vadd.f32 %v973_v7, %v1329_v38  ;;  %1105 = vtanh.f32 %v610_v5 }
 0x110   :  { %v612_v11 = vpop.f32.mrb[19].mxu1  ;;  %v1082_v12 = vpop.eup %1081  ;;  %746 = vst.msk [vmem:[%s1654_s3 + $0x48] sm:$0xff] %vm736_vm2, %v1080_v8  ;;  %v485_v15 = vadd.f32 %v1329_v38, %v484_v10  ;;  %1107 = vtanh.f32 %v493_v9 }
 0x111   :  { %v1084_v14 = vpop.eup %1083  ;;  %778 = vst.msk [vmem:[%s1654_s3 + $0x148] sm:$0xff] %vm736_vm2, %v1082_v12  ;;  %v613_v17 = vadd.f32 %v1329_v38, %v612_v11  ;;  %1109 = vtanh.f32 %v621_v13  ;;  %v944_v20 = vpop.f32.mrb[20].mxu0 }
 0x112   :  { %v1086_v16 = vpop.eup %1085  ;;  %751 = vst.msk [vmem:[%s1654_s3 + $0x70] sm:$0xff] %vm736_vm2, %v1084_v14  ;;  %v976_v21 = vpop.f32.mrb[20].mxu1  ;;  %1111 = vtanh.f32 %v485_v15  ;;  %v506_v23 = vadd.f32 %v944_v20, %v1329_v38 }
 0x113   :  { %v1088_v18 = vpop.eup %1087  ;;  %783 = vst.msk [vmem:[%s1654_s3 + $0x170] sm:$0xff] %vm736_vm2, %v1086_v16  ;;  %v634_v24 = vadd.f32 %v976_v21, %v1329_v38  ;;  %v497_v25 = vpop.f32.mrb[21].mxu0  ;;  %1113 = vtanh.f32 %v613_v17 }
 0x114   :  { %v1090_v19 = vpop.eup %1089  ;;  %749 = vst.msk [vmem:[%s1654_s3 + $0x60] sm:$0xff] %vm736_vm2, %v1088_v18  ;;  %v625_v26 = vpop.f32.mrb[21].mxu1  ;;  %v498_v28 = vadd.f32 %v1329_v38, %v497_v25  ;;  %1115 = vtanh.f32 %v506_v23 }
 0x115   :  { %v1092_v22 = vpop.eup %1091  ;;  %781 = vst.msk [vmem:[%s1654_s3 + $0x160] sm:$0xff] %vm736_vm2, %v1090_v19  ;;  %v626_v29 = vadd.f32 %v1329_v38, %v625_v26  ;;  %v945_v30 = vpop.f32.mrb[22].mxu0  ;;  %1117 = vtanh.f32 %v634_v24 }
 0x116   :  { %v1094_v27 = vpop.eup %1093  ;;  %752 = vst.msk [vmem:[%s1654_s3 + $0x78] sm:$0xff] %vm736_vm2, %v1092_v22  ;;  %v977_v31 = vpop.f32.mrb[22].mxu1  ;;  %v509_v33 = vadd.f32 %v945_v30, %v1329_v38  ;;  %1119 = vtanh.f32 %v498_v28 }
 0x117   :  { %v1096_v32 = vpop.eup %1095  ;;  %784 = vst.msk [vmem:[%s1654_s3 + $0x178] sm:$0xff] %vm736_vm2, %v1094_v27  ;;  %v500_v34 = vpop.f32.mrb[23].mxu0  ;;  %v637_v37 = vadd.f32 %v977_v31, %v1329_v38  ;;  %1121 = vtanh.f32 %v626_v29 }
 0x118   :  { %v628_v35 = vpop.f32.mrb[23].mxu1  ;;  %v1098_v36 = vpop.eup %1097  ;;  %750 = vst.msk [vmem:[%s1654_s3 + $0x68] sm:$0xff] %vm736_vm2, %v1096_v32  ;;  %v501_v40 = vadd.f32 %v1329_v38, %v500_v34  ;;  %1123 = vtanh.f32 %v509_v33 }
 0x119   :  { %v1100_v39 = vpop.eup %1099  ;;  %782 = vst.msk [vmem:[%s1654_s3 + $0x168] sm:$0xff] %vm736_vm2, %v1098_v36  ;;  %v629_v42 = vadd.f32 %v1329_v38, %v628_v35  ;;  %1125 = vtanh.f32 %v637_v37  ;;  %v948_v45 = vpop.f32.mrb[24].mxu0 }
 0x11a   :  { %v1102_v41 = vpop.eup %1101  ;;  %755 = vst.msk [vmem:[%s1654_s3 + $0x90] sm:$0xff] %vm736_vm2, %v1100_v39  ;;  %v980_v46 = vpop.f32.mrb[24].mxu1  ;;  %1127 = vtanh.f32 %v501_v40  ;;  %v522_v48 = vadd.f32 %v948_v45, %v1329_v38 }
 0x11b   :  { %v1104_v43 = vpop.eup %1103  ;;  %787 = vst.msk [vmem:[%s1654_s3 + $0x190] sm:$0xff] %vm736_vm2, %v1102_v41  ;;  %v650_v49 = vadd.f32 %v980_v46, %v1329_v38  ;;  %v513_v50 = vpop.f32.mrb[25].mxu0  ;;  %1129 = vtanh.f32 %v629_v42 }
 0x11c   :  { %v1106_v44 = vpop.eup %1105  ;;  %753 = vst.msk [vmem:[%s1654_s3 + $0x80] sm:$0xff] %vm736_vm2, %v1104_v43  ;;  %v641_v51 = vpop.f32.mrb[25].mxu1  ;;  %v514_v53 = vadd.f32 %v1329_v38, %v513_v50  ;;  %1131 = vtanh.f32 %v522_v48 }
 0x11d   :  { %v1108_v47 = vpop.eup %1107  ;;  %785 = vst.msk [vmem:[%s1654_s3 + $0x180] sm:$0xff] %vm736_vm2, %v1106_v44  ;;  %v642_v54 = vadd.f32 %v1329_v38, %v641_v51  ;;  %v949_v55 = vpop.f32.mrb[26].mxu0  ;;  %1133 = vtanh.f32 %v650_v49 }
 0x11e   :  { %v1110_v52 = vpop.eup %1109  ;;  %756 = vst.msk [vmem:[%s1654_s3 + $0x98] sm:$0xff] %vm736_vm2, %v1108_v47  ;;  %v981_v56 = vpop.f32.mrb[26].mxu1  ;;  %v525_v58 = vadd.f32 %v949_v55, %v1329_v38  ;;  %1135 = vtanh.f32 %v514_v53 }
 0x11f   :  { %v1112_v57 = vpop.eup %1111  ;;  %788 = vst.msk [vmem:[%s1654_s3 + $0x198] sm:$0xff] %vm736_vm2, %v1110_v52  ;;  %v516_v59 = vpop.f32.mrb[27].mxu0  ;;  %v653_v62 = vadd.f32 %v981_v56, %v1329_v38  ;;  %1137 = vtanh.f32 %v642_v54 }
 0x120   :  { %v644_v60 = vpop.f32.mrb[27].mxu1  ;;  %v1114_v61 = vpop.eup %1113  ;;  %754 = vst.msk [vmem:[%s1654_s3 + $0x88] sm:$0xff] %vm736_vm2, %v1112_v57  ;;  %v517_v0 = vadd.f32 %v1329_v38, %v516_v59  ;;  %1139 = vtanh.f32 %v525_v58 }
 0x121   :  { %v1116_v63 = vpop.eup %1115  ;;  %786 = vst.msk [vmem:[%s1654_s3 + $0x188] sm:$0xff] %vm736_vm2, %v1114_v61  ;;  %v645_v2 = vadd.f32 %v1329_v38, %v644_v60  ;;  %1141 = vtanh.f32 %v653_v62  ;;  %v952_v5 = vpop.f32.mrb[28].mxu0 }
 0x122   :  { %v1118_v1 = vpop.eup %1117  ;;  %759 = vst.msk [vmem:[%s1654_s3 + $0xb0] sm:$0xff] %vm736_vm2, %v1116_v63  ;;  %v984_v6 = vpop.f32.mrb[28].mxu1  ;;  %1143 = vtanh.f32 %v517_v0  ;;  %v538_v8 = vadd.f32 %v952_v5, %v1329_v38 }
 0x123   :  { %v1120_v3 = vpop.eup %1119  ;;  %791 = vst.msk [vmem:[%s1654_s3 + $0x1b0] sm:$0xff] %vm736_vm2, %v1118_v1  ;;  %v666_v9 = vadd.f32 %v984_v6, %v1329_v38  ;;  %v529_v10 = vpop.f32.mrb[29].mxu0  ;;  %1145 = vtanh.f32 %v645_v2 }
 0x124   :  { %v1122_v4 = vpop.eup %1121  ;;  %757 = vst.msk [vmem:[%s1654_s3 + $0xa0] sm:$0xff] %vm736_vm2, %v1120_v3  ;;  %v657_v11 = vpop.f32.mrb[29].mxu1  ;;  %v530_v13 = vadd.f32 %v1329_v38, %v529_v10  ;;  %1147 = vtanh.f32 %v538_v8 }
 0x125   :  { %v1124_v7 = vpop.eup %1123  ;;  %789 = vst.msk [vmem:[%s1654_s3 + $0x1a0] sm:$0xff] %vm736_vm2, %v1122_v4  ;;  %v658_v14 = vadd.f32 %v1329_v38, %v657_v11  ;;  %v953_v15 = vpop.f32.mrb[30].mxu0  ;;  %1149 = vtanh.f32 %v666_v9 }
 0x126   :  { %v1126_v12 = vpop.eup %1125  ;;  %760 = vst.msk [vmem:[%s1654_s3 + $0xb8] sm:$0xff] %vm736_vm2, %v1124_v7  ;;  %v985_v16 = vpop.f32.mrb[30].mxu1  ;;  %v541_v18 = vadd.f32 %v953_v15, %v1329_v38  ;;  %1151 = vtanh.f32 %v530_v13 }
 0x127   :  { %v1128_v17 = vpop.eup %1127  ;;  %792 = vst.msk [vmem:[%s1654_s3 + $0x1b8] sm:$0xff] %vm736_vm2, %v1126_v12  ;;  %v532_v19 = vpop.f32.mrb[31].mxu0  ;;  %v669_v22 = vadd.f32 %v985_v16, %v1329_v38  ;;  %1153 = vtanh.f32 %v658_v14 }
 0x128   :  { %v660_v20 = vpop.f32.mrb[31].mxu1  ;;  %v1130_v21 = vpop.eup %1129  ;;  %758 = vst.msk [vmem:[%s1654_s3 + $0xa8] sm:$0xff] %vm736_vm2, %v1128_v17  ;;  %v533_v24 = vadd.f32 %v1329_v38, %v532_v19  ;;  %1155 = vtanh.f32 %v541_v18 }
 0x129   :  { %v1132_v23 = vpop.eup %1131  ;;  %790 = vst.msk [vmem:[%s1654_s3 + $0x1a8] sm:$0xff] %vm736_vm2, %v1130_v21  ;;  %v661_v26 = vadd.f32 %v1329_v38, %v660_v20  ;;  %1157 = vtanh.f32 %v669_v22 }
 0x12a   :  { %v1134_v25 = vpop.eup %1133  ;;  %763 = vst.msk [vmem:[%s1654_s3 + $0xd0] sm:$0xff] %vm736_vm2, %v1132_v23  ;;  %1159 = vtanh.f32 %v533_v24 }
 0x12b   :  { %v1136_v27 = vpop.eup %1135  ;;  %795 = vst.msk [vmem:[%s1654_s3 + $0x1d0] sm:$0xff] %vm736_vm2, %v1134_v25  ;;  %1161 = vtanh.f32 %v661_v26 }
 0x12c   :  { %v1138_v28 = vpop.eup %1137  ;;  %761 = vst.msk [vmem:[%s1654_s3 + $0xc0] sm:$0xff] %vm736_vm2, %v1136_v27 }
 0x12d   :  { %v1140_v29 = vpop.eup %1139  ;;  %793 = vst.msk [vmem:[%s1654_s3 + $0x1c0] sm:$0xff] %vm736_vm2, %v1138_v28 }
 0x12e   :  { %v1142_v38 = vpop.eup %1141  ;;  %764 = vst.msk [vmem:[%s1654_s3 + $0xd8] sm:$0xff] %vm736_vm2, %v1140_v29 }
 0x12f   :  { %v1144_v30 = vpop.eup %1143  ;;  %796 = vst.msk [vmem:[%s1654_s3 + $0x1d8] sm:$0xff] %vm736_vm2, %v1142_v38 }
 0x130   :  { %v1146_v31 = vpop.eup %1145  ;;  %762 = vst.msk [vmem:[%s1654_s3 + $0xc8] sm:$0xff] %vm736_vm2, %v1144_v30 }
 0x131   :  { %v1148_v32 = vpop.eup %1147  ;;  %794 = vst.msk [vmem:[%s1654_s3 + $0x1c8] sm:$0xff] %vm736_vm2, %v1146_v31 }
 0x132   :  { %v1150_v33 = vpop.eup %1149  ;;  %767 = vst.msk [vmem:[%s1654_s3 + $0xf0] sm:$0xff] %vm736_vm2, %v1148_v32 }
 0x133   :  { %v1152_v34 = vpop.eup %1151  ;;  %799 = vst.msk [vmem:[%s1654_s3 + $0x1f0] sm:$0xff] %vm736_vm2, %v1150_v33 }
 0x134   :  { %v1154_v35 = vpop.eup %1153  ;;  %765 = vst.msk [vmem:[%s1654_s3 + $0xe0] sm:$0xff] %vm736_vm2, %v1152_v34 }
 0x135   :  { %v1156_v36 = vpop.eup %1155  ;;  %797 = vst.msk [vmem:[%s1654_s3 + $0x1e0] sm:$0xff] %vm736_vm2, %v1154_v35 }
 0x136   :  { %v1158_v37 = vpop.eup %1157  ;;  %768 = vst.msk [vmem:[%s1654_s3 + $0xf8] sm:$0xff] %vm736_vm2, %v1156_v36 }
 0x137   :  { %v1160_v39 = vpop.eup %1159  ;;  %800 = vst.msk [vmem:[%s1654_s3 + $0x1f8] sm:$0xff] %vm736_vm2, %v1158_v37 }
 0x138   :  { %v1162_v40 = vpop.eup %1161  ;;  %766 = vst.msk [vmem:[%s1654_s3 + $0xe8] sm:$0xff] %vm736_vm2, %v1160_v39 }
 0x139   :  { %798 = vst.msk [vmem:[%s1654_s3 + $0x1e8] sm:$0xff] %vm736_vm2, %v1162_v40 }

</bundles_post_ra>
